<compile_context>
chip_gen: v7x
topology: tpu7x:2x2x1
jax: 0.10.0
libtpu: 0.0.40
codegen_flags: <defaults>
</compile_context>

<pallas_src>
import functools

import jax
import jax.numpy as jnp
from jax.experimental import pallas as pl
from jax.experimental.pallas import tpu as pltpu

LANE = 128


def _round_up(v, m):
    return (v + m - 1) // m * m


# ----------------------------- fused Pallas kernel -------------------------- #

def _fused_cnn_kernel(x_ref, cw_ref, cb_ref, fw_ref, fb_ref, hw_ref, hb_ref,
                      out_ref, *, bn, h, w, cin):
    """Whole forward pass for one block of `bn` images (one grid step).

    x_ref : (bn, H+2, W+2, Cin)  bf16  zero-padded NHWC image block
    cw_ref: (9, Cin, Cp)         bf16  3x3 conv weight, tap-major, lane-padded
    cb_ref: (1, Cp)              f32
    fw_ref: (Cp, Fp)             bf16  backbone fc (num_ftrs, lane-padded)
    fb_ref: (1, Fp)              f32
    hw_ref: (Fp, Lp)             bf16  all attribute heads, concatenated + padded
    hb_ref: (1, Lp)              f32
    out_ref: (bn, Lp)            f32   concatenated attribute logits
    """
    cp = cb_ref.shape[-1]

    # --- 3x3 "same" conv as 9 accumulating matmuls on shifted slices
    #     (in-kernel im2col), f32 accumulation on the MXU. ---
    acc = None
    for tap in range(9):
        ki, kj = tap // 3, tap % 3
        patch = x_ref[:, ki:ki + h, kj:kj + w, :].reshape(bn * h * w, cin)
        part = jnp.dot(patch, cw_ref[tap], preferred_element_type=jnp.float32)
        acc = part if acc is None else acc + part
    conv = jnp.maximum(acc + cb_ref[...], 0.0)                # (bn*H*W, Cp) f32

    # --- fused global average pool (conv epilogue, stays in f32). ---
    pooled = jnp.mean(conv.reshape(bn, h * w, cp), axis=1)    # (bn, Cp)

    # --- backbone fc -> num_ftrs (whole block at once). ---
    ftrs = jnp.dot(pooled.astype(fw_ref.dtype), fw_ref[...],
                   preferred_element_type=jnp.float32) + fb_ref[...]

    # --- all attribute heads in one lane-dense matmul. ---
    logits = jnp.dot(ftrs.astype(hw_ref.dtype), hw_ref[...],
                     preferred_element_type=jnp.float32) + hb_ref[...]
    out_ref[...] = logits.astype(out_ref.dtype)


# ------------------------------ forward wrapper ------------------------------ #

def modified_cnn_forward(params, x_nchw, attributes, class_sizes, block_n=8):
    """Equivalent of ModifiedCNN.forward: backbone(x) then per-attribute Linear,
    fused into one Pallas kernel; per-attribute slicing is plain-JAX glue."""
    x = jnp.transpose(x_nchw, (0, 2, 3, 1)).astype(jnp.bfloat16)   # NCHW -> NHWC
    n, h, w, cin = x.shape

    bn = block_n if n >= block_n else n
    n_pad = _round_up(n, bn)
    # "same" conv padding + pad batch up to a multiple of the block size.
    xp = jnp.pad(x, ((0, n_pad - n), (1, 1), (1, 1), (0, 0)))
    hp, wp = h + 2, w + 2

    cw, cb = params["conv_w"], params["conv_b"]
    fw, fb = params["fc_w"], params["fc_b"]
    hw_, hb = params["heads_w"], params["heads_b"]
    cp, fp, lp = cw.shape[-1], fw.shape[-1], hw_.shape[-1]

    kernel = functools.partial(_fused_cnn_kernel, bn=bn, h=h, w=w, cin=cin)
    logits = pl.pallas_call(
        kernel,
        grid=(n_pad // bn,),
        in_specs=[
            pl.BlockSpec((bn, hp, wp, cin), lambda i: (i, 0, 0, 0)),   # image blk
            pl.BlockSpec((9, cin, cp), lambda i: (0, 0, 0)),           # conv w
            pl.BlockSpec((1, cp), lambda i: (0, 0)),                   # conv b
            pl.BlockSpec((cp, fp), lambda i: (0, 0)),                  # fc w
            pl.BlockSpec((1, fp), lambda i: (0, 0)),                   # fc b
            pl.BlockSpec((fp, lp), lambda i: (0, 0)),                  # heads w
            pl.BlockSpec((1, lp), lambda i: (0, 0)),                   # heads b
        ],
        out_specs=pl.BlockSpec((bn, lp), lambda i: (i, 0)),
        out_shape=jax.ShapeDtypeStruct((n_pad, lp), jnp.float32),
        compiler_params=pltpu.CompilerParams(
            dimension_semantics=("parallel",)),
    )(xp, cw, cb, fw, fb, hw_, hb)

    logits = logits[:n]                                        # (N, Lp)
    out, off = {}, 0
    for attr, cs in zip(attributes, class_sizes):
        out[attr] = logits[:, off:off + cs]
        off += cs
    return out


# ------------------------- parameter setup (plain JAX) ----------------------- #

def init_params(key, cin, conv_out, num_ftrs, class_sizes, attributes):
    """PyTorch-layout params: synthetic backbone + one Linear per attribute."""
    keys = jax.random.split(key, 4 + 2 * len(class_sizes))
    p = {
        "conv_w": 0.1 * jax.random.normal(keys[0], (3, 3, cin, conv_out), jnp.float32),
        "conv_b": 0.1 * jax.random.normal(keys[1], (conv_out,), jnp.float32),
        "fc_w":   0.1 * jax.random.normal(keys[2], (conv_out, num_ftrs), jnp.float32),
        "fc_b":   0.1 * jax.random.normal(keys[3], (num_ftrs,), jnp.float32),
    }
    for i, (attr, cs) in enumerate(zip(attributes, class_sizes)):
        p[f"{attr}_w"] = 0.1 * jax.random.normal(keys[4 + 2 * i], (num_ftrs, cs), jnp.float32)
        p[f"{attr}_b"] = 0.1 * jax.random.normal(keys[5 + 2 * i], (cs,), jnp.float32)
    return p


def prepare_kernel_params(p, cin, conv_out, num_ftrs, class_sizes, attributes):
    """Pad lane dims to 128, concat attribute heads, cast matmul weights to bf16.
    Biases stay f32 (added to the f32 accumulator inside the kernel)."""
    cp = _round_up(conv_out, LANE)
    fp = _round_up(num_ftrs, LANE)
    lp = _round_up(sum(class_sizes), LANE)

    cw = jnp.zeros((9, cin, cp), jnp.float32)
    cw = cw.at[:, :, :conv_out].set(p["conv_w"].reshape(9, cin, conv_out))
    cb = jnp.zeros((1, cp), jnp.float32).at[0, :conv_out].set(p["conv_b"])

    fw = jnp.zeros((cp, fp), jnp.float32).at[:conv_out, :num_ftrs].set(p["fc_w"])
    fb = jnp.zeros((1, fp), jnp.float32).at[0, :num_ftrs].set(p["fc_b"])

    hw_ = jnp.zeros((fp, lp), jnp.float32)
    hb = jnp.zeros((1, lp), jnp.float32)
    off = 0
    for attr, cs in zip(attributes, class_sizes):
        hw_ = hw_.at[:num_ftrs, off:off + cs].set(p[f"{attr}_w"])
        hb = hb.at[0, off:off + cs].set(p[f"{attr}_b"])
        off += cs

    return {
        "conv_w": cw.astype(jnp.bfloat16), "conv_b": cb,
        "fc_w": fw.astype(jnp.bfloat16), "fc_b": fb,
        "heads_w": hw_.astype(jnp.bfloat16), "heads_b": hb,
    }


# ----------------------------- pure-JAX reference ---------------------------- #

def reference_forward(p, x_nchw, attributes, class_sizes):
    x = jnp.transpose(x_nchw, (0, 2, 3, 1))
    n, h, w, cin = x.shape
    xp = jnp.pad(x, ((0, 0), (1, 1), (1, 1), (0, 0)))
    conv_out = p["conv_b"].shape[0]
    acc = jnp.zeros((n, h, w, conv_out), jnp.float32)
    for ki in range(3):
        for kj in range(3):
            acc += jnp.einsum("nhwc,cd->nhwd",
                              xp[:, ki:ki + h, kj:kj + w, :], p["conv_w"][ki, kj])
    conv = jax.nn.relu(acc + p["conv_b"])
    feat = conv.reshape(n, h * w, conv_out).mean(axis=1)
    ftrs = feat @ p["fc_w"] + p["fc_b"]
    return {attr: ftrs @ p[f"{attr}_w"] + p[f"{attr}_b"] for attr in attributes}


# --------------------------------- main -------------------------------------- #

if __name__ == "__main__":
    batch, cin, spatial = 2, 4, 16
    conv_out, num_ftrs = 8, 32
    class_sizes = [3, 5, 2]
    attributes = ["color", "shape", "texture"]

    key = jax.random.PRNGKey(0)
    k_x, k_p = jax.random.split(key)
    x = jax.random.normal(k_x, (batch, cin, spatial, spatial), dtype=jnp.float32)

    torch_params = init_params(k_p, cin, conv_out, num_ftrs, class_sizes, attributes)
    kparams = prepare_kernel_params(torch_params, cin, conv_out, num_ftrs,
                                    class_sizes, attributes)

    fwd = jax.jit(functools.partial(modified_cnn_forward,
                                    attributes=tuple(attributes),
                                    class_sizes=tuple(class_sizes)))
    outs = fwd(kparams, x)
    jax.block_until_ready(outs)

    ref = reference_forward(torch_params, x, attributes, class_sizes)
    for attr, cs in zip(attributes, class_sizes):
        assert outs[attr].shape == (batch, cs), (attr, outs[attr].shape)
        err = float(jnp.max(jnp.abs(outs[attr] - ref[attr])))
        assert err < 5e-2, (attr, err)

    print("KERNEL_OK")
</pallas_src>

<mosaic_0001>
module attributes {stable_mosaic.version = 11 : i64} {
  func.func @_fused_cnn_kernel(%arg0: i32, %arg1: memref<2x18x18x4xbf16, #tpu.memory_space<vmem>>, %arg2: memref<9x4x128xbf16, #tpu.memory_space<vmem>>, %arg3: memref<1x128xf32, #tpu.memory_space<vmem>>, %arg4: memref<128x128xbf16, #tpu.memory_space<vmem>>, %arg5: memref<1x128xf32, #tpu.memory_space<vmem>>, %arg6: memref<128x128xbf16, #tpu.memory_space<vmem>>, %arg7: memref<1x128xf32, #tpu.memory_space<vmem>>, %arg8: memref<2x128xf32, #tpu.memory_space<vmem>>) attributes {dimension_semantics = [#tpu.dimension_semantics<parallel>], iteration_bounds = array<i64: 1>, scalar_prefetch = 0 : i64, scratch_operands = 0 : i64, tpu.core_type = #tpu.core_type<tc>, window_params = [{transform_indices = @transform_0, window_bounds = array<i64: 2, 18, 18, 4>}, {pipeline_mode = #tpu.pipeline_mode<synchronous>, transform_indices = @transform_1, window_bounds = array<i64: 9, 4, 128>}, {pipeline_mode = #tpu.pipeline_mode<synchronous>, transform_indices = @transform_2, window_bounds = array<i64: 1, 128>}, {pipeline_mode = #tpu.pipeline_mode<synchronous>, transform_indices = @transform_3, window_bounds = array<i64: 128, 128>}, {pipeline_mode = #tpu.pipeline_mode<synchronous>, transform_indices = @transform_4, window_bounds = array<i64: 1, 128>}, {pipeline_mode = #tpu.pipeline_mode<synchronous>, transform_indices = @transform_5, window_bounds = array<i64: 128, 128>}, {pipeline_mode = #tpu.pipeline_mode<synchronous>, transform_indices = @transform_6, window_bounds = array<i64: 1, 128>}, {transform_indices = @transform_7, window_bounds = array<i64: 2, 128>}]} {
    %c0 = arith.constant 0 : index
    %c0_0 = arith.constant 0 : index
    %c0_1 = arith.constant 0 : index
    %c0_2 = arith.constant 0 : index
    %0 = vector.load %arg1[%c0, %c0_0, %c0_1, %c0_2] : memref<2x18x18x4xbf16, #tpu.memory_space<vmem>>, vector<2x16x16x4xbf16>
    %1 = vector.shape_cast %0 : vector<2x16x16x4xbf16> to vector<512x4xbf16>
    %c0_3 = arith.constant 0 : index
    %c0_4 = arith.constant 0 : index
    %c0_5 = arith.constant 0 : index
    %2 = vector.load %arg2[%c0_3, %c0_4, %c0_5] : memref<9x4x128xbf16, #tpu.memory_space<vmem>>, vector<1x4x128xbf16>
    %3 = vector.shape_cast %2 : vector<1x4x128xbf16> to vector<4x128xbf16>
    %cst = arith.constant dense<0.000000e+00> : vector<512x128xf32>
    %4 = tpu.matmul %1, %3, %cst {dimension_numbers = #tpu.dot_dimension_numbers<[1], [0], [0], [1], [0, 0, 1, 1], [], []>} : vector<512x4xbf16>, vector<4x128xbf16>, vector<512x128xf32> -> vector<512x128xf32>
    %c0_6 = arith.constant 0 : index
    %c0_7 = arith.constant 0 : index
    %c1 = arith.constant 1 : index
    %c0_8 = arith.constant 0 : index
    %5 = vector.load %arg1[%c0_6, %c0_7, %c1, %c0_8] : memref<2x18x18x4xbf16, #tpu.memory_space<vmem>>, vector<2x16x16x4xbf16>
    %6 = vector.shape_cast %5 : vector<2x16x16x4xbf16> to vector<512x4xbf16>
    %c1_9 = arith.constant 1 : index
    %c0_10 = arith.constant 0 : index
    %c0_11 = arith.constant 0 : index
    %7 = vector.load %arg2[%c1_9, %c0_10, %c0_11] : memref<9x4x128xbf16, #tpu.memory_space<vmem>>, vector<1x4x128xbf16>
    %8 = vector.shape_cast %7 : vector<1x4x128xbf16> to vector<4x128xbf16>
    %cst_12 = arith.constant dense<0.000000e+00> : vector<512x128xf32>
    %9 = tpu.matmul %6, %8, %cst_12 {dimension_numbers = #tpu.dot_dimension_numbers<[1], [0], [0], [1], [0, 0, 1, 1], [], []>} : vector<512x4xbf16>, vector<4x128xbf16>, vector<512x128xf32> -> vector<512x128xf32>
    %10 = arith.addf %4, %9 : vector<512x128xf32>
    %c0_13 = arith.constant 0 : index
    %c0_14 = arith.constant 0 : index
    %c2 = arith.constant 2 : index
    %c0_15 = arith.constant 0 : index
    %11 = vector.load %arg1[%c0_13, %c0_14, %c2, %c0_15] : memref<2x18x18x4xbf16, #tpu.memory_space<vmem>>, vector<2x16x16x4xbf16>
    %12 = vector.shape_cast %11 : vector<2x16x16x4xbf16> to vector<512x4xbf16>
    %c2_16 = arith.constant 2 : index
    %c0_17 = arith.constant 0 : index
    %c0_18 = arith.constant 0 : index
    %13 = vector.load %arg2[%c2_16, %c0_17, %c0_18] : memref<9x4x128xbf16, #tpu.memory_space<vmem>>, vector<1x4x128xbf16>
    %14 = vector.shape_cast %13 : vector<1x4x128xbf16> to vector<4x128xbf16>
    %cst_19 = arith.constant dense<0.000000e+00> : vector<512x128xf32>
    %15 = tpu.matmul %12, %14, %cst_19 {dimension_numbers = #tpu.dot_dimension_numbers<[1], [0], [0], [1], [0, 0, 1, 1], [], []>} : vector<512x4xbf16>, vector<4x128xbf16>, vector<512x128xf32> -> vector<512x128xf32>
    %16 = arith.addf %10, %15 : vector<512x128xf32>
    %c0_20 = arith.constant 0 : index
    %c1_21 = arith.constant 1 : index
    %c0_22 = arith.constant 0 : index
    %c0_23 = arith.constant 0 : index
    %17 = vector.load %arg1[%c0_20, %c1_21, %c0_22, %c0_23] : memref<2x18x18x4xbf16, #tpu.memory_space<vmem>>, vector<2x16x16x4xbf16>
    %18 = vector.shape_cast %17 : vector<2x16x16x4xbf16> to vector<512x4xbf16>
    %c3 = arith.constant 3 : index
    %c0_24 = arith.constant 0 : index
    %c0_25 = arith.constant 0 : index
    %19 = vector.load %arg2[%c3, %c0_24, %c0_25] : memref<9x4x128xbf16, #tpu.memory_space<vmem>>, vector<1x4x128xbf16>
    %20 = vector.shape_cast %19 : vector<1x4x128xbf16> to vector<4x128xbf16>
    %cst_26 = arith.constant dense<0.000000e+00> : vector<512x128xf32>
    %21 = tpu.matmul %18, %20, %cst_26 {dimension_numbers = #tpu.dot_dimension_numbers<[1], [0], [0], [1], [0, 0, 1, 1], [], []>} : vector<512x4xbf16>, vector<4x128xbf16>, vector<512x128xf32> -> vector<512x128xf32>
    %22 = arith.addf %16, %21 : vector<512x128xf32>
    %c0_27 = arith.constant 0 : index
    %c1_28 = arith.constant 1 : index
    %c1_29 = arith.constant 1 : index
    %c0_30 = arith.constant 0 : index
    %23 = vector.load %arg1[%c0_27, %c1_28, %c1_29, %c0_30] : memref<2x18x18x4xbf16, #tpu.memory_space<vmem>>, vector<2x16x16x4xbf16>
    %24 = vector.shape_cast %23 : vector<2x16x16x4xbf16> to vector<512x4xbf16>
    %c4 = arith.constant 4 : index
    %c0_31 = arith.constant 0 : index
    %c0_32 = arith.constant 0 : index
    %25 = vector.load %arg2[%c4, %c0_31, %c0_32] : memref<9x4x128xbf16, #tpu.memory_space<vmem>>, vector<1x4x128xbf16>
    %26 = vector.shape_cast %25 : vector<1x4x128xbf16> to vector<4x128xbf16>
    %cst_33 = arith.constant dense<0.000000e+00> : vector<512x128xf32>
    %27 = tpu.matmul %24, %26, %cst_33 {dimension_numbers = #tpu.dot_dimension_numbers<[1], [0], [0], [1], [0, 0, 1, 1], [], []>} : vector<512x4xbf16>, vector<4x128xbf16>, vector<512x128xf32> -> vector<512x128xf32>
    %28 = arith.addf %22, %27 : vector<512x128xf32>
    %c0_34 = arith.constant 0 : index
    %c1_35 = arith.constant 1 : index
    %c2_36 = arith.constant 2 : index
    %c0_37 = arith.constant 0 : index
    %29 = vector.load %arg1[%c0_34, %c1_35, %c2_36, %c0_37] : memref<2x18x18x4xbf16, #tpu.memory_space<vmem>>, vector<2x16x16x4xbf16>
    %30 = vector.shape_cast %29 : vector<2x16x16x4xbf16> to vector<512x4xbf16>
    %c5 = arith.constant 5 : index
    %c0_38 = arith.constant 0 : index
    %c0_39 = arith.constant 0 : index
    %31 = vector.load %arg2[%c5, %c0_38, %c0_39] : memref<9x4x128xbf16, #tpu.memory_space<vmem>>, vector<1x4x128xbf16>
    %32 = vector.shape_cast %31 : vector<1x4x128xbf16> to vector<4x128xbf16>
    %cst_40 = arith.constant dense<0.000000e+00> : vector<512x128xf32>
    %33 = tpu.matmul %30, %32, %cst_40 {dimension_numbers = #tpu.dot_dimension_numbers<[1], [0], [0], [1], [0, 0, 1, 1], [], []>} : vector<512x4xbf16>, vector<4x128xbf16>, vector<512x128xf32> -> vector<512x128xf32>
    %34 = arith.addf %28, %33 : vector<512x128xf32>
    %c0_41 = arith.constant 0 : index
    %c2_42 = arith.constant 2 : index
    %c0_43 = arith.constant 0 : index
    %c0_44 = arith.constant 0 : index
    %35 = vector.load %arg1[%c0_41, %c2_42, %c0_43, %c0_44] : memref<2x18x18x4xbf16, #tpu.memory_space<vmem>>, vector<2x16x16x4xbf16>
    %36 = vector.shape_cast %35 : vector<2x16x16x4xbf16> to vector<512x4xbf16>
    %c6 = arith.constant 6 : index
    %c0_45 = arith.constant 0 : index
    %c0_46 = arith.constant 0 : index
    %37 = vector.load %arg2[%c6, %c0_45, %c0_46] : memref<9x4x128xbf16, #tpu.memory_space<vmem>>, vector<1x4x128xbf16>
    %38 = vector.shape_cast %37 : vector<1x4x128xbf16> to vector<4x128xbf16>
    %cst_47 = arith.constant dense<0.000000e+00> : vector<512x128xf32>
    %39 = tpu.matmul %36, %38, %cst_47 {dimension_numbers = #tpu.dot_dimension_numbers<[1], [0], [0], [1], [0, 0, 1, 1], [], []>} : vector<512x4xbf16>, vector<4x128xbf16>, vector<512x128xf32> -> vector<512x128xf32>
    %40 = arith.addf %34, %39 : vector<512x128xf32>
    %c0_48 = arith.constant 0 : index
    %c2_49 = arith.constant 2 : index
    %c1_50 = arith.constant 1 : index
    %c0_51 = arith.constant 0 : index
    %41 = vector.load %arg1[%c0_48, %c2_49, %c1_50, %c0_51] : memref<2x18x18x4xbf16, #tpu.memory_space<vmem>>, vector<2x16x16x4xbf16>
    %42 = vector.shape_cast %41 : vector<2x16x16x4xbf16> to vector<512x4xbf16>
    %c7 = arith.constant 7 : index
    %c0_52 = arith.constant 0 : index
    %c0_53 = arith.constant 0 : index
    %43 = vector.load %arg2[%c7, %c0_52, %c0_53] : memref<9x4x128xbf16, #tpu.memory_space<vmem>>, vector<1x4x128xbf16>
    %44 = vector.shape_cast %43 : vector<1x4x128xbf16> to vector<4x128xbf16>
    %cst_54 = arith.constant dense<0.000000e+00> : vector<512x128xf32>
    %45 = tpu.matmul %42, %44, %cst_54 {dimension_numbers = #tpu.dot_dimension_numbers<[1], [0], [0], [1], [0, 0, 1, 1], [], []>} : vector<512x4xbf16>, vector<4x128xbf16>, vector<512x128xf32> -> vector<512x128xf32>
    %46 = arith.addf %40, %45 : vector<512x128xf32>
    %c0_55 = arith.constant 0 : index
    %c2_56 = arith.constant 2 : index
    %c2_57 = arith.constant 2 : index
    %c0_58 = arith.constant 0 : index
    %47 = vector.load %arg1[%c0_55, %c2_56, %c2_57, %c0_58] : memref<2x18x18x4xbf16, #tpu.memory_space<vmem>>, vector<2x16x16x4xbf16>
    %48 = vector.shape_cast %47 : vector<2x16x16x4xbf16> to vector<512x4xbf16>
    %c8 = arith.constant 8 : index
    %c0_59 = arith.constant 0 : index
    %c0_60 = arith.constant 0 : index
    %49 = vector.load %arg2[%c8, %c0_59, %c0_60] : memref<9x4x128xbf16, #tpu.memory_space<vmem>>, vector<1x4x128xbf16>
    %50 = vector.shape_cast %49 : vector<1x4x128xbf16> to vector<4x128xbf16>
    %cst_61 = arith.constant dense<0.000000e+00> : vector<512x128xf32>
    %51 = tpu.matmul %48, %50, %cst_61 {dimension_numbers = #tpu.dot_dimension_numbers<[1], [0], [0], [1], [0, 0, 1, 1], [], []>} : vector<512x4xbf16>, vector<4x128xbf16>, vector<512x128xf32> -> vector<512x128xf32>
    %52 = arith.addf %46, %51 : vector<512x128xf32>
    %c0_62 = arith.constant 0 : index
    %c0_63 = arith.constant 0 : index
    %53 = vector.load %arg3[%c0_62, %c0_63] : memref<1x128xf32, #tpu.memory_space<vmem>>, vector<1x128xf32>
    %54 = vector.broadcast %53 : vector<1x128xf32> to vector<512x128xf32>
    %55 = arith.addf %52, %54 : vector<512x128xf32>
    %cst_64 = arith.constant 0.000000e+00 : f32
    %56 = vector.broadcast %cst_64 : f32 to vector<512x128xf32>
    %57 = arith.maximumf %55, %56 : vector<512x128xf32>
    %58 = vector.shape_cast %57 : vector<512x128xf32> to vector<2x256x128xf32>
    %cst_65 = arith.constant dense<0.000000e+00> : vector<2x128xf32>
    %59 = vector.multi_reduction <add>, %58, %cst_65 [1] : vector<2x256x128xf32> to vector<2x128xf32>
    %cst_66 = arith.constant 2.560000e+02 : f32
    %60 = vector.broadcast %cst_66 : f32 to vector<2x128xf32>
    %61 = arith.divf %59, %60 : vector<2x128xf32>
    %62 = arith.truncf %61 : vector<2x128xf32> to vector<2x128xbf16>
    %c0_67 = arith.constant 0 : index
    %c0_68 = arith.constant 0 : index
    %63 = vector.load %arg4[%c0_67, %c0_68] : memref<128x128xbf16, #tpu.memory_space<vmem>>, vector<128x128xbf16>
    %cst_69 = arith.constant dense<0.000000e+00> : vector<2x128xf32>
    %64 = tpu.matmul %62, %63, %cst_69 {dimension_numbers = #tpu.dot_dimension_numbers<[1], [0], [0], [1], [0, 0, 1, 1], [], []>} : vector<2x128xbf16>, vector<128x128xbf16>, vector<2x128xf32> -> vector<2x128xf32>
    %c0_70 = arith.constant 0 : index
    %c0_71 = arith.constant 0 : index
    %65 = vector.load %arg5[%c0_70, %c0_71] : memref<1x128xf32, #tpu.memory_space<vmem>>, vector<1x128xf32>
    %66 = vector.broadcast %65 : vector<1x128xf32> to vector<2x128xf32>
    %67 = arith.addf %64, %66 : vector<2x128xf32>
    %68 = arith.truncf %67 : vector<2x128xf32> to vector<2x128xbf16>
    %c0_72 = arith.constant 0 : index
    %c0_73 = arith.constant 0 : index
    %69 = vector.load %arg6[%c0_72, %c0_73] : memref<128x128xbf16, #tpu.memory_space<vmem>>, vector<128x128xbf16>
    %cst_74 = arith.constant dense<0.000000e+00> : vector<2x128xf32>
    %70 = tpu.matmul %68, %69, %cst_74 {dimension_numbers = #tpu.dot_dimension_numbers<[1], [0], [0], [1], [0, 0, 1, 1], [], []>} : vector<2x128xbf16>, vector<128x128xbf16>, vector<2x128xf32> -> vector<2x128xf32>
    %c0_75 = arith.constant 0 : index
    %c0_76 = arith.constant 0 : index
    %71 = vector.load %arg7[%c0_75, %c0_76] : memref<1x128xf32, #tpu.memory_space<vmem>>, vector<1x128xf32>
    %72 = vector.broadcast %71 : vector<1x128xf32> to vector<2x128xf32>
    %73 = arith.addf %70, %72 : vector<2x128xf32>
    %c0_77 = arith.constant 0 : index
    %c0_78 = arith.constant 0 : index
    %74 = vector.load %arg8[%c0_77, %c0_78] : memref<2x128xf32, #tpu.memory_space<vmem>>, vector<2x128xf32>
    tpu.vector_store %arg8[%c0_77, %c0_78], %73 {strides = array<i32>} : memref<2x128xf32, #tpu.memory_space<vmem>>, vector<2x128xf32>,
    return
  }
  func.func @transform_0(%arg0: i32) -> (i32, i32, i32, i32) {
    %c0_i32 = arith.constant 0 : i32
    %c0_i32_0 = arith.constant 0 : i32
    %c0_i32_1 = arith.constant 0 : i32
    %c0_i32_2 = arith.constant 0 : i32
    return %arg0, %c0_i32, %c0_i32_0, %c0_i32_1 : i32, i32, i32, i32
  }
  func.func @transform_1(%arg0: i32) -> (i32, i32, i32) {
    %c0_i32 = arith.constant 0 : i32
    %c0_i32_0 = arith.constant 0 : i32
    %c0_i32_1 = arith.constant 0 : i32
    %c0_i32_2 = arith.constant 0 : i32
    return %c0_i32, %c0_i32_0, %c0_i32_1 : i32, i32, i32
  }
  func.func @transform_2(%arg0: i32) -> (i32, i32) {
    %c0_i32 = arith.constant 0 : i32
    %c0_i32_0 = arith.constant 0 : i32
    %c0_i32_1 = arith.constant 0 : i32
    return %c0_i32, %c0_i32_0 : i32, i32
  }
  func.func @transform_3(%arg0: i32) -> (i32, i32) {
    %c0_i32 = arith.constant 0 : i32
    %c0_i32_0 = arith.constant 0 : i32
    %c0_i32_1 = arith.constant 0 : i32
    return %c0_i32, %c0_i32_0 : i32, i32
  }
  func.func @transform_4(%arg0: i32) -> (i32, i32) {
    %c0_i32 = arith.constant 0 : i32
    %c0_i32_0 = arith.constant 0 : i32
    %c0_i32_1 = arith.constant 0 : i32
    return %c0_i32, %c0_i32_0 : i32, i32
  }
  func.func @transform_5(%arg0: i32) -> (i32, i32) {
    %c0_i32 = arith.constant 0 : i32
    %c0_i32_0 = arith.constant 0 : i32
    %c0_i32_1 = arith.constant 0 : i32
    return %c0_i32, %c0_i32_0 : i32, i32
  }
  func.func @transform_6(%arg0: i32) -> (i32, i32) {
    %c0_i32 = arith.constant 0 : i32
    %c0_i32_0 = arith.constant 0 : i32
    %c0_i32_1 = arith.constant 0 : i32
    return %c0_i32, %c0_i32_0 : i32, i32
  }
  func.func @transform_7(%arg0: i32) -> (i32, i32) {
    %c0_i32 = arith.constant 0 : i32
    %c0_i32_0 = arith.constant 0 : i32
    return %arg0, %c0_i32 : i32, i32
  }
}

</mosaic_0001>

<bundles_post_ra>
// kernel: modified_cnn_forward.1
= control target key start
LH: loop header
LB: loop body
LE: loop exit
PB: predicated region body
PF: predicated region fallthrough
CT: control target
= control target key end

     0   :  { %vm1090_vm0 = vcmask 1041408   ;;  %vm124_vm1 = vsmask.f32 3328  ;;  %vm125_vm2 = vsmask.f32 7440  ;;  %vm993_vm4 = vcmask 31744   ;;  %s16489_s1 = inlined_call_operand.vmem [shape: bf16[9,4,128], index: 1, kind: input, shape index: {}]   ;;  %s16490_s0 = inlined_call_operand.vmem [shape: bf16[2,18,18,4], index: 0, kind: input, shape index: {}]   ;;  %s16491_s2 = inlined_call_operand.vmem [shape: f32[1,128], index: 2, kind: input, shape index: {}]   ;;  %s16492_s3 = inlined_call_operand.vmem [shape: bf16[128,128], index: 3, kind: input, shape index: {}]   ;;  %s16493_s5 = inlined_call_operand.vmem [shape: bf16[128,128], index: 5, kind: input, shape index: {}]   ;;  %s16494_s4 = inlined_call_operand.vmem [shape: f32[1,128], index: 4, kind: input, shape index: {}]   ;;  %s16495_s6 = inlined_call_operand.vmem [shape: f32[1,128], index: 6, kind: input, shape index: {}]   ;;  %s16496_s7 = inlined_call_operand.vmem [shape: f32[2,128], index: 7, kind: output, shape index: {}]  }
   0x1   :  { %v9695_v0 = vld [vmem:[%s16489_s1 + $0x8] sm:$0x3]  ;;  %v9244_v1 = vld [vmem:[%s16489_s1 + $0x2] sm:$0x3]  ;;  %v28_v5 = vld [vmem:[%s16490_s0 + $0x4] sm:$0xf] }
   0x2   :  { %v27_v2 = vld [vmem:[%s16490_s0] sm:$0xf]  ;;  %11794 = vmatprep.subr.msk.bf16.mxu0 %vm1090_vm0, %v9695_v0  ;;  %11790 = vmatprep.subr.msk.bf16.mxu1 %vm1090_vm0, %v9244_v1  ;;  %v12184_v3 = vsel %vm1090_vm0, %v9695_v0, 0  ;;  %v1092_v4 = vsel %vm1090_vm0, %v9244_v1, 0  ;;  %v92_v6 = vld [vmem:[%s16490_s0 + $0x8] sm:$0x1]  ;;  %vm12222_vm3 = vmor %vm124_vm1, %vm125_vm2 }
   0x3   :  { %10907 = vmatpush3.bf16.msra.mxu0 %v12184_v3  ;;  %10643 = vmatpush3.bf16.msra.mxu1 %v1092_v4  ;;  %v128_v7 = vshrl.u32 %v27_v2, 16  ;;  %v131_v8 = vshll.u32 %v27_v2, 16  ;;  %v137_v9 = vshll.u32 %v28_v5, 16  ;;  %v141_v10 = vshrl.u32 %v28_v5, 16  ;;  %v9599_v11 = vld [vmem:[%s16490_s0 + $0xc] sm:$0xf] }
   0x4   :  { %v147_v12 = vshll.u32 %v92_v6, 16  ;;  %v12200_v13 = vld [vmem:[%s16490_s0 + $0x10] sm:$0xf]  ;;  %v12205_v14 = vld [vmem:[%s16490_s0 + $0x14] sm:$0x1]  ;;  %v3580_v21 = vshrl.u32 %v9599_v11, 16 }
   0x5   :  { %v130_v15 = vrot.slane %v128_v7, 4  ;;  %v133_v16 = vrot.slane %v131_v8, 5  ;;  %v139_v17 = vrot.slane %v137_v9, 5  ;;  %v143_v18 = vrot.slane %v141_v10, 4  ;;  %v12210_v19 = vld [vmem:[%s16489_s1 + $0xa] sm:$0x3] }
   0x6   :  { %v149_v20 = vrot.slane %v147_v12, 5  ;;  %v3583_v22 = vshll.u32 %v9599_v11, 16  ;;  %v3589_v23 = vshll.u32 %v12200_v13, 16  ;;  %11796 = vmatprep.subr.msk.bf16.mxu0 %vm1090_vm0, %v12210_v19  ;;  %v3593_v26 = vshrl.u32 %v12200_v13, 16  ;;  %v29_v28 = vld [vmem:[%s16490_s0 + $0xc] sm:$0xf] }
   0x7   :  { %v134_v24 = vor.u32 %v133_v16, %v130_v15  ;;  %v144_v25 = vor.u32 %v143_v18, %v139_v17  ;;  %v3599_v27 = vshll.u32 %v12205_v14, 16  ;;  %v3582_v30 = vrot.slane %v3580_v21, 4  ;;  %v30_v33 = vld [vmem:[%s16490_s0 + $0x10] sm:$0xf]  ;;  %v93_v39 = vld [vmem:[%s16490_s0 + $0x14] sm:$0x1] }
   0x8   :  { %v3585_v31 = vrot.slane %v3583_v22, 5  ;;  %v3591_v32 = vrot.slane %v3589_v23, 5  ;;  %v3595_v36 = vrot.slane %v3593_v26, 4  ;;  %v152_v40 = vshrl.u32 %v29_v28, 16  ;;  %v9602_v50 = vld [vmem:[%s16490_s0 + $0x18] sm:$0xf] }
   0x9   :  { %v135_v34 = vrot.slane %v134_v24, 4  ;;  %v145_v35 = vrot.slane %v144_v25, 4  ;;  %v3601_v38 = vrot.slane %v3599_v27, 5  ;;  %v155_v41 = vshll.u32 %v29_v28, 16  ;;  %v12242_v55 = vld [vmem:[%s16490_s0 + $0x1c] sm:$0xf] }
   0xa   :  { %v3586_v37 = vor.u32 %v3585_v31, %v3582_v30  ;;  %v3596_v44 = vor.u32 %v3595_v36, %v3591_v32  ;;  %v161_v45 = vshll.u32 %v30_v33, 16  ;;  %v154_v48 = vrot.slane %v152_v40, 4  ;;  %v12252_v60 = vld [vmem:[%s16490_s0 + $0x20] sm:$0x1]  ;;  %v31_v10 = vld [vmem:[%s16490_s0 + $0x18] sm:$0xf] }
   0xb   :  { %v140_v42 = vsel %vm12222_vm3, %v135_v34, %v139_v17  ;;  %v150_v43 = vsel %vm12222_vm3, %v145_v35, %v149_v20  ;;  %v157_v49 = vrot.slane %v155_v41, 5  ;;  %v165_v53 = vshrl.u32 %v30_v33, 16  ;;  %v32_v17 = vld [vmem:[%s16490_s0 + $0x1c] sm:$0xf]  ;;  %v94_v26 = vld [vmem:[%s16490_s0 + $0x20] sm:$0x1] }
   0xc   :  { %v9245_v46 = vcombine.low %v140_v42, %v150_v43  ;;  %v3587_v47 = vrot.slane %v3586_v37, 4  ;;  %v3597_v51 = vrot.slane %v3596_v44, 4  ;;  %v163_v52 = vrot.slane %v161_v45, 5  ;;  %v9605_v33 = vld [vmem:[%s16490_s0 + $0x24] sm:$0xf] }
   0xd   :  { %v171_v54 = vshll.u32 %v93_v39, 16  ;;  %v5027_v57 = vrot.slane %v12200_v13, 5  ;;  %v5030_v58 = vrot.slane %v12205_v14, 5  ;;  %v158_v59 = vor.u32 %v157_v49, %v154_v48  ;;  %v9607_v44 = vld [vmem:[%s16490_s0 + $0x2c] sm:$0x1] }
   0xe   :  { %10644 = vmatprep.mubr.msk.bf16.mxu1 %vm993_vm4, %v9245_v46  ;;  %v3592_v56 = vsel %vm12222_vm3, %v3587_v47, %v3591_v32  ;;  %v3602_v61 = vsel %vm12222_vm3, %v3597_v51, %v3601_v38  ;;  %v167_v62 = vrot.slane %v165_v53, 4  ;;  %v3604_v0 = vshrl.u32 %v9602_v50, 16  ;;  %v33_v51 = vld [vmem:[%s16490_s0 + $0x24] sm:$0xf] }
   0xf   :  { %v173_v63 = vrot.slane %v171_v54, 5  ;;  %v9696_v1 = vcombine.low %v3592_v56, %v3602_v61  ;;  %v159_v2 = vrot.slane %v158_v59, 4  ;;  %v3607_v4 = vshll.u32 %v9602_v50, 16  ;;  %v34_v59 = vld [vmem:[%s16490_s0 + $0x28] sm:$0xf] }
  0x10   :  { %v3613_v5 = vshll.u32 %v12242_v55, 16  ;;  %v168_v6 = vor.u32 %v167_v62, %v163_v52  ;;  %v3606_v7 = vrot.slane %v3604_v0, 4  ;;  %v3617_v8 = vshrl.u32 %v12242_v55, 16 }
  0x11   :  { %v3623_v9 = vshll.u32 %v12252_v60, 16  ;;  %10908 = vmatprep.mubr.msk.bf16.mxu0 %vm993_vm4, %v9696_v1  ;;  %v164_v11 = vsel %vm12222_vm3, %v159_v2, %v163_v52  ;;  %v3609_v12 = vrot.slane %v3607_v4, 5  ;;  %v5034_v16 = vrot.slane %v12242_v55, 5  ;;  %v95_v4 = vld [vmem:[%s16490_s0 + $0x2c] sm:$0x1] }
  0x12   :  { %v3615_v15 = vrot.slane %v3613_v5, 5  ;;  %v169_v18 = vrot.slane %v168_v6, 4  ;;  %v3619_v20 = vrot.slane %v3617_v8, 4  ;;  %v5037_v22 = vrot.slane %v12252_v60, 5 }
  0x13   :  { %v3625_v21 = vrot.slane %v3623_v9, 5  ;;  %v3610_v23 = vor.u32 %v3609_v12, %v3606_v7  ;;  %v12272_v24 = vrot.slane %v5034_v16, 4  ;;  %v5444_v25 = vsel %vm1090_vm0, %v12210_v19, 0  ;;  %v9606_v19 = vld [vmem:[%s16490_s0 + $0x28] sm:$0xf] }
  0x14   :  { %v176_v27 = vshrl.u32 %v31_v10, 16  ;;  %v174_v28 = vsel %vm12222_vm3, %v169_v18, %v173_v63  ;;  %v3620_v30 = vor.u32 %v3619_v20, %v3615_v15  ;;  %v179_v31 = vshll.u32 %v31_v10, 16  ;;  %v9609_v20 = vld [vmem:[%s16490_s0 + $0x34] sm:$0xf] }
  0x15   :  { %v185_v32 = vshll.u32 %v32_v17, 16  ;;  %v9246_v34 = vcombine.low %v164_v11, %v174_v28  ;;  %v3611_v35 = vrot.slane %v3610_v23, 4  ;;  %v189_v37 = vshrl.u32 %v32_v17, 16  ;;  %v9608_v11 = vld [vmem:[%s16490_s0 + $0x30] sm:$0xf] }
  0x16   :  { %v178_v36 = vrot.slane %v176_v27, 4  ;;  %v3621_v38 = vrot.slane %v3620_v30, 4  ;;  %v181_v39 = vrot.slane %v179_v31, 5  ;;  %v195_v41 = vshll.u32 %v94_v26, 16 }
  0x17   :  { %v187_v40 = vrot.slane %v185_v32, 5  ;;  %10645 = vmatmul.mubr.msk.bf16.vlgmr.msra.gmra.mrb[0].mxu1 %vm993_vm4, %v9246_v34  ;;  %v3616_v42 = vsel %vm12222_vm3, %v3611_v35, %v3615_v15  ;;  %v191_v43 = vrot.slane %v189_v37, 4  ;;  %v3628_v45 = vshrl.u32 %v9605_v33, 16  ;;  %v9610_v34 = vld [vmem:[%s16490_s0 + $0x38] sm:$0x1] }
  0x18   :  { %v3631_v46 = vshll.u32 %v9605_v33, 16  ;;  %v3626_v47 = vsel %vm12222_vm3, %v3621_v38, %v3625_v21  ;;  %v182_v48 = vor.u32 %v181_v39, %v178_v36  ;;  %v197_v49 = vrot.slane %v195_v41, 5 }
  0x19   :  { %v3637_v50 = vshll.u32 %v9606_v19, 16  ;;  %v9697_v52 = vcombine.low %v3616_v42, %v3626_v47  ;;  %v192_v53 = vor.u32 %v191_v43, %v187_v40  ;;  %v3630_v54 = vrot.slane %v3628_v45, 4  ;;  %v36_v45 = vld [vmem:[%s16490_s0 + $0x34] sm:$0xf] }
  0x1a   :  { %v3633_v56 = vrot.slane %v3631_v46, 5  ;;  %v183_v61 = vrot.slane %v182_v48, 4  ;;  %v3641_v63 = vshrl.u32 %v9606_v19, 16  ;;  %v3647_v0 = vshll.u32 %v9607_v44, 16 }
  0x1b   :  { %v3639_v62 = vrot.slane %v3637_v50, 5  ;;  %10909 = vmatmul.mubr.msk.bf16.vlgmr.msra.gmra.mrb[0].mxu0 %vm993_vm4, %v9697_v52  ;;  %v193_v1 = vrot.slane %v192_v53, 4  ;;  %v200_v5 = vshrl.u32 %v33_v51, 16  ;;  %v203_v6 = vshll.u32 %v33_v51, 16  ;;  %v96_v52 = vld [vmem:[%s16490_s0 + $0x38] sm:$0x1] }
  0x1c   :  { %v3634_v2 = vor.u32 %v3633_v56, %v3630_v54  ;;  %10973 = vmatpush3.bf16.msra.mxu0 %v5444_v25  ;;  %v188_v7 = vsel %vm12222_vm3, %v183_v61, %v187_v40  ;;  %v3643_v8 = vrot.slane %v3641_v63, 4  ;;  %v3649_v9 = vrot.slane %v3647_v0, 5  ;;  %v35_v40 = vld [vmem:[%s16490_s0 + $0x30] sm:$0xf]  ;;  %v9611_v63 = vld [vmem:[%s16490_s0 + $0x3c] sm:$0xf] }
  0x1d   :  { %v209_v10 = vshll.u32 %v34_v59, 16  ;;  %v198_v12 = vsel %vm12222_vm3, %v193_v1, %v197_v49  ;;  %v202_v17 = vrot.slane %v200_v5, 4  ;;  %v205_v18 = vrot.slane %v203_v6, 5  ;;  %v9612_v5 = vld [vmem:[%s16490_s0 + $0x40] sm:$0xf] }
  0x1e   :  { %v3635_v15 = vrot.slane %v3634_v2, 4  ;;  %v9247_v21 = vcombine.low %v188_v7, %v198_v12  ;;  %v3644_v23 = vor.u32 %v3643_v8, %v3639_v62  ;;  %v213_v26 = vshrl.u32 %v34_v59, 16 }
  0x1f   :  { %v211_v25 = vrot.slane %v209_v10, 5  ;;  %v206_v28 = vor.u32 %v205_v18, %v202_v17  ;;  %v219_v30 = vshll.u32 %v95_v4, 16  ;;  %v3652_v31 = vshrl.u32 %v9608_v11, 16 }
  0x20   :  { %v3640_v27 = vsel %vm12222_vm3, %v3635_v15, %v3639_v62  ;;  %10648 = vmatprep.mubr.msk.bf16.mxu1 %vm993_vm4, %v9247_v21  ;;  %v3645_v32 = vrot.slane %v3644_v23, 4  ;;  %v215_v33 = vrot.slane %v213_v26, 4  ;;  %v3655_v35 = vshll.u32 %v9608_v11, 16 }
  0x21   :  { %v3661_v36 = vshll.u32 %v9609_v20, 16  ;;  %v207_v37 = vrot.slane %v206_v28, 4  ;;  %v221_v19 = vrot.slane %v219_v30, 5  ;;  %v3654_v38 = vrot.slane %v3652_v31, 4  ;;  %v38_v31 = vld [vmem:[%s16490_s0 + $0x40] sm:$0xf] }
  0x22   :  { %v3665_v39 = vshrl.u32 %v9609_v20, 16  ;;  %v3650_v41 = vsel %vm12222_vm3, %v3645_v32, %v3649_v9  ;;  %v216_v42 = vor.u32 %v215_v33, %v211_v25  ;;  %v3657_v43 = vrot.slane %v3655_v35, 5  ;;  %v9613_v20 = vld [vmem:[%s16490_s0 + $0x44] sm:$0x1] }
  0x23   :  { %v3663_v44 = vrot.slane %v3661_v36, 5  ;;  %v9698_v46 = vcombine.low %v3640_v27, %v3650_v41  ;;  %v212_v47 = vsel %vm12222_vm3, %v207_v37, %v211_v25  ;;  %v3671_v49 = vshll.u32 %v9610_v34, 16  ;;  %v37_v25 = vld [vmem:[%s16490_s0 + $0x3c] sm:$0xf] }
  0x24   :  { %v3667_v48 = vrot.slane %v3665_v39, 4  ;;  %v217_v50 = vrot.slane %v216_v42, 4  ;;  %v3658_v51 = vor.u32 %v3657_v43, %v3654_v38  ;;  %v224_v53 = vshrl.u32 %v35_v40, 16  ;;  %v97_v42 = vld [vmem:[%s16490_s0 + $0x44] sm:$0x1] }
  0x25   :  { %v227_v54 = vshll.u32 %v35_v40, 16  ;;  %10912 = vmatprep.mubr.msk.bf16.mxu0 %vm993_vm4, %v9698_v46  ;;  %v3673_v59 = vrot.slane %v3671_v49, 5  ;;  %v233_v61 = vshll.u32 %v36_v45, 16  ;;  %v237_v62 = vshrl.u32 %v36_v45, 16  ;;  %v9615_v49 = vld [vmem:[%s16490_s0 + $0x4c] sm:$0xf] }
  0x26   :  { %v3668_v56 = vor.u32 %v3667_v48, %v3663_v44  ;;  %v222_v0 = vsel %vm12222_vm3, %v217_v50, %v221_v19  ;;  %v3659_v1 = vrot.slane %v3658_v51, 4  ;;  %v226_v2 = vrot.slane %v224_v53, 4 }
  0x27   :  { %v229_v4 = vrot.slane %v227_v54, 5  ;;  %v9248_v6 = vcombine.low %v212_v47, %v222_v0  ;;  %v235_v8 = vrot.slane %v233_v61, 5  ;;  %v239_v9 = vrot.slane %v237_v62, 4 }
  0x28   :  { %v3669_v7 = vrot.slane %v3668_v56, 4  ;;  %v3664_v10 = vsel %vm12222_vm3, %v3659_v1, %v3663_v44  ;;  %v243_v12 = vshll.u32 %v96_v52, 16  ;;  %v3676_v15 = vshrl.u32 %v9611_v63, 16  ;;  %v9614_v44 = vld [vmem:[%s16490_s0 + $0x48] sm:$0xf] }
  0x29   :  { %v230_v11 = vor.u32 %v229_v4, %v226_v2  ;;  %10649 = vmatmul.mubr.msk.bf16.gmra.mrb[4].mxu1 %vm993_vm4, %v9248_v6  ;;  %v240_v18 = vor.u32 %v239_v9, %v235_v8  ;;  %v3679_v21 = vshll.u32 %v9611_v63, 16  ;;  %v3685_v23 = vshll.u32 %v9612_v5, 16  ;;  %v9616_v1 = vld [vmem:[%s16490_s0 + $0x50] sm:$0x1] }
  0x2a   :  { %v3674_v17 = vsel %vm12222_vm3, %v3669_v7, %v3673_v59  ;;  %v245_v28 = vrot.slane %v243_v12, 5  ;;  %v3678_v30 = vrot.slane %v3676_v15, 4  ;;  %v3689_v35 = vshrl.u32 %v9612_v5, 16  ;;  %v40_v15 = vld [vmem:[%s16490_s0 + $0x4c] sm:$0xf] }
  0x2b   :  { %v9699_v26 = vcombine.low %v3664_v10, %v3674_v17  ;;  %v231_v27 = vrot.slane %v230_v11, 4  ;;  %v241_v32 = vrot.slane %v240_v18, 4  ;;  %v3681_v33 = vrot.slane %v3679_v21, 5 }
  0x2c   :  { %v3687_v34 = vrot.slane %v3685_v23, 5  ;;  %v3695_v37 = vshll.u32 %v9613_v20, 16  ;;  %v248_v19 = vshrl.u32 %v37_v25, 16  ;;  %v251_v38 = vshll.u32 %v37_v25, 16 }
  0x2d   :  { %10913 = vmatmul.mubr.msk.bf16.gmra.mrb[4].mxu0 %vm993_vm4, %v9699_v26  ;;  %v236_v36 = vsel %vm12222_vm3, %v231_v27, %v235_v8  ;;  %v246_v39 = vsel %vm12222_vm3, %v241_v32, %v245_v28  ;;  %v3682_v40 = vor.u32 %v3681_v33, %v3678_v30  ;;  %v3691_v41 = vrot.slane %v3689_v35, 4  ;;  %v39_v8 = vld [vmem:[%s16490_s0 + $0x48] sm:$0xf]  ;;  %v98_v26 = vld [vmem:[%s16490_s0 + $0x50] sm:$0x1] }
  0x2e   :  { %v257_v43 = vshll.u32 %v38_v31, 16  ;;  %v9249_v45 = vcombine.low %v236_v36, %v246_v39  ;;  %v3697_v46 = vrot.slane %v3695_v37, 5  ;;  %v250_v47 = vrot.slane %v248_v19, 4 }
  0x2f   :  { %v253_v48 = vrot.slane %v251_v38, 5  ;;  %v3683_v50 = vrot.slane %v3682_v40, 4  ;;  %v3692_v51 = vor.u32 %v3691_v41, %v3687_v34  ;;  %v261_v53 = vshrl.u32 %v38_v31, 16  ;;  %v9618_v38 = vld [vmem:[%s16490_s0 + $0x58] sm:$0xf] }
  0x30   :  { %v259_v52 = vrot.slane %v257_v43, 5  ;;  %10652 = vmatprep.mubr.msk.bf16.mxu1 %vm993_vm4, %v9249_v45  ;;  %v267_v56 = vshll.u32 %v97_v42, 16  ;;  %v3700_v59 = vshrl.u32 %v9614_v44, 16  ;;  %v3703_v61 = vshll.u32 %v9614_v44, 16  ;;  %v9619_v43 = vld [vmem:[%s16490_s0 + $0x5c] sm:$0x1] }
  0x31   :  { %v254_v54 = vor.u32 %v253_v48, %v250_v47  ;;  %v3688_v62 = vsel %vm12222_vm3, %v3683_v50, %v3687_v34  ;;  %v3693_v63 = vrot.slane %v3692_v51, 4  ;;  %v263_v0 = vrot.slane %v261_v53, 4  ;;  %v9617_v34 = vld [vmem:[%s16490_s0 + $0x54] sm:$0xf]  ;;  %v12407_v48 = vld [vmem:[%s16489_s1] sm:$0x3] }
  0x32   :  { %v3709_v2 = vshll.u32 %v9615_v49, 16  ;;  %v269_v5 = vrot.slane %v267_v56, 5  ;;  %v3702_v6 = vrot.slane %v3700_v59, 4  ;;  %v3705_v7 = vrot.slane %v3703_v61, 5  ;;  %v41_v53 = vld [vmem:[%s16490_s0 + $0x54] sm:$0xf]  ;;  %11791 = vmatprep.subr.msk.bf16.mxu1 %vm1090_vm0, %v12407_v48 }
  0x33   :  { %v255_v4 = vrot.slane %v254_v54, 4  ;;  %v3698_v9 = vsel %vm12222_vm3, %v3693_v63, %v3697_v46  ;;  %v264_v10 = vor.u32 %v263_v0, %v259_v52  ;;  %v3713_v12 = vshrl.u32 %v9615_v49, 16 }
  0x34   :  { %v3711_v11 = vrot.slane %v3709_v2, 5  ;;  %v9700_v17 = vcombine.low %v3688_v62, %v3698_v9  ;;  %v3706_v20 = vor.u32 %v3705_v7, %v3702_v6  ;;  %v3719_v21 = vshll.u32 %v9616_v1, 16  ;;  %v42_v62 = vld [vmem:[%s16490_s0 + $0x58] sm:$0xf] }
  0x35   :  { %v260_v18 = vsel %vm12222_vm3, %v255_v4, %v259_v52  ;;  %v265_v23 = vrot.slane %v264_v10, 4  ;;  %v3715_v25 = vrot.slane %v3713_v12, 4  ;;  %v272_v27 = vshrl.u32 %v39_v8, 16  ;;  %v99_v10 = vld [vmem:[%s16490_s0 + $0x5c] sm:$0x1] }
  0x36   :  { %v275_v28 = vshll.u32 %v39_v8, 16  ;;  %10916 = vmatprep.mubr.msk.bf16.mxu0 %vm993_vm4, %v9700_v17  ;;  %v3707_v30 = vrot.slane %v3706_v20, 4  ;;  %v3721_v31 = vrot.slane %v3719_v21, 5  ;;  %v281_v32 = vshll.u32 %v40_v15, 16 }
  0x37   :  { %v285_v33 = vshrl.u32 %v40_v15, 16  ;;  %v270_v35 = vsel %vm12222_vm3, %v265_v23, %v269_v5  ;;  %v3716_v36 = vor.u32 %v3715_v25, %v3711_v11  ;;  %v274_v37 = vrot.slane %v272_v27, 4  ;;  %v9620_v15 = vld [vmem:[%s16490_s0 + $0x60] sm:$0xf]  ;;  %v9621_v23 = vld [vmem:[%s16490_s0 + $0x64] sm:$0xf] }
  0x38   :  { %v277_v19 = vrot.slane %v275_v28, 5  ;;  %v9250_v39 = vcombine.low %v260_v18, %v270_v35  ;;  %v3712_v40 = vsel %vm12222_vm3, %v3707_v30, %v3711_v11  ;;  %v283_v41 = vrot.slane %v281_v32, 5 }
  0x39   :  { %v287_v42 = vrot.slane %v285_v33, 4  ;;  %v3717_v44 = vrot.slane %v3716_v36, 4  ;;  %v291_v46 = vshll.u32 %v98_v26, 16  ;;  %v3724_v47 = vshrl.u32 %v9617_v34, 16 }
  0x3a   :  { %v278_v45 = vor.u32 %v277_v19, %v274_v37  ;;  %10653 = vmatmul.mubr.msk.bf16.gmra.mrb[8].mxu1 %vm993_vm4, %v9250_v39  ;;  %v3727_v50 = vshll.u32 %v9617_v34, 16  ;;  %v3733_v51 = vshll.u32 %v9618_v38, 16  ;;  %v3737_v52 = vshrl.u32 %v9618_v38, 16  ;;  %v9622_v37 = vld [vmem:[%s16490_s0 + $0x68] sm:$0x1] }
  0x3b   :  { %v288_v49 = vor.u32 %v287_v42, %v283_v41  ;;  %v3722_v54 = vsel %vm12222_vm3, %v3717_v44, %v3721_v31  ;;  %v293_v59 = vrot.slane %v291_v46, 5  ;;  %v3726_v61 = vrot.slane %v3724_v47, 4  ;;  %v43_v38 = vld [vmem:[%s16490_s0 + $0x60] sm:$0xf] }
  0x3c   :  { %v279_v56 = vrot.slane %v278_v45, 4  ;;  %v9701_v63 = vcombine.low %v3712_v40, %v3722_v54  ;;  %v3729_v1 = vrot.slane %v3727_v50, 5  ;;  %v3735_v2 = vrot.slane %v3733_v51, 5 }
  0x3d   :  { %v289_v0 = vrot.slane %v288_v49, 4  ;;  %v3739_v5 = vrot.slane %v3737_v52, 4  ;;  %v3743_v6 = vshll.u32 %v9619_v43, 16  ;;  %v296_v7 = vshrl.u32 %v41_v53, 16  ;;  %v44_v43 = vld [vmem:[%s16490_s0 + $0x64] sm:$0xf] }
  0x3e   :  { %v284_v4 = vsel %vm12222_vm3, %v279_v56, %v283_v41  ;;  %10917 = vmatmul.mubr.msk.bf16.gmra.mrb[8].mxu0 %vm993_vm4, %v9701_v63  ;;  %v3730_v9 = vor.u32 %v3729_v1, %v3726_v61  ;;  %v299_v11 = vshll.u32 %v41_v53, 16  ;;  %v305_v12 = vshll.u32 %v42_v62, 16  ;;  %v100_v56 = vld [vmem:[%s16490_s0 + $0x68] sm:$0x1] }
  0x3f   :  { %v294_v8 = vsel %vm12222_vm3, %v289_v0, %v293_v59  ;;  %v3740_v18 = vor.u32 %v3739_v5, %v3735_v2  ;;  %v3745_v20 = vrot.slane %v3743_v6, 5  ;;  %v298_v21 = vrot.slane %v296_v7, 4 }
  0x40   :  { %v9251_v17 = vcombine.low %v284_v4, %v294_v8  ;;  %v3731_v25 = vrot.slane %v3730_v9, 4  ;;  %v301_v26 = vrot.slane %v299_v11, 5  ;;  %v307_v27 = vrot.slane %v305_v12, 5  ;;  %v9624_v8 = vld [vmem:[%s16490_s0 + $0x70] sm:$0xf] }
  0x41   :  { %v309_v28 = vshrl.u32 %v42_v62, 16  ;;  %v3741_v30 = vrot.slane %v3740_v18, 4  ;;  %v315_v31 = vshll.u32 %v99_v10, 16  ;;  %v3748_v32 = vshrl.u32 %v9620_v15, 16  ;;  %v9625_v18 = vld [vmem:[%s16490_s0 + $0x74] sm:$0x1] }
  0x42   :  { %10656 = vmatprep.mubr.msk.bf16.mxu1 %vm993_vm4, %v9251_v17  ;;  %v3751_v33 = vshll.u32 %v9620_v15, 16  ;;  %v3736_v34 = vsel %vm12222_vm3, %v3731_v25, %v3735_v2  ;;  %v302_v35 = vor.u32 %v301_v26, %v298_v21  ;;  %v3757_v19 = vshll.u32 %v9621_v23, 16  ;;  %v9623_v2 = vld [vmem:[%s16490_s0 + $0x6c] sm:$0xf] }
  0x43   :  { %v311_v36 = vrot.slane %v309_v28, 4  ;;  %v3746_v39 = vsel %vm12222_vm3, %v3741_v30, %v3745_v20  ;;  %v317_v40 = vrot.slane %v315_v31, 5  ;;  %v3750_v41 = vrot.slane %v3748_v32, 4 }
  0x44   :  { %v3753_v42 = vrot.slane %v3751_v33, 5  ;;  %v9702_v44 = vcombine.low %v3736_v34, %v3746_v39  ;;  %v303_v45 = vrot.slane %v302_v35, 4  ;;  %v3759_v47 = vrot.slane %v3757_v19, 5  ;;  %v45_v33 = vld [vmem:[%s16490_s0 + $0x6c] sm:$0xf] }
  0x45   :  { %v312_v46 = vor.u32 %v311_v36, %v307_v27  ;;  %v3761_v50 = vshrl.u32 %v9621_v23, 16  ;;  %v3767_v51 = vshll.u32 %v9622_v37, 16  ;;  %v320_v52 = vshrl.u32 %v43_v38, 16  ;;  %v46_v19 = vld [vmem:[%s16490_s0 + $0x70] sm:$0xf] }
  0x46   :  { %v3754_v49 = vor.u32 %v3753_v42, %v3750_v41  ;;  %10920 = vmatprep.mubr.msk.bf16.mxu0 %vm993_vm4, %v9702_v44  ;;  %v308_v53 = vsel %vm12222_vm3, %v303_v45, %v307_v27  ;;  %v323_v59 = vshll.u32 %v43_v38, 16  ;;  %v329_v61 = vshll.u32 %v44_v43, 16  ;;  %v101_v44 = vld [vmem:[%s16490_s0 + $0x74] sm:$0x1] }
  0x47   :  { %v313_v54 = vrot.slane %v312_v46, 4  ;;  %v3763_v63 = vrot.slane %v3761_v50, 4  ;;  %v3769_v0 = vrot.slane %v3767_v51, 5  ;;  %v322_v1 = vrot.slane %v320_v52, 4  ;;  %v9626_v52 = vld [vmem:[%s16490_s0 + $0x78] sm:$0xf] }
  0x48   :  { %v3755_v62 = vrot.slane %v3754_v49, 4  ;;  %v325_v5 = vrot.slane %v323_v59, 5  ;;  %v331_v6 = vrot.slane %v329_v61, 5  ;;  %v333_v7 = vshrl.u32 %v44_v43, 16  ;;  %v9627_v61 = vld [vmem:[%s16490_s0 + $0x7c] sm:$0xf] }
  0x49   :  { %v318_v4 = vsel %vm12222_vm3, %v313_v54, %v317_v40  ;;  %v3764_v11 = vor.u32 %v3763_v63, %v3759_v47  ;;  %v339_v12 = vshll.u32 %v100_v56, 16  ;;  %v3772_v20 = vshrl.u32 %v9623_v2, 16 }
  0x4a   :  { %v9252_v9 = vcombine.low %v308_v53, %v318_v4  ;;  %v3760_v10 = vsel %vm12222_vm3, %v3755_v62, %v3759_v47  ;;  %v326_v15 = vor.u32 %v325_v5, %v322_v1  ;;  %v335_v17 = vrot.slane %v333_v7, 4  ;;  %v9628_v5 = vld [vmem:[%s16490_s0 + $0x80] sm:$0x1] }
  0x4b   :  { %v3775_v21 = vshll.u32 %v9623_v2, 16  ;;  %v3765_v23 = vrot.slane %v3764_v11, 4  ;;  %v341_v25 = vrot.slane %v339_v12, 5  ;;  %v3781_v26 = vshll.u32 %v9624_v8, 16 }
  0x4c   :  { %10657 = vmatmul.mubr.msk.bf16.gmra.mrb[12].mxu1 %vm993_vm4, %v9252_v9  ;;  %v3785_v27 = vshrl.u32 %v9624_v8, 16  ;;  %v327_v28 = vrot.slane %v326_v15, 4  ;;  %v336_v30 = vor.u32 %v335_v17, %v331_v6  ;;  %v3774_v31 = vrot.slane %v3772_v20, 4  ;;  %v47_v8 = vld [vmem:[%s16490_s0 + $0x78] sm:$0xf] }
  0x4d   :  { %v3777_v32 = vrot.slane %v3775_v21, 5  ;;  %v3770_v34 = vsel %vm12222_vm3, %v3765_v23, %v3769_v0  ;;  %v3783_v35 = vrot.slane %v3781_v26, 5  ;;  %v3791_v37 = vshll.u32 %v9625_v18, 16  ;;  %v48_v21 = vld [vmem:[%s16490_s0 + $0x7c] sm:$0xf] }
  0x4e   :  { %v3787_v36 = vrot.slane %v3785_v27, 4  ;;  %v9703_v38 = vcombine.low %v3760_v10, %v3770_v34  ;;  %v332_v39 = vsel %vm12222_vm3, %v327_v28, %v331_v6  ;;  %v337_v40 = vrot.slane %v336_v30, 4  ;;  %v9629_v34 = vld [vmem:[%s16490_s0 + $0x84] sm:$0xf] }
  0x4f   :  { %v3778_v41 = vor.u32 %v3777_v32, %v3774_v31  ;;  %v3793_v43 = vrot.slane %v3791_v37, 5  ;;  %v344_v45 = vshrl.u32 %v45_v33, 16  ;;  %v347_v46 = vshll.u32 %v45_v33, 16  ;;  %v102_v32 = vld [vmem:[%s16490_s0 + $0x80] sm:$0x1] }
  0x50   :  { %v3788_v42 = vor.u32 %v3787_v36, %v3783_v35  ;;  %10921 = vmatmul.mubr.msk.bf16.gmra.mrb[12].mxu0 %vm993_vm4, %v9703_v38  ;;  %v342_v47 = vsel %vm12222_vm3, %v337_v40, %v341_v25  ;;  %v353_v50 = vshll.u32 %v46_v19, 16  ;;  %v357_v51 = vshrl.u32 %v46_v19, 16 }
  0x51   :  { %v3779_v49 = vrot.slane %v3778_v41, 4  ;;  %v9253_v53 = vcombine.low %v332_v39, %v342_v47  ;;  %v346_v56 = vrot.slane %v344_v45, 4  ;;  %v349_v59 = vrot.slane %v347_v46, 5 }
  0x52   :  { %v3789_v54 = vrot.slane %v3788_v42, 4  ;;  %v355_v63 = vrot.slane %v353_v50, 5  ;;  %v359_v0 = vrot.slane %v357_v51, 4  ;;  %v363_v1 = vshll.u32 %v101_v44, 16  ;;  %v9630_v42 = vld [vmem:[%s16490_s0 + $0x88] sm:$0xf] }
  0x53   :  { %v3784_v62 = vsel %vm12222_vm3, %v3779_v49, %v3783_v35  ;;  %10660 = vmatprep.mubr.msk.bf16.mxu1 %vm993_vm4, %v9253_v53  ;;  %v350_v4 = vor.u32 %v349_v59, %v346_v56  ;;  %v3796_v6 = vshrl.u32 %v9626_v52, 16  ;;  %v3799_v7 = vshll.u32 %v9626_v52, 16  ;;  %v9631_v51 = vld [vmem:[%s16490_s0 + $0x8c] sm:$0x1] }
  0x54   :  { %v3794_v2 = vsel %vm12222_vm3, %v3789_v54, %v3793_v43  ;;  %v360_v10 = vor.u32 %v359_v0, %v355_v63  ;;  %v365_v11 = vrot.slane %v363_v1, 5  ;;  %v3805_v12 = vshll.u32 %v9627_v61, 16 }
  0x55   :  { %v9704_v9 = vcombine.low %v3784_v62, %v3794_v2  ;;  %v351_v15 = vrot.slane %v350_v4, 4  ;;  %v3798_v17 = vrot.slane %v3796_v6, 4  ;;  %v3801_v18 = vrot.slane %v3799_v7, 5  ;;  %v50_v2 = vld [vmem:[%s16490_s0 + $0x88] sm:$0xf] }
  0x56   :  { %v3809_v20 = vshrl.u32 %v9627_v61, 16  ;;  %v361_v23 = vrot.slane %v360_v10, 4  ;;  %v3807_v25 = vrot.slane %v3805_v12, 5  ;;  %v3815_v26 = vshll.u32 %v9628_v5, 16  ;;  %v49_v61 = vld [vmem:[%s16490_s0 + $0x84] sm:$0xf] }
  0x57   :  { %10924 = vmatprep.mubr.msk.bf16.mxu0 %vm993_vm4, %v9704_v9  ;;  %v368_v27 = vshrl.u32 %v47_v8, 16  ;;  %v356_v28 = vsel %vm12222_vm3, %v351_v15, %v355_v63  ;;  %v3802_v30 = vor.u32 %v3801_v18, %v3798_v17  ;;  %v371_v33 = vshll.u32 %v47_v8, 16 }
  0x58   :  { %v3811_v31 = vrot.slane %v3809_v20, 4  ;;  %v366_v35 = vsel %vm12222_vm3, %v361_v23, %v365_v11  ;;  %v3817_v36 = vrot.slane %v3815_v26, 5  ;;  %v377_v19 = vshll.u32 %v48_v21, 16  ;;  %v103_v11 = vld [vmem:[%s16490_s0 + $0x8c] sm:$0x1] }
  0x59   :  { %v370_v37 = vrot.slane %v368_v27, 4  ;;  %v9254_v38 = vcombine.low %v356_v28, %v366_v35  ;;  %v3803_v39 = vrot.slane %v3802_v30, 4  ;;  %v373_v41 = vrot.slane %v371_v33, 5  ;;  %v9632_v27 = vld [vmem:[%s16490_s0 + $0x90] sm:$0xf] }
  0x5a   :  { %v3812_v40 = vor.u32 %v3811_v31, %v3807_v25  ;;  %v379_v43 = vrot.slane %v377_v19, 5  ;;  %v381_v44 = vshrl.u32 %v48_v21, 16  ;;  %v387_v45 = vshll.u32 %v102_v32, 16  ;;  %v9633_v33 = vld [vmem:[%s16490_s0 + $0x94] sm:$0xf] }
  0x5b   :  { %v3820_v46 = vshrl.u32 %v9629_v34, 16  ;;  %10661 = vmatmul.mubr.msk.bf16.gmra.mrb[16].mxu1 %vm993_vm4, %v9254_v38  ;;  %v3808_v47 = vsel %vm12222_vm3, %v3803_v39, %v3807_v25  ;;  %v374_v50 = vor.u32 %v373_v41, %v370_v37  ;;  %v3823_v52 = vshll.u32 %v9629_v34, 16  ;;  %v9634_v39 = vld [vmem:[%s16490_s0 + $0x98] sm:$0x1] }
  0x5c   :  { %v3813_v49 = vrot.slane %v3812_v40, 4  ;;  %v383_v53 = vrot.slane %v381_v44, 4  ;;  %v389_v54 = vrot.slane %v387_v45, 5  ;;  %v3829_v59 = vshll.u32 %v9630_v42, 16 }
  0x5d   :  { %v3822_v56 = vrot.slane %v3820_v46, 4  ;;  %v375_v63 = vrot.slane %v374_v50, 4  ;;  %v3825_v0 = vrot.slane %v3823_v52, 5  ;;  %v3833_v1 = vshrl.u32 %v9630_v42, 16  ;;  %v51_v46 = vld [vmem:[%s16490_s0 + $0x90] sm:$0xf] }
  0x5e   :  { %v3818_v62 = vsel %vm12222_vm3, %v3813_v49, %v3817_v36  ;;  %v384_v5 = vor.u32 %v383_v53, %v379_v43  ;;  %v3831_v6 = vrot.slane %v3829_v59, 5  ;;  %v3839_v7 = vshll.u32 %v9631_v51, 16  ;;  %v52_v52 = vld [vmem:[%s16490_s0 + $0x94] sm:$0xf] }
  0x5f   :  { %v9705_v4 = vcombine.low %v3808_v47, %v3818_v62  ;;  %v380_v8 = vsel %vm12222_vm3, %v375_v63, %v379_v43  ;;  %v3826_v9 = vor.u32 %v3825_v0, %v3822_v56  ;;  %v3835_v10 = vrot.slane %v3833_v1, 4  ;;  %v104_v63 = vld [vmem:[%s16490_s0 + $0x98] sm:$0x1] }
  0x60   :  { %v392_v12 = vshrl.u32 %v49_v61, 16  ;;  %v385_v15 = vrot.slane %v384_v5, 4  ;;  %v3841_v17 = vrot.slane %v3839_v7, 5  ;;  %v395_v18 = vshll.u32 %v49_v61, 16 }
  0x61   :  { %10925 = vmatmul.mubr.msk.bf16.gmra.mrb[16].mxu0 %vm993_vm4, %v9705_v4  ;;  %v401_v20 = vshll.u32 %v50_v2, 16  ;;  %v3827_v21 = vrot.slane %v3826_v9, 4  ;;  %v3836_v23 = vor.u32 %v3835_v10, %v3831_v6  ;;  %v405_v26 = vshrl.u32 %v50_v2, 16  ;;  %v9953_v2 = vld [vmem:[%s16489_s1 + $0xc] sm:$0x3] }
  0x62   :  { %v394_v25 = vrot.slane %v392_v12, 4  ;;  %v390_v28 = vsel %vm12222_vm3, %v385_v15, %v389_v54  ;;  %v397_v30 = vrot.slane %v395_v18, 5  ;;  %v411_v32 = vshll.u32 %v103_v11, 16  ;;  %11797 = vmatprep.subr.msk.bf16.mxu0 %vm1090_vm0, %v9953_v2  ;;  %v9636_v15 = vld [vmem:[%s16490_s0 + $0xa0] sm:$0xf] }
  0x63   :  { %v403_v31 = vrot.slane %v401_v20, 5  ;;  %v9255_v34 = vcombine.low %v380_v8, %v390_v28  ;;  %v3832_v35 = vsel %vm12222_vm3, %v3827_v21, %v3831_v6  ;;  %v3837_v36 = vrot.slane %v3836_v23, 4  ;;  %v9635_v8 = vld [vmem:[%s16490_s0 + $0x9c] sm:$0xf]  ;;  %v9639_v2 = vld [vmem:[%s16490_s0 + $0xac] sm:$0xf] }
  0x64   :  { %v407_v37 = vrot.slane %v405_v26, 4  ;;  %v398_v19 = vor.u32 %v397_v30, %v394_v25  ;;  %v413_v38 = vrot.slane %v411_v32, 5  ;;  %v3844_v40 = vshrl.u32 %v9632_v27, 16  ;;  %v9637_v26 = vld [vmem:[%s16490_s0 + $0xa4] sm:$0x1] }
  0x65   :  { %v3847_v41 = vshll.u32 %v9632_v27, 16  ;;  %10664 = vmatprep.mubr.msk.bf16.mxu1 %vm993_vm4, %v9255_v34  ;;  %v3842_v42 = vsel %vm12222_vm3, %v3837_v36, %v3841_v17  ;;  %v3853_v44 = vshll.u32 %v9633_v33, 16  ;;  %v3857_v45 = vshrl.u32 %v9633_v33, 16  ;;  %v53_v34 = vld [vmem:[%s16490_s0 + $0x9c] sm:$0xf] }
  0x66   :  { %v408_v43 = vor.u32 %v407_v37, %v403_v31  ;;  %v9706_v47 = vcombine.low %v3832_v35, %v3842_v42  ;;  %v399_v49 = vrot.slane %v398_v19, 4  ;;  %v3846_v50 = vrot.slane %v3844_v40, 4 }
  0x67   :  { %v3849_v51 = vrot.slane %v3847_v41, 5  ;;  %v3855_v54 = vrot.slane %v3853_v44, 5  ;;  %v3859_v56 = vrot.slane %v3857_v45, 4  ;;  %v3863_v59 = vshll.u32 %v9634_v39, 16  ;;  %v105_v45 = vld [vmem:[%s16490_s0 + $0xa4] sm:$0x1] }
  0x68   :  { %v409_v53 = vrot.slane %v408_v43, 4  ;;  %10928 = vmatprep.mubr.msk.bf16.mxu0 %vm993_vm4, %v9706_v47  ;;  %v404_v61 = vsel %vm12222_vm3, %v399_v49, %v403_v31  ;;  %v416_v0 = vshrl.u32 %v51_v46, 16  ;;  %v419_v1 = vshll.u32 %v51_v46, 16 }
  0x69   :  { %v3850_v62 = vor.u32 %v3849_v51, %v3846_v50  ;;  %v3860_v5 = vor.u32 %v3859_v56, %v3855_v54  ;;  %v3865_v6 = vrot.slane %v3863_v59, 5  ;;  %v425_v7 = vshll.u32 %v52_v52, 16 }
  0x6a   :  { %v414_v4 = vsel %vm12222_vm3, %v409_v53, %v413_v38  ;;  %v418_v11 = vrot.slane %v416_v0, 4  ;;  %v421_v12 = vrot.slane %v419_v1, 5  ;;  %v429_v20 = vshrl.u32 %v52_v52, 16  ;;  %v54_v38 = vld [vmem:[%s16490_s0 + $0xa0] sm:$0xf] }
  0x6b   :  { %v9256_v9 = vcombine.low %v404_v61, %v414_v4  ;;  %v3851_v10 = vrot.slane %v3850_v62, 4  ;;  %v3861_v17 = vrot.slane %v3860_v5, 4  ;;  %v427_v18 = vrot.slane %v425_v7, 5  ;;  %v9638_v61 = vld [vmem:[%s16490_s0 + $0xa8] sm:$0xf] }
  0x6c   :  { %v435_v21 = vshll.u32 %v104_v63, 16  ;;  %v422_v25 = vor.u32 %v421_v12, %v418_v11  ;;  %v3868_v27 = vshrl.u32 %v9635_v8, 16  ;;  %v3871_v28 = vshll.u32 %v9635_v8, 16  ;;  %v9640_v8 = vld [vmem:[%s16490_s0 + $0xb0] sm:$0x1] }
  0x6d   :  { %10665 = vmatmul.mubr.msk.bf16.gmra.mrb[20].mxu1 %vm993_vm4, %v9256_v9  ;;  %v3856_v23 = vsel %vm12222_vm3, %v3851_v10, %v3855_v54  ;;  %v3866_v30 = vsel %vm12222_vm3, %v3861_v17, %v3865_v6  ;;  %v431_v31 = vrot.slane %v429_v20, 4  ;;  %v3877_v33 = vshll.u32 %v9636_v15, 16 }
  0x6e   :  { %v437_v32 = vrot.slane %v435_v21, 5  ;;  %v9707_v35 = vcombine.low %v3856_v23, %v3866_v30  ;;  %v423_v36 = vrot.slane %v422_v25, 4  ;;  %v3870_v37 = vrot.slane %v3868_v27, 4  ;;  %v55_v21 = vld [vmem:[%s16490_s0 + $0xa8] sm:$0xf] }
  0x6f   :  { %v3873_v19 = vrot.slane %v3871_v28, 5  ;;  %v432_v39 = vor.u32 %v431_v31, %v427_v18  ;;  %v3879_v40 = vrot.slane %v3877_v33, 5  ;;  %v3881_v41 = vshrl.u32 %v9636_v15, 16 }
  0x70   :  { %v3887_v42 = vshll.u32 %v9637_v26, 16  ;;  %10929 = vmatmul.mubr.msk.bf16.gmra.mrb[20].mxu0 %vm993_vm4, %v9707_v35  ;;  %v428_v43 = vsel %vm12222_vm3, %v423_v36, %v427_v18  ;;  %v440_v46 = vshrl.u32 %v53_v34, 16  ;;  %v443_v47 = vshll.u32 %v53_v34, 16  ;;  %v106_v36 = vld [vmem:[%s16490_s0 + $0xb0] sm:$0x1] }
  0x71   :  { %v3874_v44 = vor.u32 %v3873_v19, %v3870_v37  ;;  %v433_v49 = vrot.slane %v432_v39, 4  ;;  %v3883_v50 = vrot.slane %v3881_v41, 4  ;;  %v449_v52 = vshll.u32 %v54_v38, 16  ;;  %v9641_v41 = vld [vmem:[%s16490_s0 + $0xb4] sm:$0xf] }
  0x72   :  { %v3889_v51 = vrot.slane %v3887_v42, 5  ;;  %v442_v54 = vrot.slane %v440_v46, 4  ;;  %v445_v56 = vrot.slane %v443_v47, 5  ;;  %v453_v59 = vshrl.u32 %v54_v38, 16  ;;  %v9642_v46 = vld [vmem:[%s16490_s0 + $0xb8] sm:$0xf] }
  0x73   :  { %v3875_v53 = vrot.slane %v3874_v44, 4  ;;  %v438_v62 = vsel %vm12222_vm3, %v433_v49, %v437_v32  ;;  %v3884_v63 = vor.u32 %v3883_v50, %v3879_v40  ;;  %v451_v0 = vrot.slane %v449_v52, 5 }
  0x74   :  { %v459_v1 = vshll.u32 %v105_v45, 16  ;;  %v9257_v4 = vcombine.low %v428_v43, %v438_v62  ;;  %v446_v6 = vor.u32 %v445_v56, %v442_v54  ;;  %v455_v7 = vrot.slane %v453_v59, 4 }
  0x75   :  { %v3880_v5 = vsel %vm12222_vm3, %v3875_v53, %v3879_v40  ;;  %v3885_v9 = vrot.slane %v3884_v63, 4  ;;  %v1640_v11 = vsel %vm1090_vm0, %v12407_v48, 0  ;;  %v3892_v12 = vshrl.u32 %v9638_v61, 16  ;;  %v56_v48 = vld [vmem:[%s16490_s0 + $0xac] sm:$0xf] }
  0x76   :  { %v461_v10 = vrot.slane %v459_v1, 5  ;;  %10668 = vmatprep.mubr.msk.bf16.mxu1 %vm993_vm4, %v9257_v4  ;;  %v447_v15 = vrot.slane %v446_v6, 4  ;;  %v456_v17 = vor.u32 %v455_v7, %v451_v0  ;;  %10709 = vmatpush3.bf16.msra.mxu1 %v1640_v11  ;;  %v3895_v18 = vshll.u32 %v9638_v61, 16  ;;  %v9643_v63 = vld [vmem:[%s16490_s0 + $0xbc] sm:$0x1] }
  0x77   :  { %v3901_v20 = vshll.u32 %v9639_v2, 16  ;;  %v3890_v23 = vsel %vm12222_vm3, %v3885_v9, %v3889_v51  ;;  %v3894_v25 = vrot.slane %v3892_v12, 4  ;;  %v3905_v26 = vshrl.u32 %v9639_v2, 16  ;;  %v57_v1 = vld [vmem:[%s16490_s0 + $0xb4] sm:$0xf] }
  0x78   :  { %v3911_v27 = vshll.u32 %v9640_v8, 16  ;;  %v9708_v28 = vcombine.low %v3880_v5, %v3890_v23  ;;  %v452_v30 = vsel %vm12222_vm3, %v447_v15, %v451_v0  ;;  %v457_v31 = vrot.slane %v456_v17, 4  ;;  %v58_v7 = vld [vmem:[%s16490_s0 + $0xb8] sm:$0xf] }
  0x79   :  { %v3897_v32 = vrot.slane %v3895_v18, 5  ;;  %v3903_v33 = vrot.slane %v3901_v20, 5  ;;  %v3907_v34 = vrot.slane %v3905_v26, 4  ;;  %v464_v37 = vshrl.u32 %v55_v21, 16  ;;  %v107_v18 = vld [vmem:[%s16490_s0 + $0xbc] sm:$0x1] }
  0x7a   :  { %v3913_v35 = vrot.slane %v3911_v27, 5  ;;  %10932 = vmatprep.mubr.msk.bf16.mxu0 %vm993_vm4, %v9708_v28  ;;  %v462_v19 = vsel %vm12222_vm3, %v457_v31, %v461_v10  ;;  %v467_v39 = vshll.u32 %v55_v21, 16  ;;  %v473_v40 = vshll.u32 %v56_v48, 16  ;;  %v9644_v27 = vld [vmem:[%s16490_s0 + $0xc0] sm:$0xf] }
  0x7b   :  { %v3898_v38 = vor.u32 %v3897_v32, %v3894_v25  ;;  %v9258_v42 = vcombine.low %v452_v30, %v462_v19  ;;  %v3908_v43 = vor.u32 %v3907_v34, %v3903_v33  ;;  %v466_v44 = vrot.slane %v464_v37, 4  ;;  %v9645_v32 = vld [vmem:[%s16490_s0 + $0xc4] sm:$0xf]  ;;  %v9646_v37 = vld [vmem:[%s16490_s0 + $0xc8] sm:$0x1] }
  0x7c   :  { %v477_v45 = vshrl.u32 %v56_v48, 16  ;;  %v469_v49 = vrot.slane %v467_v39, 5  ;;  %v475_v50 = vrot.slane %v473_v40, 5  ;;  %v483_v51 = vshll.u32 %v106_v36, 16 }
  0x7d   :  { %v3899_v47 = vrot.slane %v3898_v38, 4  ;;  %10669 = vmatmul.mubr.msk.bf16.gmra.mrb[24].mxu1 %vm993_vm4, %v9258_v42  ;;  %v3909_v52 = vrot.slane %v3908_v43, 4  ;;  %v3916_v54 = vshrl.u32 %v9641_v41, 16  ;;  %v3919_v56 = vshll.u32 %v9641_v41, 16  ;;  %v59_v41 = vld [vmem:[%s16490_s0 + $0xd8] sm:$0xf] }
  0x7e   :  { %v479_v53 = vrot.slane %v477_v45, 4  ;;  %v470_v61 = vor.u32 %v469_v49, %v466_v44  ;;  %v485_v62 = vrot.slane %v483_v51, 5  ;;  %v3925_v0 = vshll.u32 %v9642_v46, 16 }
  0x7f   :  { %v3904_v59 = vsel %vm12222_vm3, %v3899_v47, %v3903_v33  ;;  %v3914_v2 = vsel %vm12222_vm3, %v3909_v52, %v3913_v35  ;;  %v3918_v5 = vrot.slane %v3916_v54, 4  ;;  %v3921_v6 = vrot.slane %v3919_v56, 5 }
  0x80   :  { %v480_v4 = vor.u32 %v479_v53, %v475_v50  ;;  %v9709_v8 = vcombine.low %v3904_v59, %v3914_v2  ;;  %v471_v9 = vrot.slane %v470_v61, 4  ;;  %v3927_v10 = vrot.slane %v3925_v0, 5  ;;  %v108_v0 = vld [vmem:[%s16490_s0 + $0xe0] sm:$0x1] }
  0x81   :  { %v3929_v11 = vshrl.u32 %v9642_v46, 16  ;;  %v3922_v15 = vor.u32 %v3921_v6, %v3918_v5  ;;  %v3935_v17 = vshll.u32 %v9643_v63, 16  ;;  %v488_v20 = vshrl.u32 %v57_v1, 16  ;;  %v60_v46 = vld [vmem:[%s16490_s0 + $0xdc] sm:$0xf] }
  0x82   :  { %v481_v12 = vrot.slane %v480_v4, 4  ;;  %10933 = vmatmul.mubr.msk.bf16.gmra.mrb[24].mxu0 %vm993_vm4, %v9709_v8  ;;  %v476_v21 = vsel %vm12222_vm3, %v471_v9, %v475_v50  ;;  %v491_v25 = vshll.u32 %v57_v1, 16  ;;  %v497_v26 = vshll.u32 %v58_v7, 16  ;;  %v9647_v6 = vld [vmem:[%s16490_s0 + $0xe4] sm:$0xf] }
  0x83   :  { %v3931_v23 = vrot.slane %v3929_v11, 4  ;;  %v3923_v28 = vrot.slane %v3922_v15, 4  ;;  %v3937_v30 = vrot.slane %v3935_v17, 5  ;;  %v490_v31 = vrot.slane %v488_v20, 4  ;;  %v9648_v11 = vld [vmem:[%s16490_s0 + $0xe8] sm:$0xf] }
  0x84   :  { %v486_v48 = vsel %vm12222_vm3, %v481_v12, %v485_v62  ;;  %v493_v35 = vrot.slane %v491_v25, 5  ;;  %v499_v36 = vrot.slane %v497_v26, 5  ;;  %v501_v38 = vshrl.u32 %v58_v7, 16  ;;  %v9649_v20 = vld [vmem:[%s16490_s0 + $0xec] sm:$0x1] }
  0x85   :  { %v9259_v33 = vcombine.low %v476_v21, %v486_v48  ;;  %v3932_v34 = vor.u32 %v3931_v23, %v3927_v10  ;;  %v3928_v19 = vsel %vm12222_vm3, %v3923_v28, %v3927_v10  ;;  %v507_v39 = vshll.u32 %v107_v18, 16 }
  0x86   :  { %v3940_v40 = vshrl.u32 %v9644_v27, 16  ;;  %v494_v43 = vor.u32 %v493_v35, %v490_v31  ;;  %v3943_v44 = vshll.u32 %v9644_v27, 16  ;;  %v3949_v45 = vshll.u32 %v9645_v32, 16  ;;  %v61_v27 = vld [vmem:[%s16490_s0 + $0xe4] sm:$0xf] }
  0x87   :  { %10672 = vmatprep.mubr.msk.bf16.mxu1 %vm993_vm4, %v9259_v33  ;;  %v3933_v42 = vrot.slane %v3932_v34, 4  ;;  %v503_v47 = vrot.slane %v501_v38, 4  ;;  %v509_v49 = vrot.slane %v507_v39, 5  ;;  %v3953_v51 = vshrl.u32 %v9645_v32, 16 }
  0x88   :  { %v3942_v50 = vrot.slane %v3940_v40, 4  ;;  %v495_v53 = vrot.slane %v494_v43, 4  ;;  %v3945_v54 = vrot.slane %v3943_v44, 5  ;;  %v3951_v56 = vrot.slane %v3949_v45, 5  ;;  %v109_v44 = vld [vmem:[%s16490_s0 + $0xec] sm:$0x1] }
  0x89   :  { %v3938_v52 = vsel %vm12222_vm3, %v3933_v42, %v3937_v30  ;;  %v504_v61 = vor.u32 %v503_v47, %v499_v36  ;;  %v3955_v62 = vrot.slane %v3953_v51, 4  ;;  %v3959_v63 = vshll.u32 %v9646_v37, 16 }
  0x8a   :  { %v9710_v59 = vcombine.low %v3928_v19, %v3938_v52  ;;  %v500_v1 = vsel %vm12222_vm3, %v495_v53, %v499_v36  ;;  %v3946_v2 = vor.u32 %v3945_v54, %v3942_v50  ;;  %v512_v4 = vshrl.u32 %v59_v41, 16  ;;  %v62_v36 = vld [vmem:[%s16490_s0 + $0xe8] sm:$0xf]  ;;  %v9650_v50 = vld [vmem:[%s16490_s0 + $0xf0] sm:$0xf] }
  0x8b   :  { %v515_v5 = vshll.u32 %v59_v41, 16  ;;  %v505_v7 = vrot.slane %v504_v61, 4  ;;  %v3956_v8 = vor.u32 %v3955_v62, %v3951_v56  ;;  %v3961_v9 = vrot.slane %v3959_v63, 5 }
  0x8c   :  { %10936 = vmatprep.mubr.msk.bf16.mxu0 %vm993_vm4, %v9710_v59  ;;  %v521_v10 = vshll.u32 %v60_v46, 16  ;;  %v3947_v12 = vrot.slane %v3946_v2, 4  ;;  %v514_v15 = vrot.slane %v512_v4, 4  ;;  %v525_v18 = vshrl.u32 %v60_v46, 16 }
  0x8d   :  { %v517_v17 = vrot.slane %v515_v5, 5  ;;  %v510_v21 = vsel %vm12222_vm3, %v505_v7, %v509_v49  ;;  %v3957_v23 = vrot.slane %v3956_v8, 4  ;;  %v531_v26 = vshll.u32 %v108_v0, 16  ;;  %v9652_v5 = vld [vmem:[%s16490_s0 + $0xf8] sm:$0x1] }
  0x8e   :  { %v523_v25 = vrot.slane %v521_v10, 5  ;;  %v9260_v48 = vcombine.low %v500_v1, %v510_v21  ;;  %v3952_v28 = vsel %vm12222_vm3, %v3947_v12, %v3951_v56  ;;  %v527_v31 = vrot.slane %v525_v18, 4  ;;  %v9651_v56 = vld [vmem:[%s16490_s0 + $0xf4] sm:$0xf]  ;;  %v63_v10 = vld [vmem:[%s16490_s0 + $0xf0] sm:$0xf] }
  0x8f   :  { %v518_v30 = vor.u32 %v517_v17, %v514_v15  ;;  %v3962_v32 = vsel %vm12222_vm3, %v3957_v23, %v3961_v9  ;;  %v533_v33 = vrot.slane %v531_v26, 5  ;;  %v3964_v34 = vshrl.u32 %v9647_v6, 16  ;;  %v64_v18 = vld [vmem:[%s16490_s0 + $0xf4] sm:$0xf] }
  0x90   :  { %v3967_v35 = vshll.u32 %v9647_v6, 16  ;;  %10673 = vmatmul.mubr.msk.bf16.gmra.mrb[28].mxu1 %vm993_vm4, %v9260_v48  ;;  %v9711_v37 = vcombine.low %v3952_v28, %v3962_v32  ;;  %v528_v38 = vor.u32 %v527_v31, %v523_v25  ;;  %v3973_v39 = vshll.u32 %v9648_v11, 16 }
  0x91   :  { %v519_v19 = vrot.slane %v518_v30, 4  ;;  %v3966_v40 = vrot.slane %v3964_v34, 4  ;;  %v3977_v42 = vshrl.u32 %v9648_v11, 16  ;;  %v3983_v43 = vshll.u32 %v9649_v20, 16  ;;  %v110_v30 = vld [vmem:[%s16490_s0 + $0xf8] sm:$0x1] }
  0x92   :  { %v3969_v41 = vrot.slane %v3967_v35, 5  ;;  %10937 = vmatmul.mubr.msk.bf16.gmra.mrb[28].mxu0 %vm993_vm4, %v9711_v37  ;;  %v529_v46 = vrot.slane %v528_v38, 4  ;;  %v3975_v47 = vrot.slane %v3973_v39, 5  ;;  %v536_v49 = vshrl.u32 %v61_v27, 16  ;;  %v9653_v35 = vld [vmem:[%s16490_s0 + $0xfc] sm:$0xf] }
  0x93   :  { %v524_v45 = vsel %vm12222_vm3, %v519_v19, %v523_v25  ;;  %v3979_v52 = vrot.slane %v3977_v42, 4  ;;  %v3985_v53 = vrot.slane %v3983_v43, 5  ;;  %v539_v54 = vshll.u32 %v61_v27, 16  ;;  %v9654_v39 = vld [vmem:[%s16490_s0 + $0x100] sm:$0xf] }
  0x94   :  { %v3970_v51 = vor.u32 %v3969_v41, %v3966_v40  ;;  %v534_v59 = vsel %vm12222_vm3, %v529_v46, %v533_v33  ;;  %v538_v61 = vrot.slane %v536_v49, 4  ;;  %v545_v62 = vshll.u32 %v62_v36, 16 }
  0x95   :  { %v549_v63 = vshrl.u32 %v62_v36, 16  ;;  %v9261_v0 = vcombine.low %v524_v45, %v534_v59  ;;  %v3980_v2 = vor.u32 %v3979_v52, %v3975_v47  ;;  %v541_v4 = vrot.slane %v539_v54, 5  ;;  %v65_v54 = vld [vmem:[%s16490_s0 + $0xfc] sm:$0xf] }
  0x96   :  { %v3971_v1 = vrot.slane %v3970_v51, 4  ;;  %v547_v6 = vrot.slane %v545_v62, 5  ;;  %v555_v8 = vshll.u32 %v109_v44, 16  ;;  %v3988_v9 = vshrl.u32 %v9650_v50, 16 }
  0x97   :  { %v551_v7 = vrot.slane %v549_v63, 4  ;;  %10676 = vmatprep.mubr.msk.bf16.mxu1 %vm993_vm4, %v9261_v0  ;;  %v3981_v12 = vrot.slane %v3980_v2, 4  ;;  %v542_v15 = vor.u32 %v541_v4, %v538_v61  ;;  %v3991_v17 = vshll.u32 %v9650_v50, 16 }
  0x98   :  { %v3976_v11 = vsel %vm12222_vm3, %v3971_v1, %v3975_v47  ;;  %v557_v21 = vrot.slane %v555_v8, 5  ;;  %v3990_v23 = vrot.slane %v3988_v9, 4  ;;  %v3997_v25 = vshll.u32 %v9651_v56, 16  ;;  %v66_v8 = vld [vmem:[%s16490_s0 + $0x100] sm:$0xf] }
  0x99   :  { %v552_v20 = vor.u32 %v551_v7, %v547_v6  ;;  %v3986_v26 = vsel %vm12222_vm3, %v3981_v12, %v3985_v53  ;;  %v543_v27 = vrot.slane %v542_v15, 4  ;;  %v3993_v48 = vrot.slane %v3991_v17, 5  ;;  %v9655_v53 = vld [vmem:[%s16490_s0 + $0x104] sm:$0x1] }
  0x9a   :  { %v4001_v28 = vshrl.u32 %v9651_v56, 16  ;;  %v9712_v31 = vcombine.low %v3976_v11, %v3986_v26  ;;  %v3999_v33 = vrot.slane %v3997_v25, 5  ;;  %v4007_v34 = vshll.u32 %v9652_v5, 16  ;;  %v111_v15 = vld [vmem:[%s16490_s0 + $0x104] sm:$0x1] }
  0x9b   :  { %v553_v32 = vrot.slane %v552_v20, 4  ;;  %v548_v36 = vsel %vm12222_vm3, %v543_v27, %v547_v6  ;;  %v3994_v37 = vor.u32 %v3993_v48, %v3990_v23  ;;  %v560_v38 = vshrl.u32 %v63_v10, 16  ;;  %v9656_v23 = vld [vmem:[%s16490_s0 + $0x108] sm:$0xf] }
  0x9c   :  { %v4003_v19 = vrot.slane %v4001_v28, 4  ;;  %10940 = vmatprep.mubr.msk.bf16.mxu0 %vm993_vm4, %v9712_v31  ;;  %v4009_v41 = vrot.slane %v4007_v34, 5  ;;  %v563_v42 = vshll.u32 %v63_v10, 16  ;;  %v569_v43 = vshll.u32 %v64_v18, 16  ;;  %v9657_v28 = vld [vmem:[%s16490_s0 + $0x10c] sm:$0xf] }
  0x9d   :  { %v558_v40 = vsel %vm12222_vm3, %v553_v32, %v557_v21  ;;  %v3995_v45 = vrot.slane %v3994_v37, 4  ;;  %v562_v47 = vrot.slane %v560_v38, 4  ;;  %v573_v51 = vshrl.u32 %v64_v18, 16 }
  0x9e   :  { %v9262_v44 = vcombine.low %v548_v36, %v558_v40  ;;  %v4004_v46 = vor.u32 %v4003_v19, %v3999_v33  ;;  %v565_v49 = vrot.slane %v563_v42, 5  ;;  %v571_v50 = vrot.slane %v569_v43, 5  ;;  %v9658_v19 = vld [vmem:[%s16490_s0 + $0x110] sm:$0x1] }
  0x9f   :  { %v579_v52 = vshll.u32 %v110_v30, 16  ;;  %v4000_v56 = vsel %vm12222_vm3, %v3995_v45, %v3999_v33  ;;  %v4012_v61 = vshrl.u32 %v9653_v35, 16  ;;  %v4015_v62 = vshll.u32 %v9653_v35, 16 }
  0xa0   :  { %10677 = vmatmul.mubr.msk.bf16.gmra.mrb[32].mxu1 %vm993_vm4, %v9262_v44  ;;  %v4005_v59 = vrot.slane %v4004_v46, 4  ;;  %v566_v63 = vor.u32 %v565_v49, %v562_v47  ;;  %v575_v0 = vrot.slane %v573_v51, 4  ;;  %v4021_v2 = vshll.u32 %v9654_v39, 16  ;;  %v67_v51 = vld [vmem:[%s16490_s0 + $0x108] sm:$0xf] }
  0xa1   :  { %v581_v1 = vrot.slane %v579_v52, 5  ;;  %v4014_v5 = vrot.slane %v4012_v61, 4  ;;  %v4017_v6 = vrot.slane %v4015_v62, 5  ;;  %v4025_v7 = vshrl.u32 %v9654_v39, 16 }
  0xa2   :  { %v4010_v4 = vsel %vm12222_vm3, %v4005_v59, %v4009_v41  ;;  %v567_v10 = vrot.slane %v566_v63, 4  ;;  %v576_v11 = vor.u32 %v575_v0, %v571_v50  ;;  %v4023_v12 = vrot.slane %v4021_v2, 5  ;;  %v68_v59 = vld [vmem:[%s16490_s0 + $0x10c] sm:$0xf]  ;;  %v9659_v2 = vld [vmem:[%s16490_s0 + $0x114] sm:$0xf] }
  0xa3   :  { %v9713_v9 = vcombine.low %v4000_v56, %v4010_v4  ;;  %v4018_v17 = vor.u32 %v4017_v6, %v4014_v5  ;;  %v4027_v18 = vrot.slane %v4025_v7, 4  ;;  %v4031_v20 = vshll.u32 %v9655_v53, 16 }
  0xa4   :  { %v584_v21 = vshrl.u32 %v65_v54, 16  ;;  %v572_v25 = vsel %vm12222_vm3, %v567_v10, %v571_v50  ;;  %v577_v26 = vrot.slane %v576_v11, 4  ;;  %v587_v27 = vshll.u32 %v65_v54, 16 }
  0xa5   :  { %10941 = vmatmul.mubr.msk.bf16.gmra.mrb[32].mxu0 %vm993_vm4, %v9713_v9  ;;  %v593_v48 = vshll.u32 %v66_v8, 16  ;;  %v4019_v30 = vrot.slane %v4018_v17, 4  ;;  %v4028_v31 = vor.u32 %v4027_v18, %v4023_v12  ;;  %v4033_v32 = vrot.slane %v4031_v20, 5 }
  0xa6   :  { %v586_v33 = vrot.slane %v584_v21, 4  ;;  %v582_v34 = vsel %vm12222_vm3, %v577_v26, %v581_v1  ;;  %v589_v35 = vrot.slane %v587_v27, 5  ;;  %v597_v37 = vshrl.u32 %v66_v8, 16  ;;  %v112_v1 = vld [vmem:[%s16490_s0 + $0x110] sm:$0x1] }
  0xa7   :  { %v595_v36 = vrot.slane %v593_v48, 5  ;;  %v9263_v38 = vcombine.low %v572_v25, %v582_v34  ;;  %v4024_v39 = vsel %vm12222_vm3, %v4019_v30, %v4023_v12  ;;  %v4029_v40 = vrot.slane %v4028_v31, 4  ;;  %v9660_v8 = vld [vmem:[%s16490_s0 + $0x118] sm:$0xf]  ;;  %v9661_v30 = vld [vmem:[%s16490_s0 + $0x11c] sm:$0x1] }
  0xa8   :  { %v603_v41 = vshll.u32 %v111_v15, 16  ;;  %v590_v42 = vor.u32 %v589_v35, %v586_v33  ;;  %v599_v43 = vrot.slane %v597_v37, 4  ;;  %v4036_v44 = vshrl.u32 %v9656_v23, 16  ;;  %v9405_v37 = vld [vmem:[%s16489_s1 + $0x4] sm:$0x3] }
  0xa9   :  { %v4039_v45 = vshll.u32 %v9656_v23, 16  ;;  %10680 = vmatprep.mubr.msk.bf16.mxu1 %vm993_vm4, %v9263_v38  ;;  %v4034_v46 = vsel %vm12222_vm3, %v4029_v40, %v4033_v32  ;;  %v4045_v49 = vshll.u32 %v9657_v28, 16  ;;  %v4049_v50 = vshrl.u32 %v9657_v28, 16  ;;  %11792 = vmatprep.subr.msk.bf16.mxu1 %vm1090_vm0, %v9405_v37 }
  0xaa   :  { %v605_v47 = vrot.slane %v603_v41, 5  ;;  %v9714_v52 = vcombine.low %v4024_v39, %v4034_v46  ;;  %v591_v53 = vrot.slane %v590_v42, 4  ;;  %v600_v54 = vor.u32 %v599_v43, %v595_v36  ;;  %v70_v41 = vld [vmem:[%s16490_s0 + $0x118] sm:$0xf]  ;;  %v113_v46 = vld [vmem:[%s16490_s0 + $0x11c] sm:$0x1] }
  0xab   :  { %v4038_v56 = vrot.slane %v4036_v44, 4  ;;  %v4041_v61 = vrot.slane %v4039_v45, 5  ;;  %v4047_v62 = vrot.slane %v4045_v49, 5  ;;  %v4051_v63 = vrot.slane %v4049_v50, 4 }
  0xac   :  { %v4055_v0 = vshll.u32 %v9658_v19, 16  ;;  %10944 = vmatprep.mubr.msk.bf16.mxu0 %vm993_vm4, %v9714_v52  ;;  %v596_v4 = vsel %vm12222_vm3, %v591_v53, %v595_v36  ;;  %v601_v5 = vrot.slane %v600_v54, 4  ;;  %v608_v6 = vshrl.u32 %v67_v51, 16  ;;  %v69_v36 = vld [vmem:[%s16490_s0 + $0x114] sm:$0xf] }
  0xad   :  { %v611_v7 = vshll.u32 %v67_v51, 16  ;;  %v4042_v9 = vor.u32 %v4041_v61, %v4038_v56  ;;  %v4052_v10 = vor.u32 %v4051_v63, %v4047_v62  ;;  %v617_v12 = vshll.u32 %v68_v59, 16 }
  0xae   :  { %v4057_v11 = vrot.slane %v4055_v0, 5  ;;  %v606_v15 = vsel %vm12222_vm3, %v601_v5, %v605_v47  ;;  %v610_v17 = vrot.slane %v608_v6, 4  ;;  %v621_v20 = vshrl.u32 %v68_v59, 16  ;;  %v9662_v47 = vld [vmem:[%s16490_s0 + $0x120] sm:$0xf] }
  0xaf   :  { %v613_v18 = vrot.slane %v611_v7, 5  ;;  %v9264_v21 = vcombine.low %v596_v4, %v606_v15  ;;  %v4043_v23 = vrot.slane %v4042_v9, 4  ;;  %v4053_v25 = vrot.slane %v4052_v10, 4  ;;  %v9663_v6 = vld [vmem:[%s16490_s0 + $0x124] sm:$0xf] }
  0xb0   :  { %v619_v26 = vrot.slane %v617_v12, 5  ;;  %v623_v48 = vrot.slane %v621_v20, 4  ;;  %v627_v28 = vshll.u32 %v112_v1, 16  ;;  %v4060_v31 = vshrl.u32 %v9659_v2, 16  ;;  %v71_v20 = vld [vmem:[%s16490_s0 + $0x120] sm:$0xf] }
  0xb1   :  { %v614_v27 = vor.u32 %v613_v18, %v610_v17  ;;  %10681 = vmatmul.mubr.msk.bf16.gmra.mrb[36].mxu1 %vm993_vm4, %v9264_v21  ;;  %v4048_v32 = vsel %vm12222_vm3, %v4043_v23, %v4047_v62  ;;  %v4058_v33 = vsel %vm12222_vm3, %v4053_v25, %v4057_v11  ;;  %v4063_v34 = vshll.u32 %v9659_v2, 16  ;;  %v9664_v17 = vld [vmem:[%s16490_s0 + $0x128] sm:$0x1] }
  0xb2   :  { %v4069_v35 = vshll.u32 %v9660_v8, 16  ;;  %v9715_v19 = vcombine.low %v4048_v32, %v4058_v33  ;;  %v624_v39 = vor.u32 %v623_v48, %v619_v26  ;;  %v629_v40 = vrot.slane %v627_v28, 5  ;;  %v114_v32 = vld [vmem:[%s16490_s0 + $0x128] sm:$0x1] }
  0xb3   :  { %v615_v38 = vrot.slane %v614_v27, 4  ;;  %v4062_v42 = vrot.slane %v4060_v31, 4  ;;  %v4065_v43 = vrot.slane %v4063_v34, 5  ;;  %v4073_v45 = vshrl.u32 %v9660_v8, 16  ;;  %v72_v27 = vld [vmem:[%s16490_s0 + $0x124] sm:$0xf] }
  0xb4   :  { %v4071_v44 = vrot.slane %v4069_v35, 5  ;;  %10945 = vmatmul.mubr.msk.bf16.gmra.mrb[36].mxu0 %vm993_vm4, %v9715_v19  ;;  %v625_v50 = vrot.slane %v624_v39, 4  ;;  %v4079_v51 = vshll.u32 %v9661_v30, 16  ;;  %v632_v52 = vshrl.u32 %v69_v36, 16 }
  0xb5   :  { %v620_v49 = vsel %vm12222_vm3, %v615_v38, %v619_v26  ;;  %v4066_v53 = vor.u32 %v4065_v43, %v4062_v42  ;;  %v4075_v54 = vrot.slane %v4073_v45, 4  ;;  %v635_v56 = vshll.u32 %v69_v36, 16 }
  0xb6   :  { %v641_v59 = vshll.u32 %v70_v41, 16  ;;  %v630_v61 = vsel %vm12222_vm3, %v625_v50, %v629_v40  ;;  %v4081_v62 = vrot.slane %v4079_v51, 5  ;;  %v634_v63 = vrot.slane %v632_v52, 4 }
  0xb7   :  { %v645_v0 = vshrl.u32 %v70_v41, 16  ;;  %v9265_v1 = vcombine.low %v620_v49, %v630_v61  ;;  %v4067_v2 = vrot.slane %v4066_v53, 4  ;;  %v4076_v4 = vor.u32 %v4075_v54, %v4071_v44  ;;  %v9760_v49 = vld [vmem:[%s16490_s0 + $0xc] sm:$0xe] }
  0xb8   :  { %v637_v5 = vrot.slane %v635_v56, 5  ;;  %v643_v7 = vrot.slane %v641_v59, 5  ;;  %v651_v9 = vshll.u32 %v113_v46, 16  ;;  %v4084_v10 = vshrl.u32 %v9662_v47, 16  ;;  %v73_v54 = vld [vmem:[%s16490_s0 + $0x12c] sm:$0xf] }
  0xb9   :  { %v647_v8 = vrot.slane %v645_v0, 4  ;;  %10684 = vmatprep.mubr.msk.bf16.mxu1 %vm993_vm4, %v9265_v1  ;;  %v4072_v11 = vsel %vm12222_vm3, %v4067_v2, %v4071_v44  ;;  %v4077_v12 = vrot.slane %v4076_v4, 4  ;;  %v4087_v18 = vshll.u32 %v9662_v47, 16  ;;  %v74_v2 = vld [vmem:[%s16490_s0 + $0x130] sm:$0xf] }
  0xba   :  { %v638_v15 = vor.u32 %v637_v5, %v634_v63  ;;  %v653_v23 = vrot.slane %v651_v9, 5  ;;  %v4086_v25 = vrot.slane %v4084_v10, 4  ;;  %v4093_v26 = vshll.u32 %v9663_v6, 16 }
  0xbb   :  { %v648_v21 = vor.u32 %v647_v8, %v643_v7  ;;  %v4082_v48 = vsel %vm12222_vm3, %v4077_v12, %v4081_v62  ;;  %v4089_v30 = vrot.slane %v4087_v18, 5  ;;  %v4097_v31 = vshrl.u32 %v9663_v6, 16  ;;  %v115_v6 = vld [vmem:[%s16490_s0 + $0x134] sm:$0x1] }
  0xbc   :  { %v639_v28 = vrot.slane %v638_v15, 4  ;;  %v9716_v33 = vcombine.low %v4072_v11, %v4082_v48  ;;  %v4095_v35 = vrot.slane %v4093_v26, 5  ;;  %v4103_v36 = vshll.u32 %v9664_v17, 16  ;;  %v9761_v15 = vld [vmem:[%s16490_s0 + $0x18] sm:$0xe] }
  0xbd   :  { %v649_v34 = vrot.slane %v648_v21, 4  ;;  %v4090_v19 = vor.u32 %v4089_v30, %v4086_v25  ;;  %v4099_v38 = vrot.slane %v4097_v31, 4  ;;  %v656_v39 = vshrl.u32 %v71_v20, 16 }
  0xbe   :  { %v644_v37 = vsel %vm12222_vm3, %v639_v28, %v643_v7  ;;  %10948 = vmatprep.mubr.msk.bf16.mxu0 %vm993_vm4, %v9716_v33  ;;  %v4105_v41 = vrot.slane %v4103_v36, 5  ;;  %v659_v42 = vshll.u32 %v71_v20, 16  ;;  %v665_v43 = vshll.u32 %v72_v27, 16  ;;  %v11914_v33 = vld [vmem:[%s16489_s1 + $0xc] sm:$0x3] }
  0xbf   :  { %v654_v40 = vsel %vm12222_vm3, %v649_v34, %v653_v23  ;;  %v4091_v45 = vrot.slane %v4090_v19, 4  ;;  %v4100_v46 = vor.u32 %v4099_v38, %v4095_v35  ;;  %v658_v47 = vrot.slane %v656_v39, 4  ;;  %v75_v23 = vld [vmem:[%s16490_s0 + $0x138] sm:$0xf] }
  0xc0   :  { %v9266_v44 = vcombine.low %v644_v37, %v654_v40  ;;  %v661_v50 = vrot.slane %v659_v42, 5  ;;  %v667_v51 = vrot.slane %v665_v43, 5  ;;  %v669_v52 = vshrl.u32 %v72_v27, 16 }
  0xc1   :  { %v675_v53 = vshll.u32 %v114_v32, 16  ;;  %v4096_v56 = vsel %vm12222_vm3, %v4091_v45, %v4095_v35  ;;  %v4101_v59 = vrot.slane %v4100_v46, 4  ;;  %vm2027_vm5 = vcmask 1042432   ;;  %v116_v35 = vld [vmem:[%s16490_s0 + $0x140] sm:$0x1] }
  0xc2   :  { %10685 = vmatmul.mubr.msk.bf16.gmra.mrb[40].mxu1 %vm993_vm4, %v9266_v44  ;;  %vm2028_vm6 = vcmask 1046532   ;;  %v662_v61 = vor.u32 %v661_v50, %v658_v47  ;;  %v671_v62 = vrot.slane %v669_v52, 4  ;;  %v9792_v1 = vrot.slane %v9760_v49, 9  ;;  %v78_v44 = vld [vmem:[%s16490_s0 + $0x148] sm:$0xf] }
  0xc3   :  { %v677_v63 = vrot.slane %v675_v53, 5  ;;  %vm12867_vm7 = vmor %vm2027_vm5, %vm2028_vm6  ;;  %v4106_v4 = vsel %vm12222_vm3, %v4101_v59, %v4105_v41  ;;  %v5029_v5 = vrot.slane %v5027_v57, 4  ;;  %v680_v7 = vshrl.u32 %v73_v54, 16  ;;  %v77_v41 = vld [vmem:[%s16490_s0 + $0x144] sm:$0xf] }
  0xc4   :  { %v683_v8 = vshll.u32 %v73_v54, 16  ;;  %v9717_v9 = vcombine.low %v4096_v56, %v4106_v4  ;;  %v663_v10 = vrot.slane %v662_v61, 4  ;;  %v672_v11 = vor.u32 %v671_v62, %v667_v51  ;;  %v117_v50 = vld [vmem:[%s16490_s0 + $0x14c] sm:$0x1]  ;;  %v11915_v54 = vld [vmem:[%s16490_s0 + $0x28] sm:$0xf] }
  0xc5   :  { %v5028_v12 = vsel %vm12867_vm7, %v9792_v1, %v5027_v57  ;;  %v5031_v17 = vsel %vm12867_vm7, %v5029_v5, %v5030_v58  ;;  %v682_v18 = vrot.slane %v680_v7, 4  ;;  %v689_v21 = vshll.u32 %v74_v2, 16  ;;  %v76_v58 = vld [vmem:[%s16490_s0 + $0x13c] sm:$0xf]  ;;  %v11916_v62 = vld [vmem:[%s16490_s0 + $0x2c] sm:$0x1] }
  0xc6   :  { %v685_v20 = vrot.slane %v683_v8, 5  ;;  %10949 = vmatmul.mubr.msk.bf16.gmra.mrb[40].mxu0 %vm993_vm4, %v9717_v9  ;;  %v668_v13 = vsel %vm12222_vm3, %v663_v10, %v667_v51  ;;  %v673_v57 = vrot.slane %v672_v11, 4  ;;  %v9825_v25 = vcombine.low %v5028_v12, %v5031_v17  ;;  %v9763_v11 = vld [vmem:[%s16490_s0 + $0x30] sm:$0xe] }
  0xc7   :  { %v693_v26 = vshrl.u32 %v74_v2, 16  ;;  %v691_v14 = vrot.slane %v689_v21, 5  ;;  %v699_v48 = vshll.u32 %v115_v6, 16  ;;  %v9793_v28 = vrot.slane %v9761_v15, 9 }
  0xc8   :  { %v686_v27 = vor.u32 %v685_v20, %v682_v18  ;;  %v678_v30 = vsel %vm12222_vm3, %v673_v57, %v677_v63  ;;  %10974 = vmatprep.mubr.msk.bf16.mxu0 %vm993_vm4, %v9825_v25  ;;  %v5038_v32 = vsel %vm12867_vm7, %v12272_v24, %v5037_v22  ;;  %v6123_v34 = vsel %vm1090_vm0, %v11914_v33, 0  ;;  %v9762_v22 = vld [vmem:[%s16490_s0 + $0x24] sm:$0xe]  ;;  %v79_v57 = vld [vmem:[%s16490_s0 + $0x150] sm:$0xf] }
  0xc9   :  { %v695_v31 = vrot.slane %v693_v26, 4  ;;  %v9267_v36 = vcombine.low %v668_v13, %v678_v30  ;;  %v701_v19 = vrot.slane %v699_v48, 5  ;;  %v5035_v60 = vsel %vm12867_vm7, %v9793_v28, %v5034_v16  ;;  %v80_v25 = vld [vmem:[%s16490_s0 + $0x154] sm:$0xf]  ;;  %v118_v28 = vld [vmem:[%s16490_s0 + $0x158] sm:$0x1] }
  0xca   :  { %v687_v37 = vrot.slane %v686_v27, 4  ;;  %v9826_v38 = vcombine.low %v5035_v60, %v5038_v32  ;;  %v704_v39 = vshrl.u32 %v75_v23, 16  ;;  %v707_v40 = vshll.u32 %v75_v23, 16  ;;  %v11918_v33 = vld [vmem:[%s16490_s0 + $0x38] sm:$0x1] }
  0xcb   :  { %v696_v24 = vor.u32 %v695_v31, %v691_v14  ;;  %10688 = vmatprep.mubr.msk.bf16.mxu1 %vm993_vm4, %v9267_v36  ;;  %v713_v42 = vshll.u32 %v76_v58, 16  ;;  %v717_v43 = vshrl.u32 %v76_v58, 16  ;;  %v723_v16 = vshll.u32 %v116_v35, 16  ;;  %v11917_v31 = vld [vmem:[%s16490_s0 + $0x34] sm:$0xf] }
  0xcc   :  { %v692_v55 = vsel %vm12222_vm3, %v687_v37, %v691_v14  ;;  %v706_v46 = vrot.slane %v704_v39, 4  ;;  %v709_v47 = vrot.slane %v707_v40, 5  ;;  %v9794_v49 = vrot.slane %v9762_v22, 9  ;;  %v9764_v35 = vld [vmem:[%s16490_s0 + $0x3c] sm:$0xe] }
  0xcd   :  { %v697_v45 = vrot.slane %v696_v24, 4  ;;  %v715_v51 = vrot.slane %v713_v42, 5  ;;  %v719_v52 = vrot.slane %v717_v43, 4  ;;  %v725_v53 = vrot.slane %v723_v16, 5  ;;  %v81_v40 = vld [vmem:[%s16490_s0 + $0x15c] sm:$0xf] }
  0xce   :  { %v5041_v56 = vrot.slane %v11915_v54, 5  ;;  %10975 = vmatmul.mubr.msk.bf16.vlgmr.msra.gmra.mrb[0].mxu0 %vm993_vm4, %v9826_v38  ;;  %v710_v61 = vor.u32 %v709_v47, %v706_v46  ;;  %v5044_v63 = vrot.slane %v11916_v62, 5  ;;  %v728_v1 = vshrl.u32 %v77_v41, 16  ;;  %v82_v16 = vld [vmem:[%s16490_s0 + $0x160] sm:$0xf] }
  0xcf   :  { %v702_v59 = vsel %vm12222_vm3, %v697_v45, %v701_v19  ;;  %11039 = vmatpush3.bf16.msra.mxu0 %v6123_v34  ;;  %v720_v4 = vor.u32 %v719_v52, %v715_v51  ;;  %v731_v9 = vshll.u32 %v77_v41, 16  ;;  %v737_v10 = vshll.u32 %v78_v44, 16  ;;  %v12996_v54 = vld [vmem:[%s16489_s1 + $0xe] sm:$0x3]  ;;  %v11919_v62 = vld [vmem:[%s16490_s0 + $0x40] sm:$0xf] }
  0xd0   :  { %v9268_v2 = vcombine.low %v692_v55, %v702_v59  ;;  %v5042_v5 = vsel %vm12867_vm7, %v9794_v49, %v5041_v56  ;;  %v5043_v6 = vrot.slane %v5041_v56, 4  ;;  %v711_v7 = vrot.slane %v710_v61, 4  ;;  %11798 = vmatprep.subr.msk.bf16.mxu0 %vm1090_vm0, %v12996_v54 }
  0xd1   :  { %v730_v8 = vrot.slane %v728_v1, 4  ;;  %v721_v12 = vrot.slane %v720_v4, 4  ;;  %v741_v17 = vshrl.u32 %v78_v44, 16  ;;  %v747_v18 = vshll.u32 %v117_v50, 16 }
  0xd2   :  { %10689 = vmatmul.mubr.msk.bf16.gmra.mrb[44].mxu1 %vm993_vm4, %v9268_v2  ;;  %v5045_v15 = vsel %vm12867_vm7, %v5043_v6, %v5044_v63  ;;  %v716_v20 = vsel %vm12222_vm3, %v711_v7, %v715_v51  ;;  %v733_v23 = vrot.slane %v731_v9, 5  ;;  %v739_v13 = vrot.slane %v737_v10, 5  ;;  %v11920_v2 = vld [vmem:[%s16490_s0 + $0x44] sm:$0x1]  ;;  %v9765_v7 = vld [vmem:[%s16490_s0 + $0x48] sm:$0xe] }
  0xd3   :  { %v9827_v21 = vcombine.low %v5042_v5, %v5045_v15  ;;  %v726_v26 = vsel %vm12222_vm3, %v721_v12, %v725_v53  ;;  %v743_v27 = vrot.slane %v741_v17, 4  ;;  %v749_v14 = vrot.slane %v747_v18, 5  ;;  %v119_v53 = vld [vmem:[%s16490_s0 + $0x164] sm:$0x1]  ;;  %v13016_v12 = vld [vmem:[%s16490_s0 + $0x168] sm:$0xf] }
  0xd4   :  { %v9795_v48 = vrot.slane %v9763_v11, 9  ;;  %v9269_v58 = vcombine.low %v716_v20, %v726_v26  ;;  %v734_v30 = vor.u32 %v733_v23, %v730_v8  ;;  %v5048_v32 = vrot.slane %v11917_v31, 5  ;;  %v11921_v31 = vld [vmem:[%s16490_s0 + $0x4c] sm:$0xf] }
  0xd5   :  { %10978 = vmatprep.mubr.msk.bf16.mxu0 %vm993_vm4, %v9827_v21  ;;  %v5051_v34 = vrot.slane %v11918_v33, 5  ;;  %v744_v36 = vor.u32 %v743_v27, %v739_v13  ;;  %v752_v37 = vshrl.u32 %v79_v57, 16  ;;  %v755_v19 = vshll.u32 %v79_v57, 16  ;;  %v11922_v33 = vld [vmem:[%s16490_s0 + $0x50] sm:$0x1] }
  0xd6   :  { %v761_v60 = vshll.u32 %v80_v25, 16  ;;  %10692 = vmatprep.mubr.msk.bf16.mxu1 %vm993_vm4, %v9269_v58  ;;  %v735_v22 = vrot.slane %v734_v30, 4  ;;  %v5049_v24 = vsel %vm12867_vm7, %v9795_v48, %v5048_v32  ;;  %v5050_v38 = vrot.slane %v5048_v32, 4 }
  0xd7   :  { %v765_v39 = vshrl.u32 %v80_v25, 16  ;;  %v745_v41 = vrot.slane %v744_v36, 4  ;;  %v754_v55 = vrot.slane %v752_v37, 4  ;;  %v757_v42 = vrot.slane %v755_v19, 5  ;;  %v13027_v25 = vld [vmem:[%s16490_s0 + $0x16c] sm:$0xf] }
  0xd8   :  { %v763_v43 = vrot.slane %v761_v60, 5  ;;  %v740_v44 = vsel %vm12222_vm3, %v735_v22, %v739_v13  ;;  %v5052_v45 = vsel %vm12867_vm7, %v5050_v38, %v5051_v34  ;;  %v771_v47 = vshll.u32 %v118_v28, 16  ;;  %v120_v28 = vld [vmem:[%s16490_s0 + $0x170] sm:$0x1] }
  0xd9   :  { %v767_v46 = vrot.slane %v765_v39, 4  ;;  %v750_v49 = vsel %vm12222_vm3, %v745_v41, %v749_v14  ;;  %v9828_v50 = vcombine.low %v5049_v24, %v5052_v45  ;;  %v758_v51 = vor.u32 %v757_v42, %v754_v55 }
  0xda   :  { %v9796_v52 = vrot.slane %v9764_v35, 9  ;;  %v9270_v56 = vcombine.low %v740_v44, %v750_v49  ;;  %v773_v61 = vrot.slane %v771_v47, 5  ;;  %v5055_v63 = vrot.slane %v11919_v62, 5  ;;  %v9766_v35 = vld [vmem:[%s16490_s0 + $0x54] sm:$0xe] }
  0xdb   :  { %v768_v59 = vor.u32 %v767_v46, %v763_v43  ;;  %10979 = vmatmul.mubr.msk.bf16.gmra.mrb[4].mxu0 %vm993_vm4, %v9828_v50  ;;  %v759_v1 = vrot.slane %v758_v51, 4  ;;  %v5058_v4 = vrot.slane %v11920_v2, 5  ;;  %v776_v5 = vshrl.u32 %v81_v40, 16  ;;  %v11924_v2 = vld [vmem:[%s16490_s0 + $0x5c] sm:$0x1] }
  0xdc   :  { %v779_v6 = vshll.u32 %v81_v40, 16  ;;  %10693 = vmatmul.mubr.msk.bf16.gmra.mrb[48].mxu1 %vm993_vm4, %v9270_v56  ;;  %v5056_v9 = vsel %vm12867_vm7, %v9796_v52, %v5055_v63  ;;  %v5057_v10 = vrot.slane %v5055_v63, 4  ;;  %v785_v11 = vshll.u32 %v82_v16, 16  ;;  %v13052_v40 = vld [vmem:[%s16490_s0 + $0x174] sm:$0xf] }
  0xdd   :  { %v769_v8 = vrot.slane %v768_v59, 4  ;;  %v764_v15 = vsel %vm12222_vm3, %v759_v1, %v763_v43  ;;  %v778_v17 = vrot.slane %v776_v5, 4  ;;  %v789_v20 = vshrl.u32 %v82_v16, 16  ;;  %v13059_v16 = vld [vmem:[%s16490_s0 + $0x178] sm:$0xf] }
  0xde   :  { %v781_v18 = vrot.slane %v779_v6, 5  ;;  %v5059_v23 = vsel %vm12867_vm7, %v5057_v10, %v5058_v4  ;;  %v787_v13 = vrot.slane %v785_v11, 5  ;;  %v795_v57 = vshll.u32 %v119_v53, 16  ;;  %v121_v63 = vld [vmem:[%s16490_s0 + $0x17c] sm:$0x1] }
  0xdf   :  { %v774_v21 = vsel %vm12222_vm3, %v769_v8, %v773_v61  ;;  %v9829_v27 = vcombine.low %v5056_v9, %v5059_v23  ;;  %v791_v48 = vrot.slane %v789_v20, 4  ;;  %v9797_v30 = vrot.slane %v9765_v7, 9  ;;  %v11923_v61 = vld [vmem:[%s16490_s0 + $0x58] sm:$0xf]  ;;  %v9767_v7 = vld [vmem:[%s16490_s0 + $0x60] sm:$0xe] }
  0xe0   :  { %v9271_v26 = vcombine.low %v764_v15, %v774_v21  ;;  %v782_v14 = vor.u32 %v781_v18, %v778_v17  ;;  %v797_v58 = vrot.slane %v795_v57, 5  ;;  %v5062_v32 = vrot.slane %v11921_v31, 5  ;;  %v13087_v15 = vld [vmem:[%s16490_s0 + $0x180] sm:$0xf]  ;;  %v13095_v23 = vld [vmem:[%s16490_s0 + $0x184] sm:$0xf] }
  0xe1   :  { %v5065_v34 = vrot.slane %v11922_v33, 5  ;;  %10982 = vmatprep.mubr.msk.bf16.mxu0 %vm993_vm4, %v9829_v27  ;;  %v792_v37 = vor.u32 %v791_v48, %v787_v13  ;;  %v800_v19 = vshrl.u32 %v13016_v12, 16  ;;  %v803_v60 = vshll.u32 %v13016_v12, 16  ;;  %v11925_v33 = vld [vmem:[%s16490_s0 + $0x64] sm:$0xf] }
  0xe2   :  { %10696 = vmatprep.mubr.msk.bf16.mxu1 %vm993_vm4, %v9271_v26  ;;  %v783_v36 = vrot.slane %v782_v14, 4  ;;  %v5063_v22 = vsel %vm12867_vm7, %v9797_v30, %v5062_v32  ;;  %v5064_v24 = vrot.slane %v5062_v32, 4  ;;  %v809_v38 = vshll.u32 %v13027_v25, 16  ;;  %v122_v30 = vld [vmem:[%s16490_s0 + $0x188] sm:$0x1] }
  0xe3   :  { %v813_v39 = vshrl.u32 %v13027_v25, 16  ;;  %v793_v55 = vrot.slane %v792_v37, 4  ;;  %v802_v42 = vrot.slane %v800_v19, 4  ;;  %v805_v43 = vrot.slane %v803_v60, 5  ;;  %v9768_v37 = vld [vmem:[%s16490_s0 + $0x6c] sm:$0xe] }
  0xe4   :  { %v788_v41 = vsel %vm12222_vm3, %v783_v36, %v787_v13  ;;  %v5066_v44 = vsel %vm12867_vm7, %v5064_v24, %v5065_v34  ;;  %v811_v45 = vrot.slane %v809_v38, 5  ;;  %v819_v47 = vshll.u32 %v120_v28, 16 }
  0xe5   :  { %v815_v46 = vrot.slane %v813_v39, 4  ;;  %v798_v49 = vsel %vm12222_vm3, %v793_v55, %v797_v58  ;;  %v9830_v50 = vcombine.low %v5063_v22, %v5066_v44  ;;  %v806_v51 = vor.u32 %v805_v43, %v802_v42  ;;  %v13124_v42 = vld [vmem:[%s16490_s0 + $0x18c] sm:$0xf] }
  0xe6   :  { %v9798_v52 = vrot.slane %v9766_v35, 9  ;;  %v9272_v53 = vcombine.low %v788_v41, %v798_v49  ;;  %v821_v59 = vrot.slane %v819_v47, 5  ;;  %v5069_v62 = vrot.slane %v11923_v61, 5  ;;  %v11926_v35 = vld [vmem:[%s16490_s0 + $0x68] sm:$0x1] }
  0xe7   :  { %v816_v56 = vor.u32 %v815_v46, %v811_v45  ;;  %10983 = vmatmul.mubr.msk.bf16.gmra.mrb[8].mxu0 %vm993_vm4, %v9830_v50  ;;  %v807_v1 = vrot.slane %v806_v51, 4  ;;  %v5072_v4 = vrot.slane %v11924_v2, 5  ;;  %v824_v5 = vshrl.u32 %v13052_v40, 16  ;;  %v13131_v47 = vld [vmem:[%s16490_s0 + $0x190] sm:$0xf] }
  0xe8   :  { %v827_v6 = vshll.u32 %v13052_v40, 16  ;;  %10697 = vmatmul.mubr.msk.bf16.gmra.mrb[52].mxu1 %vm993_vm4, %v9272_v53  ;;  %v5070_v9 = vsel %vm12867_vm7, %v9798_v52, %v5069_v62  ;;  %v5071_v10 = vrot.slane %v5069_v62, 4  ;;  %v833_v11 = vshll.u32 %v13059_v16, 16  ;;  %v123_v62 = vld [vmem:[%s16490_s0 + $0x194] sm:$0x1] }
  0xe9   :  { %v817_v8 = vrot.slane %v816_v56, 4  ;;  %v812_v17 = vsel %vm12222_vm3, %v807_v1, %v811_v45  ;;  %v826_v18 = vrot.slane %v824_v5, 4  ;;  %v837_v21 = vshrl.u32 %v13059_v16, 16 }
  0xea   :  { %v829_v20 = vrot.slane %v827_v6, 5  ;;  %v5073_v57 = vsel %vm12867_vm7, %v5071_v10, %v5072_v4  ;;  %v835_v26 = vrot.slane %v833_v11, 5  ;;  %v843_v27 = vshll.u32 %v121_v63, 16  ;;  %v11927_v4 = vld [vmem:[%s16490_s0 + $0x70] sm:$0xf] }
  0xeb   :  { %v822_v13 = vsel %vm12222_vm3, %v817_v8, %v821_v59  ;;  %v9831_v48 = vcombine.low %v5070_v9, %v5073_v57  ;;  %v839_v58 = vrot.slane %v837_v21, 4  ;;  %v9799_v32 = vrot.slane %v9767_v7, 9  ;;  %v11928_v7 = vld [vmem:[%s16490_s0 + $0x74] sm:$0x1]  ;;  %v9769_v11 = vld [vmem:[%s16490_s0 + $0x78] sm:$0xe] }
  0xec   :  { %v9273_v14 = vcombine.low %v812_v17, %v822_v13  ;;  %v830_v28 = vor.u32 %v829_v20, %v826_v18  ;;  %v845_v31 = vrot.slane %v843_v27, 5  ;;  %v5076_v34 = vrot.slane %v11925_v33, 5  ;;  %v9770_v13 = vld [vmem:[%s16490_s0 + $0x84] sm:$0xe] }
  0xed   :  { %v5079_v36 = vrot.slane %v11926_v35, 5  ;;  %10986 = vmatprep.mubr.msk.bf16.mxu0 %vm993_vm4, %v9831_v48  ;;  %v840_v60 = vor.u32 %v839_v58, %v835_v26  ;;  %v848_v22 = vshrl.u32 %v13087_v15, 16  ;;  %v851_v24 = vshll.u32 %v13087_v15, 16 }
  0xee   :  { %10700 = vmatprep.mubr.msk.bf16.mxu1 %vm993_vm4, %v9273_v14  ;;  %v831_v19 = vrot.slane %v830_v28, 4  ;;  %v5077_v38 = vsel %vm12867_vm7, %v9799_v32, %v5076_v34  ;;  %v5078_v39 = vrot.slane %v5076_v34, 4  ;;  %v857_v41 = vshll.u32 %v13095_v23, 16 }
  0xef   :  { %v861_v55 = vshrl.u32 %v13095_v23, 16  ;;  %v841_v44 = vrot.slane %v840_v60, 4  ;;  %v850_v45 = vrot.slane %v848_v22, 4  ;;  %v853_v46 = vrot.slane %v851_v24, 5  ;;  %v11930_v60 = vld [vmem:[%s16490_s0 + $0x80] sm:$0x1] }
  0xf0   :  { %v836_v43 = vsel %vm12222_vm3, %v831_v19, %v835_v26  ;;  %v5080_v49 = vsel %vm12867_vm7, %v5078_v39, %v5079_v36  ;;  %v859_v50 = vrot.slane %v857_v41, 5  ;;  %v867_v52 = vshll.u32 %v122_v30, 16 }
  0xf1   :  { %v863_v51 = vrot.slane %v861_v55, 4  ;;  %v846_v53 = vsel %vm12222_vm3, %v841_v44, %v845_v31  ;;  %v9832_v56 = vcombine.low %v5077_v38, %v5080_v49  ;;  %v854_v59 = vor.u32 %v853_v46, %v850_v45  ;;  %v9771_v31 = vld [vmem:[%s16490_s0 + $0x90] sm:$0xe]  ;;  %v11931_v44 = vld [vmem:[%s16490_s0 + $0x88] sm:$0xf] }
  0xf2   :  { %v9800_v61 = vrot.slane %v9768_v37, 9  ;;  %v9274_v63 = vcombine.low %v836_v43, %v846_v53  ;;  %v869_v2 = vrot.slane %v867_v52, 5  ;;  %v5083_v5 = vrot.slane %v11927_v4, 5  ;;  %v11929_v37 = vld [vmem:[%s16490_s0 + $0x7c] sm:$0xf] }
  0xf3   :  { %v864_v1 = vor.u32 %v863_v51, %v859_v50  ;;  %10987 = vmatmul.mubr.msk.bf16.gmra.mrb[12].mxu0 %vm993_vm4, %v9832_v56  ;;  %v855_v6 = vrot.slane %v854_v59, 4  ;;  %v5086_v8 = vrot.slane %v11928_v7, 5  ;;  %v872_v9 = vshrl.u32 %v13124_v42, 16  ;;  %v11932_v46 = vld [vmem:[%s16490_s0 + $0x8c] sm:$0x1] }
  0xf4   :  { %v875_v10 = vshll.u32 %v13124_v42, 16  ;;  %10701 = vmatmul.mubr.msk.bf16.gmra.mrb[56].mxu1 %vm993_vm4, %v9274_v63  ;;  %v5084_v18 = vsel %vm12867_vm7, %v9800_v61, %v5083_v5  ;;  %v5085_v20 = vrot.slane %v5083_v5, 4  ;;  %v881_v21 = vshll.u32 %v13131_v47, 16  ;;  %v11934_v4 = vld [vmem:[%s16490_s0] sm:$0xf] }
  0xf5   :  { %v865_v17 = vrot.slane %v864_v1, 4  ;;  %v860_v57 = vsel %vm12222_vm3, %v855_v6, %v859_v50  ;;  %v874_v26 = vrot.slane %v872_v9, 4  ;;  %v885_v14 = vshrl.u32 %v13131_v47, 16  ;;  %v9772_v50 = vld [vmem:[%s16490_s0 + $0x9c] sm:$0xe] }
  0xf6   :  { %v877_v27 = vrot.slane %v875_v10, 5  ;;  %v5087_v28 = vsel %vm12867_vm7, %v5085_v20, %v5086_v8  ;;  %v883_v58 = vrot.slane %v881_v21, 5  ;;  %v891_v30 = vshll.u32 %v123_v62, 16  ;;  %v11933_v62 = vld [vmem:[%s16490_s0 + $0x94] sm:$0xf] }
  0xf7   :  { %v870_v48 = vsel %vm12222_vm3, %v865_v17, %v869_v2  ;;  %v9833_v33 = vcombine.low %v5084_v18, %v5087_v28  ;;  %v887_v35 = vrot.slane %v885_v14, 4  ;;  %v9801_v36 = vrot.slane %v9769_v11, 9  ;;  %v13205_v5 = vld [vmem:[%s16490_s0 + $0x4] sm:$0xf]  ;;  %v11936_v7 = vld [vmem:[%s16490_s0 + $0x98] sm:$0x1] }
  0xf8   :  { %v9275_v32 = vcombine.low %v860_v57, %v870_v48  ;;  %v878_v34 = vor.u32 %v877_v27, %v874_v26  ;;  %v5090_v19 = vrot.slane %v11929_v37, 5  ;;  %v5093_v22 = vrot.slane %v11930_v60, 5  ;;  %v11937_v20 = vld [vmem:[%s16490_s0 + $0xa0] sm:$0xf]  ;;  %v11939_v14 = vld [vmem:[%s16490_s0 + $0xac] sm:$0xf] }
  0xf9   :  { %10990 = vmatprep.mubr.msk.bf16.mxu0 %vm993_vm4, %v9833_v33  ;;  %v888_v38 = vor.u32 %v887_v35, %v883_v58  ;;  %v893_v39 = vrot.slane %v891_v30, 5  ;;  %v9802_v41 = vrot.slane %v9770_v13, 9  ;;  %v5097_v45 = vrot.slane %v11931_v44, 5  ;;  %v11938_v13 = vld [vmem:[%s16490_s0 + $0xa4] sm:$0x1] }
  0xfa   :  { %10704 = vmatprep.mubr.msk.bf16.mxu1 %vm993_vm4, %v9275_v32  ;;  %v879_v24 = vrot.slane %v878_v34, 4  ;;  %v5091_v55 = vsel %vm12867_vm7, %v9801_v36, %v5090_v19  ;;  %v5092_v43 = vrot.slane %v5090_v19, 4  ;;  %v5100_v49 = vrot.slane %v11932_v46, 5  ;;  %v9773_v30 = vld [vmem:[%s16490_s0 + $0xa8] sm:$0xe] }
  0xfb   :  { %v889_v52 = vrot.slane %v888_v38, 4  ;;  %v9803_v53 = vrot.slane %v9771_v31, 9  ;;  %v5098_v59 = vsel %vm12867_vm7, %v9802_v41, %v5097_v45  ;;  %v5099_v61 = vrot.slane %v5097_v45, 4  ;;  %v9774_v31 = vld [vmem:[%s16490_s0 + $0xb4] sm:$0xe] }
  0xfc   :  { %v884_v51 = vsel %vm12222_vm3, %v879_v24, %v883_v58  ;;  %v5094_v56 = vsel %vm12867_vm7, %v5092_v43, %v5093_v22  ;;  %v5104_v63 = vrot.slane %v11933_v62, 5  ;;  %v9309_v6 = vcombine.low %v11934_v4, %v13205_v5  ;;  %v11940_v32 = vld [vmem:[%s16490_s0 + $0xc] sm:$0xf]  ;;  %v13244_v33 = vld [vmem:[%s16490_s0 + $0x10] sm:$0xf] }
  0xfd   :  { %v894_v1 = vsel %vm12222_vm3, %v889_v52, %v893_v39  ;;  %v9834_v2 = vcombine.low %v5091_v55, %v5094_v56  ;;  %v5107_v8 = vrot.slane %v11936_v7, 5  ;;  %v5101_v10 = vsel %vm12867_vm7, %v5099_v61, %v5100_v49  ;;  %v11942_v37 = vld [vmem:[%s16490_s0 + $0xb8] sm:$0xf]  ;;  %v11943_v38 = vld [vmem:[%s16490_s0 + $0xb0] sm:$0x1] }
  0xfe   :  { %v9276_v9 = vcombine.low %v884_v51, %v894_v1  ;;  %v5106_v11 = vrot.slane %v5104_v63, 4  ;;  %v9835_v17 = vcombine.low %v5098_v59, %v5101_v10  ;;  %v9804_v18 = vrot.slane %v9772_v50, 9  ;;  %v11944_v41 = vld [vmem:[%s16490_s0 + $0x18] sm:$0xf]  ;;  %v13261_v55 = vld [vmem:[%s16490_s0 + $0x1c] sm:$0xf] }
  0xff   :  { %10991 = vmatmul.mubr.msk.bf16.gmra.mrb[16].mxu0 %vm993_vm4, %v9834_v2  ;;  %v5111_v21 = vrot.slane %v11937_v20, 5  ;;  %v5114_v57 = vrot.slane %v11938_v13, 5  ;;  %v5105_v26 = vsel %vm12867_vm7, %v9803_v53, %v5104_v63  ;;  %v5118_v48 = vrot.slane %v11939_v14, 5  ;;  %v11946_v46 = vld [vmem:[%s16490_s0 + $0xbc] sm:$0x1] }
 0x100   :  { %10705 = vmatmul.mubr.msk.bf16.gmra.mrb[60].mxu1 %vm993_vm4, %v9276_v9  ;;  %v5108_v27 = vsel %vm12867_vm7, %v5106_v11, %v5107_v8  ;;  %10994 = vmatprep.mubr.msk.bf16.mxu0 %vm993_vm4, %v9835_v17  ;;  %v9310_v34 = vcombine.low %v11940_v32, %v13244_v33  ;;  %v5125_v19 = vrot.slane %v11942_v37, 5  ;;  %v9805_v22 = vrot.slane %v9773_v30, 9  ;;  %v11947_v52 = vld [vmem:[%s16490_s0 + $0xc4] sm:$0xf]  ;;  %v9775_v61 = vld [vmem:[%s16490_s0 + $0xc0] sm:$0xe] }
 0x101   :  { %10710 = vmatprep.mubr.msk.bf16.mxu1 %vm993_vm4, %v9309_v6  ;;  %v5112_v28 = vsel %vm12867_vm7, %v9804_v18, %v5111_v21  ;;  %v5113_v58 = vrot.slane %v5111_v21, 4  ;;  %v9836_v35 = vcombine.low %v5105_v26, %v5108_v27  ;;  %v5120_v24 = vrot.slane %v5118_v48, 4  ;;  %v11948_v62 = vld [vmem:[%s16490_s0 + $0xe8] sm:$0xf]  ;;  %v9776_v1 = vld [vmem:[%s16490_s0 + $0xe4] sm:$0xe] }
 0x102   :  { %v5121_v39 = vrot.slane %v11943_v38, 5  ;;  %v9311_v43 = vcombine.low %v11944_v41, %v13261_v55  ;;  %v9806_v44 = vrot.slane %v9774_v31, 9  ;;  %v5127_v45 = vrot.slane %v5125_v19, 4  ;;  %v11949_v2 = vld [vmem:[%s16490_s0 + $0x24] sm:$0xf] }
 0x103   :  { %v5115_v36 = vsel %vm12867_vm7, %v5113_v58, %v5114_v57  ;;  %v5128_v49 = vrot.slane %v11946_v46, 5  ;;  %v5119_v50 = vsel %vm12867_vm7, %v9805_v22, %v5118_v48  ;;  %v5132_v53 = vrot.slane %v11947_v52, 5  ;;  %v13297_v4 = vld [vmem:[%s16490_s0 + $0x28] sm:$0xf]  ;;  %v11952_v18 = vld [vmem:[%s16490_s0 + $0x30] sm:$0xf] }
 0x104   :  { %v9837_v60 = vcombine.low %v5112_v28, %v5115_v36  ;;  %v5122_v51 = vsel %vm12867_vm7, %v5120_v24, %v5121_v39  ;;  %v5126_v56 = vsel %vm12867_vm7, %v9806_v44, %v5125_v19  ;;  %v5139_v63 = vrot.slane %v11948_v62, 5  ;;  %v11951_v11 = vld [vmem:[%s16490_s0 + $0xc8] sm:$0x1]  ;;  %v13309_v20 = vld [vmem:[%s16490_s0 + $0x34] sm:$0xf] }
 0x105   :  { %v5129_v59 = vsel %vm12867_vm7, %v5127_v45, %v5128_v49  ;;  %v9312_v6 = vcombine.low %v11949_v2, %v13297_v4  ;;  %v9838_v7 = vcombine.low %v5119_v50, %v5122_v51  ;;  %v9807_v9 = vrot.slane %v9775_v61, 9  ;;  %v11954_v26 = vld [vmem:[%s16490_s0 + $0xec] sm:$0x1]  ;;  %v9777_v28 = vld [vmem:[%s16490_s0 + $0xf0] sm:$0xe] }
 0x106   :  { %v9839_v8 = vcombine.low %v5126_v56, %v5129_v59  ;;  %v5134_v10 = vrot.slane %v5132_v53, 4  ;;  %v5135_v17 = vrot.slane %v11951_v11, 5  ;;  %v9313_v21 = vcombine.low %v11952_v18, %v13309_v20  ;;  %v11955_v58 = vld [vmem:[%s16490_s0 + $0xf4] sm:$0xf]  ;;  %v9778_v36 = vld [vmem:[%s16490_s0 + $0xfc] sm:$0xe] }
 0x107   :  { %10995 = vmatmul.mubr.msk.bf16.gmra.mrb[20].mxu0 %vm993_vm4, %v9836_v35  ;;  %v9808_v13 = vrot.slane %v9776_v1, 9  ;;  %v5141_v57 = vrot.slane %v5139_v63, 4  ;;  %v5142_v27 = vrot.slane %v11954_v26, 5  ;;  %v5133_v14 = vsel %vm12867_vm7, %v9807_v9, %v5132_v53  ;;  %v11957_v37 = vld [vmem:[%s16490_s0 + $0x3c] sm:$0xf] }
 0x108   :  { %10711 = vmatmul.mubr.msk.bf16.vlgmr.msra.gmra.mrb[0].mxu1 %vm993_vm4, %v9310_v34  ;;  %10998 = vmatprep.mubr.msk.bf16.mxu0 %vm993_vm4, %v9837_v60  ;;  %v5136_v48 = vsel %vm12867_vm7, %v5134_v10, %v5135_v17  ;;  %v5146_v30 = vrot.slane %v11955_v58, 5  ;;  %v11956_v34 = vld [vmem:[%s16490_s0 + $0x100] sm:$0xf]  ;;  %v9809_v24 = vrot.slane %v9777_v28, 9  ;;  %v11959_v41 = vld [vmem:[%s16490_s0 + $0xf8] sm:$0x1] }
 0x109   :  { %10714 = vmatprep.mubr.msk.bf16.mxu1 %vm993_vm4, %v9311_v43  ;;  %v5140_v31 = vsel %vm12867_vm7, %v9808_v13, %v5139_v63  ;;  %v5143_v32 = vsel %vm12867_vm7, %v5141_v57, %v5142_v27  ;;  %v5153_v35 = vrot.slane %v11956_v34, 5  ;;  %v13345_v19 = vld [vmem:[%s16490_s0 + $0x40] sm:$0xf]  ;;  %v9840_v22 = vcombine.low %v5133_v14, %v5136_v48  ;;  %v11960_v44 = vld [vmem:[%s16489_s1 + $0x4] sm:$0x3] }
 0x10a   :  { %v9314_v60 = vcombine.low %v11957_v37, %v13345_v19  ;;  %v9841_v38 = vcombine.low %v5140_v31, %v5143_v32  ;;  %v5148_v39 = vrot.slane %v5146_v30, 4  ;;  %v5149_v43 = vrot.slane %v11959_v41, 5  ;;  %v11961_v46 = vld [vmem:[%s16490_s0 + $0x48] sm:$0xf]  ;;  %v13361_v49 = vld [vmem:[%s16490_s0 + $0x4c] sm:$0xf] }
 0x10b   :  { %v2449_v45 = vsel %vm1090_vm0, %v11960_v44, 0  ;;  %v9315_v50 = vcombine.low %v11961_v46, %v13361_v49  ;;  %v9810_v51 = vrot.slane %v9778_v36, 9  ;;  %v5155_v52 = vrot.slane %v5153_v35, 4  ;;  %v11963_v53 = vld [vmem:[%s16490_s0 + $0x104] sm:$0x1] }
 0x10c   :  { %v5156_v56 = vrot.slane %v11963_v53, 5  ;;  %10775 = vmatpush3.bf16.msra.mxu1 %v2449_v45  ;;  %v5147_v59 = vsel %vm12867_vm7, %v9809_v24, %v5146_v30  ;;  %v5150_v61 = vsel %vm12867_vm7, %v5148_v39, %v5149_v43  ;;  %v11964_v62 = vld [vmem:[%s16490_s0 + $0x10c] sm:$0xf]  ;;  %v9780_v9 = vld [vmem:[%s16490_s0 + $0x114] sm:$0xe]  ;;  %vm12131_vm8 = vmmov 0  }
 0x10d   :  { %v5160_v63 = vrot.slane %v11964_v62, 5  ;;  %v5154_v1 = vsel %vm12867_vm7, %v9810_v51, %v5153_v35  ;;  %v11966_v10 = vld [vmem:[%s16490_s0 + $0x54] sm:$0xf]  ;;  %v13397_v11 = vld [vmem:[%s16490_s0 + $0x58] sm:$0xf]  ;;  %v9842_v18 = vcombine.low %v5147_v59, %v5150_v61  ;;  %v9812_v58 = vrot.slane %v9780_v9, 9 }
 0x10e   :  { %v5157_v2 = vsel %vm12867_vm7, %v5155_v52, %v5156_v56  ;;  %v9316_v17 = vcombine.low %v11966_v10, %v13397_v11  ;;  %v11968_v26 = vld [vmem:[%s16490_s0 + $0x110] sm:$0x1]  ;;  %v11969_v14 = vld [vmem:[%s16490_s0 + $0x60] sm:$0xf]  ;;  %v13409_v48 = vld [vmem:[%s16490_s0 + $0x64] sm:$0xf] }
 0x10f   :  { %10999 = vmatmul.mubr.msk.bf16.gmra.mrb[24].mxu0 %vm993_vm4, %v9838_v7  ;;  %v11965_v7 = vld [vmem:[%s16490_s0 + $0x118] sm:$0xf]  ;;  %v5162_v57 = vrot.slane %v5160_v63, 4  ;;  %v5163_v27 = vrot.slane %v11968_v26, 5  ;;  %v9317_v28 = vcombine.low %v11969_v14, %v13409_v48  ;;  %v11971_v31 = vld [vmem:[%s16490_s0 + $0x11c] sm:$0x1] }
 0x110   :  { %10715 = vmatmul.mubr.msk.bf16.gmra.mrb[4].mxu1 %vm993_vm4, %v9312_v6  ;;  %11002 = vmatprep.mubr.msk.bf16.mxu0 %vm993_vm4, %v9839_v8  ;;  %v9779_v6 = vld [vmem:[%s16490_s0 + $0x108] sm:$0xe]  ;;  %v5167_v8 = vrot.slane %v11965_v7, 5  ;;  %v5170_v32 = vrot.slane %v11971_v31, 5  ;;  %v9666_v34 = vld [vmem:[%s16490_s0 + $0x130] sm:$0xf] }
 0x111   :  { %10718 = vmatprep.mubr.msk.bf16.mxu1 %vm993_vm4, %v9313_v21  ;;  %v9843_v21 = vcombine.low %v5154_v1, %v5157_v2  ;;  %v9811_v13 = vrot.slane %v9779_v6, 9  ;;  %v5164_v36 = vsel %vm12867_vm7, %v5162_v57, %v5163_v27  ;;  %v11972_v37 = vld [vmem:[%s16490_s0 + $0x124] sm:$0xf]  ;;  %v5181_v39 = vrot.slane %v9666_v34, 5  ;;  %v9667_v41 = vld [vmem:[%s16490_s0 + $0x134] sm:$0x1] }
 0x112   :  { %v5169_v30 = vrot.slane %v5167_v8, 4  ;;  %v9782_v43 = vld [vmem:[%s16490_s0 + $0x12c] sm:$0xe]  ;;  %v13448_v45 = vld [vmem:[%s16490_s0 + $0x70] sm:$0xf]  ;;  %v5184_v6 = vrot.slane %v9667_v41, 5 }
 0x113   :  { %v5161_v35 = vsel %vm12867_vm7, %v9811_v13, %v5160_v63  ;;  %v11973_v44 = vld [vmem:[%s16490_s0 + $0x6c] sm:$0xf]  ;;  %v11975_v56 = vld [vmem:[%s16490_s0 + $0x128] sm:$0x1]  ;;  %v11976_v61 = vld [vmem:[%s16490_s0 + $0x78] sm:$0xf] }
 0x114   :  { %v5171_v24 = vsel %vm12867_vm7, %v5169_v30, %v5170_v32  ;;  %v9318_v46 = vcombine.low %v11973_v44, %v13448_v45  ;;  %v5177_v59 = vrot.slane %v11975_v56, 5  ;;  %v13460_v62 = vld [vmem:[%s16490_s0 + $0x7c] sm:$0xf]  ;;  %v9814_v1 = vrot.slane %v9782_v43, 9  ;;  %v13487_v13 = vld [vmem:[%s16490_s0 + $0x140] sm:$0x1] }
 0x115   :  { %v9319_v63 = vcombine.low %v11976_v61, %v13460_v62  ;;  %v5183_v2 = vrot.slane %v5181_v39, 4  ;;  %v13466_v7 = vld [vmem:[%s16490_s0 + $0x13c] sm:$0xf]  ;;  %v9783_v57 = vld [vmem:[%s16490_s0 + $0x138] sm:$0xe]  ;;  %vm9035_vm9 = vcmask 1041409  }
 0x116   :  { %v9673_v27 = vld [vmem:[%s16490_s0 + $0x14c] sm:$0x1]  ;;  %v9784_v14 = vld [vmem:[%s16490_s0 + $0x144] sm:$0xe]  ;;  %v9815_v34 = vrot.slane %v9783_v57, 9 }
 0x117   :  { %11003 = vmatmul.mubr.msk.bf16.gmra.mrb[28].mxu0 %vm993_vm4, %v9840_v22  ;;  %v5168_v22 = vsel %vm12867_vm7, %v9812_v58, %v5167_v8  ;;  %v9672_v8 = vld [vmem:[%s16490_s0 + $0x148] sm:$0xf]  ;;  %v9675_v41 = vld [vmem:[%s16490_s0 + $0x154] sm:$0xf]  ;;  %v9678_v43 = vld [vmem:[%s16490_s0 + $0x160] sm:$0xf] }
 0x118   :  { %10719 = vmatmul.mubr.msk.bf16.gmra.mrb[8].mxu1 %vm993_vm4, %v9314_v60  ;;  %11006 = vmatprep.mubr.msk.bf16.mxu0 %vm993_vm4, %v9841_v38  ;;  %v5174_v60 = vrot.slane %v11972_v37, 5  ;;  %v9781_v38 = vld [vmem:[%s16490_s0 + $0x120] sm:$0xe]  ;;  %v9845_v51 = vcombine.low %v5168_v22, %v5171_v24  ;;  %v5195_v26 = vrot.slane %v9672_v8, 5  ;;  %v13504_v58 = vld [vmem:[%s16490_s0 + $0x88] sm:$0xf] }
 0x119   :  { %10722 = vmatprep.mubr.msk.bf16.mxu1 %vm993_vm4, %v9315_v50  ;;  %v9844_v50 = vcombine.low %v5161_v35, %v5164_v36  ;;  %v9813_v52 = vrot.slane %v9781_v38, 9  ;;  %v5191_v36 = vrot.slane %v13487_v13, 5  ;;  %v11980_v37 = vld [vmem:[%s16490_s0 + $0x90] sm:$0xf]  ;;  %v9816_v24 = vrot.slane %v9784_v14, 9 }
 0x11a   :  { %v5176_v53 = vrot.slane %v5174_v60, 4  ;;  %v5197_v38 = vrot.slane %v5195_v26, 4  ;;  %v9785_v56 = vld [vmem:[%s16490_s0 + $0x150] sm:$0xe]  ;;  %v13544_v61 = vld [vmem:[%s16489_s1 + $0x6] sm:$0x3] }
 0x11b   :  { %v5175_v9 = vsel %vm12867_vm7, %v9813_v52, %v5174_v60  ;;  %v13514_v60 = vld [vmem:[%s16490_s0 + $0x94] sm:$0xf]  ;;  %v5196_v52 = vsel %vm12867_vm7, %v9816_v24, %v5195_v26  ;;  %11793 = vmatprep.subr.msk.bf16.mxu1 %vm1090_vm0, %v13544_v61  ;;  %v11984_v57 = vld [vmem:[%s16490_s0 + $0xa8] sm:$0xf]  ;;  %v13569_v26 = vld [vmem:[%s16490_s0 + $0xac] sm:$0xf] }
 0x11c   :  { %v5178_v10 = vsel %vm12867_vm7, %v5176_v53, %v5177_v59  ;;  %v9321_v22 = vcombine.low %v11980_v37, %v13514_v60  ;;  %v5209_v59 = vrot.slane %v9678_v43, 5  ;;  %v9682_v24 = vld [vmem:[%s16490_s0 + $0x170] sm:$0x1]  ;;  %v9788_v43 = vld [vmem:[%s16490_s0 + $0x174] sm:$0xe] }
 0x11d   :  { %v9846_v31 = vcombine.low %v5175_v9, %v5178_v10 }
 0x11f   :  { %11007 = vmatmul.mubr.msk.bf16.gmra.mrb[32].mxu0 %vm993_vm4, %v9842_v18  ;;  %v5182_v18 = vsel %vm12867_vm7, %v9814_v1, %v5181_v39  ;;  %v5198_v39 = vrot.slane %v9673_v27, 5  ;;  %v9786_v1 = vld [vmem:[%s16490_s0 + $0x15c] sm:$0xe]  ;;  %v9323_v27 = vcombine.low %v11984_v57, %v13569_v26 }
 0x120   :  { %10723 = vmatmul.mubr.msk.bf16.gmra.mrb[12].mxu1 %vm993_vm4, %v9316_v17  ;;  %11010 = vmatprep.mubr.msk.bf16.mxu0 %vm993_vm4, %v9843_v21  ;;  %v5188_v17 = vrot.slane %v13466_v7, 5  ;;  %v5185_v21 = vsel %vm12867_vm7, %v5183_v2, %v5184_v6  ;;  %v11982_v2 = vld [vmem:[%s16490_s0 + $0x9c] sm:$0xf]  ;;  %v13560_v6 = vld [vmem:[%s16490_s0 + $0xa0] sm:$0xf]  ;;  %v9818_v14 = vrot.slane %v9786_v1, 9 }
 0x121   :  { %10726 = vmatprep.mubr.msk.bf16.mxu1 %vm993_vm4, %v9317_v28  ;;  %v11978_v28 = vld [vmem:[%s16490_s0 + $0x84] sm:$0xf]  ;;  %v9847_v32 = vcombine.low %v5182_v18, %v5185_v21  ;;  %v5199_v53 = vsel %vm12867_vm7, %v5197_v38, %v5198_v39  ;;  %v9322_v8 = vcombine.low %v11982_v2, %v13560_v6  ;;  %v9787_v38 = vld [vmem:[%s16490_s0 + $0x168] sm:$0xe]  ;;  %v13617_v1 = vld [vmem:[%s16490_s0 + $0xdc] sm:$0xf] }
 0x122   :  { %v9320_v30 = vcombine.low %v11978_v28, %v13504_v58  ;;  %v5190_v35 = vrot.slane %v5188_v17, 4  ;;  %v5189_v44 = vsel %vm12867_vm7, %v9815_v34, %v5188_v17  ;;  %v9849_v10 = vcombine.low %v5196_v52, %v5199_v53 }
 0x123   :  { %v9817_v17 = vrot.slane %v9785_v56, 9  ;;  %v5211_v28 = vrot.slane %v5209_v59, 4  ;;  %v5210_v37 = vsel %vm12867_vm7, %v9818_v14, %v5209_v59  ;;  %v9819_v53 = vrot.slane %v9787_v38, 9 }
 0x124   :  { %v5219_v59 = vrot.slane %v9682_v24, 5 }
 0x127   :  { %11011 = vmatmul.mubr.msk.bf16.gmra.mrb[36].mxu0 %vm993_vm4, %v9844_v50  ;;  %v9676_v50 = vld [vmem:[%s16490_s0 + $0x158] sm:$0x1] }
 0x128   :  { %10727 = vmatmul.mubr.msk.bf16.gmra.mrb[16].mxu1 %vm993_vm4, %v9318_v46  ;;  %11014 = vmatprep.mubr.msk.bf16.mxu0 %vm993_vm4, %v9845_v51  ;;  %v5192_v46 = vsel %vm12867_vm7, %v5190_v35, %v5191_v36  ;;  %v5202_v51 = vrot.slane %v9675_v41, 5  ;;  %v5205_v21 = vrot.slane %v9676_v50, 5  ;;  %v9685_v41 = vld [vmem:[%s16490_s0 + $0x17c] sm:$0x1] }
 0x129   :  { %10730 = vmatprep.mubr.msk.bf16.mxu1 %vm993_vm4, %v9319_v63  ;;  %v9679_v63 = vld [vmem:[%s16490_s0 + $0x164] sm:$0x1]  ;;  %v9848_v9 = vcombine.low %v5189_v44, %v5192_v46  ;;  %v11986_v44 = vld [vmem:[%s16490_s0 + $0xb4] sm:$0xf]  ;;  %v13608_v46 = vld [vmem:[%s16490_s0 + $0xb8] sm:$0xf] }
 0x12a   :  { %v5204_v18 = vrot.slane %v5202_v51, 4  ;;  %v5203_v34 = vsel %vm12867_vm7, %v9817_v17, %v5202_v51  ;;  %v9324_v50 = vcombine.low %v11986_v44, %v13608_v46  ;;  %v9687_v17 = vld [vmem:[%s16490_s0 + $0x184] sm:$0xf]  ;;  %v11992_v44 = vld [vmem:[%s16490_s0 + $0xf0] sm:$0xf] }
 0x12c   :  { %v5206_v35 = vsel %vm12867_vm7, %v5204_v18, %v5205_v21  ;;  %v9690_v18 = vld [vmem:[%s16490_s0 + $0x190] sm:$0xf] }
 0x12d   :  { %v9850_v51 = vcombine.low %v5203_v34, %v5206_v35  ;;  %v9691_v34 = vld [vmem:[%s16490_s0 + $0x194] sm:$0x1]  ;;  %v9790_v35 = vld [vmem:[%s16490_s0 + $0x18c] sm:$0xe] }
 0x12f   :  { %11015 = vmatmul.mubr.msk.bf16.gmra.mrb[40].mxu0 %vm993_vm4, %v9846_v31  ;;  %v9681_v31 = vld [vmem:[%s16490_s0 + $0x16c] sm:$0xf] }
 0x130   :  { %10731 = vmatmul.mubr.msk.bf16.gmra.mrb[20].mxu1 %vm993_vm4, %v9320_v30  ;;  %11018 = vmatprep.mubr.msk.bf16.mxu0 %vm993_vm4, %v9847_v32  ;;  %v5212_v30 = vrot.slane %v9679_v63, 5  ;;  %v9684_v32 = vld [vmem:[%s16490_s0 + $0x178] sm:$0xf]  ;;  %v5216_v36 = vrot.slane %v9681_v31, 5  ;;  %v9789_v31 = vld [vmem:[%s16490_s0 + $0x180] sm:$0xe] }
 0x131   :  { %10734 = vmatprep.mubr.msk.bf16.mxu1 %vm993_vm4, %v9321_v22  ;;  %v5223_v39 = vrot.slane %v9684_v32, 5  ;;  %v11988_v63 = vld [vmem:[%s16490_s0 + $0xd8] sm:$0xf]  ;;  %v5237_v32 = vrot.slane %v9690_v18, 5 }
 0x132   :  { %v5213_v22 = vsel %vm12867_vm7, %v5211_v28, %v5212_v30  ;;  %v5218_v56 = vrot.slane %v5216_v36, 4  ;;  %v9325_v2 = vcombine.low %v11988_v63, %v13617_v1  ;;  %v5217_v21 = vsel %vm12867_vm7, %v9819_v53, %v5216_v36  ;;  %v9688_v30 = vld [vmem:[%s16490_s0 + $0x188] sm:$0x1]  ;;  %v11990_v36 = vld [vmem:[%s16490_s0 + $0xe4] sm:$0xf] }
 0x133   :  { %v9851_v52 = vcombine.low %v5210_v37, %v5213_v22  ;;  %v13656_v37 = vld [vmem:[%s16490_s0 + $0xe8] sm:$0xf]  ;;  %v5239_v53 = vrot.slane %v5237_v32, 4  ;;  %v9791_v18 = vld [vmem:[%s16490_s0 + $0x198] sm:$0xe] }
 0x134   :  { %v5220_v57 = vsel %vm12867_vm7, %v5218_v56, %v5219_v59  ;;  %v9326_v22 = vcombine.low %v11990_v36, %v13656_v37  ;;  %v5240_v56 = vrot.slane %v9691_v34, 5  ;;  %v9693_v59 = vld [vmem:[%s16490_s0 + $0x19c] sm:$0xf]  ;;  %v11996_v34 = vld [vmem:[%s16490_s0 + $0x108] sm:$0xf] }
 0x135   :  { %v9852_v24 = vcombine.low %v5217_v21, %v5220_v57  ;;  %v11994_v21 = vld [vmem:[%s16490_s0 + $0xfc] sm:$0xf]  ;;  %v13695_v57 = vld [vmem:[%s16490_s0 + $0x100] sm:$0xf] }
 0x137   :  { %11019 = vmatmul.mubr.msk.bf16.gmra.mrb[44].mxu0 %vm993_vm4, %v9848_v9  ;;  %v5225_v9 = vrot.slane %v5223_v39, 4 }
 0x138   :  { %10735 = vmatmul.mubr.msk.bf16.gmra.mrb[24].mxu1 %vm993_vm4, %v9322_v8  ;;  %11022 = vmatprep.mubr.msk.bf16.mxu0 %vm993_vm4, %v9849_v10  ;;  %v9820_v8 = vrot.slane %v9788_v43, 9  ;;  %v5226_v10 = vrot.slane %v9685_v41, 5  ;;  %v5233_v43 = vrot.slane %v9688_v30, 5  ;;  %v9823_v30 = vrot.slane %v9791_v18, 9  ;;  %v11829_v18 = vld [vmem:[%s16490_s0 + $0x30] sm:$0xff]  }
 0x139   :  { %10738 = vmatprep.mubr.msk.bf16.mxu1 %vm993_vm4, %v9323_v27  ;;  %v5230_v27 = vrot.slane %v9687_v17, 5  ;;  %v9694_v17 = vld [vmem:[%s16490_s0 + $0x1a0] sm:$0x1] }
 0x13a   :  { %v5224_v14 = vsel %vm12867_vm7, %v9820_v8, %v5223_v39  ;;  %v5227_v28 = vsel %vm12867_vm7, %v5225_v9, %v5226_v10  ;;  %v9821_v39 = vrot.slane %v9789_v31, 9  ;;  %v5244_v8 = vrot.slane %v9693_v59, 5  ;;  %v12002_v59 = vld [vmem:[%s16490_s0 + $0x12c] sm:$0xf] }
 0x13b   :  { %v9853_v38 = vcombine.low %v5224_v14, %v5227_v28  ;;  %v5232_v41 = vrot.slane %v5230_v27, 4  ;;  %v5241_v10 = vsel %vm12867_vm7, %v5239_v53, %v5240_v56  ;;  %v11827_v56 = vld [vmem:[%s16490_s0 + $0x24] sm:$0xff]  }
 0x13c   :  { %v5231_v63 = vsel %vm12867_vm7, %v9821_v39, %v5230_v27  ;;  %v9328_v27 = vcombine.low %v11994_v21, %v13695_v57  ;;  %v5246_v31 = vrot.slane %v5244_v8, 4  ;;  %v11998_v39 = vld [vmem:[%s16490_s0 + $0x114] sm:$0xf]  ;;  %v11831_v21 = vld [vmem:[%s16490_s0 + $0x3c] sm:$0xff]  }
 0x13f   :  { %11023 = vmatmul.mubr.msk.bf16.gmra.mrb[48].mxu0 %vm993_vm4, %v9850_v51 }
 0x140   :  { %10739 = vmatmul.mubr.msk.bf16.gmra.mrb[28].mxu1 %vm993_vm4, %v9324_v50  ;;  %11026 = vmatprep.mubr.msk.bf16.mxu0 %vm993_vm4, %v9851_v52  ;;  %v13665_v50 = vld [vmem:[%s16490_s0 + $0xf4] sm:$0xf]  ;;  %v9822_v52 = vrot.slane %v9790_v35, 9  ;;  %v13704_v35 = vld [vmem:[%s16490_s0 + $0x10c] sm:$0xf] }
 0x141   :  { %10742 = vmatprep.mubr.msk.bf16.mxu1 %vm993_vm4, %v9325_v2  ;;  %v9327_v51 = vcombine.low %v11992_v44, %v13665_v50  ;;  %v5234_v2 = vsel %vm12867_vm7, %v5232_v41, %v5233_v43  ;;  %v9329_v36 = vcombine.low %v11996_v34, %v13704_v35  ;;  %v13721_v41 = vld [vmem:[%s16490_s0 + $0x118] sm:$0xf] }
 0x142   :  { %v5238_v9 = vsel %vm12867_vm7, %v9822_v52, %v5237_v32  ;;  %v9854_v14 = vcombine.low %v5231_v63, %v5234_v2  ;;  %v5247_v32 = vrot.slane %v9694_v17, 5  ;;  %v9330_v43 = vcombine.low %v11998_v39, %v13721_v41  ;;  %v11825_v44 = vld [vmem:[%s16490_s0 + $0x18] sm:$0xff]   ;;  %v13733_v52 = vld [vmem:[%s16490_s0 + $0x124] sm:$0xf]  ;;  %v13749_v63 = vld [vmem:[%s16490_s0 + $0x130] sm:$0xf] }
 0x143   :  { %v9855_v28 = vcombine.low %v5238_v9, %v5241_v10  ;;  %v9332_v2 = vcombine.low %v12002_v59, %v13749_v63  ;;  %v12004_v9 = vld [vmem:[%s16490_s0 + $0x138] sm:$0xf]  ;;  %v13760_v10 = vld [vmem:[%s16490_s0 + $0x13c] sm:$0xf]  ;;  %v11837_v39 = vld [vmem:[%s16490_s0 + $0x60] sm:$0xff]  }
 0x144   :  { %v9333_v17 = vcombine.low %v12004_v9, %v13760_v10  ;;  %v2046_v9 = vrot.slane %v13261_v55, 5 }
 0x147   :  { %11027 = vmatmul.mubr.msk.bf16.gmra.mrb[52].mxu0 %vm993_vm4, %v9852_v24  ;;  %v5248_v24 = vsel %vm12867_vm7, %v5246_v31, %v5247_v32  ;;  %v12008_v31 = vld [vmem:[%s16490_s0 + $0x150] sm:$0xf]  ;;  %v13798_v32 = vld [vmem:[%s16490_s0 + $0x154] sm:$0xf] }
 0x148   :  { %10743 = vmatmul.mubr.msk.bf16.gmra.mrb[32].mxu1 %vm993_vm4, %v9326_v22  ;;  %11030 = vmatprep.mubr.msk.bf16.mxu0 %vm993_vm4, %v9853_v38  ;;  %v5245_v22 = vsel %vm12867_vm7, %v9823_v30, %v5244_v8  ;;  %v7537_v8 = vsel %vm1090_vm0, %v12996_v54, 0  ;;  %v13770_v54 = vld [vmem:[%s16489_s1 + $0x10] sm:$0x3]  ;;  %v11833_v30 = vld [vmem:[%s16490_s0 + $0x48] sm:$0xff]   ;;  %v9335_v34 = vcombine.low %v12008_v31, %v13798_v32 }
 0x149   :  { %10746 = vmatprep.mubr.msk.bf16.mxu1 %vm993_vm4, %v9327_v51  ;;  %v9856_v38 = vcombine.low %v5245_v22, %v5248_v24  ;;  %v12000_v51 = vld [vmem:[%s16490_s0 + $0x120] sm:$0xf]  ;;  %v12010_v22 = vld [vmem:[%s16490_s0 + $0x15c] sm:$0xf] }
 0x14a   :  { %v9331_v53 = vcombine.low %v12000_v51, %v13733_v52  ;;  %v13814_v24 = vld [vmem:[%s16490_s0 + $0x160] sm:$0xf]  ;;  %v11839_v51 = vld [vmem:[%s16490_s0 + $0x6c] sm:$0xff]  }
 0x14f   :  { %11031 = vmatmul.mubr.msk.bf16.gmra.mrb[56].mxu0 %vm993_vm4, %v9854_v14  ;;  %v13786_v14 = vld [vmem:[%s16490_s0 + $0x148] sm:$0xf] }
 0x150   :  { %10747 = vmatmul.mubr.msk.bf16.gmra.mrb[36].mxu1 %vm993_vm4, %v9328_v27  ;;  %11034 = vmatprep.mubr.msk.bf16.mxu0 %vm993_vm4, %v9855_v28  ;;  %v12006_v27 = vld [vmem:[%s16490_s0 + $0x144] sm:$0xf] }
 0x151   :  { %10750 = vmatprep.mubr.msk.bf16.mxu1 %vm993_vm4, %v9329_v36  ;;  %v9334_v28 = vcombine.low %v12006_v27, %v13786_v14  ;;  %v11835_v36 = vld [vmem:[%s16490_s0 + $0x54] sm:$0xff]  }
 0x152   :  { %v12013_v27 = vld [vmem:[%s16490_s0 + $0x14] sm:$0x1] }
 0x153   :  { %v2042_v55 = vrot.slane %v12013_v27, 5  ;;  %v4141_v27 = vshll.u32 %v13466_v7, 16 }
 0x157   :  { %11035 = vmatmul.mubr.msk.bf16.gmra.mrb[60].mxu0 %vm993_vm4, %v9856_v38  ;;  %v9336_v38 = vcombine.low %v12010_v22, %v13814_v24  ;;  %v12014_v22 = vld [vmem:[%s16490_s0 + $0x20] sm:$0x1] }
 0x158   :  { %10751 = vmatmul.mubr.msk.bf16.gmra.mrb[40].mxu1 %vm993_vm4, %v9330_v43  ;;  %11040 = vmatprep.mubr.msk.bf16.mxu0 %vm993_vm4, %v11825_v44  ;;  %v9337_v43 = vcombine.low %v13016_v12, %v13027_v25  ;;  %v2032_v44 = vrot.slane %v13205_v5, 5  ;;  %v9338_v12 = vcombine.low %v13052_v40, %v13059_v16  ;;  %v11841_v25 = vld [vmem:[%s16490_s0 + $0x78] sm:$0xff]   ;;  %v12012_v5 = vld [vmem:[%s16490_s0 + $0x8] sm:$0x1]  ;;  %v2039_v40 = vrot.slane %v13244_v33, 5 }
 0x159   :  { %10754 = vmatprep.mubr.msk.bf16.mxu1 %vm993_vm4, %v9331_v53  ;;  %v1931_v53 = vld [vmem:[%s16490_s0] sm:$0xe]  ;;  %v2035_v59 = vrot.slane %v12012_v5, 5  ;;  %v1933_v33 = vld [vmem:[%s16490_s0 + $0x18] sm:$0xe] }
 0x15a   :  { %v2041_v31 = vrot.slane %v2039_v40, 4 }
 0x15f   :  { %11041 = vmatmul.mubr.msk.bf16.vlgmr.msra.gmra.mrb[0].mxu0 %vm993_vm4, %v11827_v56  ;;  %v9339_v56 = vcombine.low %v13087_v15, %v13095_v23  ;;  %v1932_v23 = vld [vmem:[%s16490_s0 + $0xc] sm:$0xe] }
 0x160   :  { %10755 = vmatmul.mubr.msk.bf16.gmra.mrb[44].mxu1 %vm993_vm4, %v9332_v2  ;;  %11105 = vmatpush3.bf16.msra.mxu0 %v7537_v8  ;;  %v9373_v2 = vrot.slane %v1931_v53, 9  ;;  %v2034_v8 = vrot.slane %v2032_v44, 4 }
 0x161   :  { %10758 = vmatprep.mubr.msk.bf16.mxu1 %vm993_vm4, %v9333_v17  ;;  %11044 = vmatprep.mubr.msk.bf16.mxu0 %vm993_vm4, %v11829_v18  ;;  %v11843_v17 = vld [vmem:[%s16490_s0 + $0x84] sm:$0xff]   ;;  %v9340_v18 = vcombine.low %v13124_v42, %v13131_v47  ;;  %v2043_v47 = vsel %vm12867_vm7, %v2041_v31, %v2042_v55  ;;  %v4145_v55 = vshrl.u32 %v13466_v7, 16 }
 0x162   :  { %11799 = vmatprep.subr.msk.bf16.mxu0 %vm1090_vm0, %v13770_v54  ;;  %v2033_v16 = vsel %vm12867_vm7, %v9373_v2, %v2032_v44  ;;  %v2036_v15 = vsel %vm12867_vm7, %v2034_v8, %v2035_v59  ;;  %v1935_v44 = vld [vmem:[%s16490_s0 + $0x30] sm:$0xe] }
 0x163   :  { %v9377_v59 = vrot.slane %v1935_v44, 9  ;;  %v13946_v44 = vrot.slane %v4141_v27, 5 }
 0x167   :  { %11045 = vmatmul.mubr.msk.bf16.gmra.mrb[4].mxu0 %vm993_vm4, %v11831_v21  ;;  %v11844_v21 = vld [vmem:[%s16490_s0 + $0x90] sm:$0xff]  }
 0x168   :  { %10759 = vmatmul.mubr.msk.bf16.gmra.mrb[48].mxu1 %vm993_vm4, %v9334_v28  ;;  %11048 = vmatprep.mubr.msk.bf16.mxu0 %vm993_vm4, %v11833_v30  ;;  %v9406_v28 = vcombine.low %v2033_v16, %v2036_v15  ;;  %v9374_v30 = vrot.slane %v1932_v23, 9  ;;  %v1936_v23 = vld [vmem:[%s16490_s0 + $0x3c] sm:$0xe] }
 0x169   :  { %10762 = vmatprep.mubr.msk.bf16.mxu1 %vm993_vm4, %v9335_v34  ;;  %v9375_v34 = vrot.slane %v1933_v33, 9  ;;  %v1937_v33 = vld [vmem:[%s16490_s0 + $0x48] sm:$0xe]  ;;  %v9378_v7 = vrot.slane %v1936_v23, 9 }
 0x16a   :  { %v2040_v42 = vsel %vm12867_vm7, %v9374_v30, %v2039_v40  ;;  %v12015_v40 = vld [vmem:[%s16490_s0 + $0x2c] sm:$0x1]  ;;  %v12017_v30 = vld [vmem:[%s16490_s0 + $0x44] sm:$0x1] }
 0x16b   :  { %v2056_v16 = vrot.slane %v12015_v40, 5  ;;  %v2070_v31 = vrot.slane %v12017_v30, 5  ;;  %v1942_v30 = vld [vmem:[%s16490_s0 + $0x84] sm:$0xe] }
 0x16f   :  { %11049 = vmatmul.mubr.msk.bf16.gmra.mrb[8].mxu0 %vm993_vm4, %v11835_v36  ;;  %v2048_v36 = vrot.slane %v2046_v9, 4 }
 0x170   :  { %10763 = vmatmul.mubr.msk.bf16.gmra.mrb[52].mxu1 %vm993_vm4, %v9336_v38  ;;  %11052 = vmatprep.mubr.msk.bf16.mxu0 %vm993_vm4, %v11837_v39  ;;  %v2049_v38 = vrot.slane %v12014_v22, 5  ;;  %v1934_v39 = vld [vmem:[%s16490_s0 + $0x24] sm:$0xe] }
 0x171   :  { %10766 = vmatprep.mubr.msk.bf16.mxu1 %vm993_vm4, %v9337_v43  ;;  %v2053_v43 = vrot.slane %v13297_v4, 5  ;;  %v11846_v4 = vld [vmem:[%s16490_s0 + $0xa8] sm:$0xff]   ;;  %v9376_v5 = vrot.slane %v1934_v39, 9  ;;  %v1939_v39 = vld [vmem:[%s16490_s0 + $0x60] sm:$0xe] }
 0x172   :  { %v2050_v53 = vsel %vm12867_vm7, %v2048_v36, %v2049_v38  ;;  %v1938_v36 = vld [vmem:[%s16490_s0 + $0x54] sm:$0xe] }
 0x173   :  { %v2055_v8 = vrot.slane %v2053_v43, 4 }
 0x177   :  { %11053 = vmatmul.mubr.msk.bf16.gmra.mrb[12].mxu0 %vm993_vm4, %v11839_v51  ;;  %v2047_v51 = vsel %vm12867_vm7, %v9375_v34, %v2046_v9  ;;  %v9379_v34 = vrot.slane %v1937_v33, 9 }
 0x178   :  { %10767 = vmatmul.mubr.msk.bf16.gmra.mrb[56].mxu1 %vm993_vm4, %v9338_v12  ;;  %11056 = vmatprep.mubr.msk.bf16.mxu0 %vm993_vm4, %v11841_v25  ;;  %v2060_v12 = vrot.slane %v13309_v20, 5  ;;  %v11845_v25 = vld [vmem:[%s16490_s0 + $0x9c] sm:$0xff]   ;;  %v9408_v2 = vcombine.low %v2047_v51, %v2050_v53  ;;  %v12016_v20 = vld [vmem:[%s16490_s0 + $0x38] sm:$0x1]  ;;  %v13948_v51 = vrot.slane %v4145_v55, 4  ;;  %v4151_v53 = vshll.u32 %v13487_v13, 16 }
 0x179   :  { %10770 = vmatprep.mubr.msk.bf16.mxu1 %vm993_vm4, %v9339_v56  ;;  %v9407_v56 = vcombine.low %v2040_v42, %v2043_v47  ;;  %v2063_v15 = vrot.slane %v12016_v20, 5  ;;  %v12018_v42 = vld [vmem:[%s16490_s0 + $0x50] sm:$0x1]  ;;  %v9381_v13 = vrot.slane %v1939_v39, 9 }
 0x17a   :  { %v2062_v9 = vrot.slane %v2060_v12, 4  ;;  %v2077_v47 = vrot.slane %v12018_v42, 5  ;;  %v13973_v23 = vrot.slane %v4151_v53, 5  ;;  %v4148_v27 = vor.u32 %v13948_v51, %v13946_v44  ;;  %v11849_v42 = vld [vmem:[%s16490_s0 + $0xcc] sm:$0xff]  }
 0x17b   :  { %v10023_v51 = vld [vmem:[%s16490_s0 + $0x2c] sm:$0x1] }
 0x17f   :  { %11057 = vmatmul.mubr.msk.bf16.gmra.mrb[16].mxu0 %vm993_vm4, %v11843_v17  ;;  %v2067_v17 = vrot.slane %v13345_v19, 5  ;;  %v2054_v19 = vsel %vm12867_vm7, %v9376_v5, %v2053_v43  ;;  %v12019_v43 = vld [vmem:[%s16489_s1 + $0x8] sm:$0x3]  ;;  %v9380_v5 = vrot.slane %v1938_v36, 9 }
 0x180   :  { %10771 = vmatmul.mubr.msk.bf16.gmra.mrb[60].mxu1 %vm993_vm4, %v9340_v18  ;;  %11060 = vmatprep.mubr.msk.bf16.mxu0 %vm993_vm4, %v11844_v21  ;;  %v2074_v18 = vrot.slane %v13361_v49, 5  ;;  %v3128_v21 = vsel %vm1090_vm0, %v13544_v61, 0  ;;  %v2081_v49 = vrot.slane %v13397_v11, 5  ;;  %v2057_v61 = vsel %vm12867_vm7, %v2055_v8, %v2056_v16 }
 0x181   :  { %10776 = vmatprep.mubr.msk.bf16.mxu1 %vm993_vm4, %v9406_v28  ;;  %v2061_v28 = vsel %vm12867_vm7, %v9377_v59, %v2060_v12  ;;  %v2064_v11 = vsel %vm12867_vm7, %v2062_v9, %v2063_v15  ;;  %v2069_v22 = vrot.slane %v2067_v17, 4  ;;  %v11847_v12 = vld [vmem:[%s16490_s0 + $0xb4] sm:$0xff]   ;;  %v2068_v16 = vsel %vm12867_vm7, %v9378_v7, %v2067_v17  ;;  %v12021_v17 = vld [vmem:[%s16490_s0 + $0x68] sm:$0x1] }
 0x182   :  { %v2076_v38 = vrot.slane %v2074_v18, 4  ;;  %v2083_v59 = vrot.slane %v2081_v49, 4  ;;  %v9410_v40 = vcombine.low %v2061_v28, %v2064_v11  ;;  %v13967_v20 = vsel %vm12867_vm7, %v9379_v34, %v2074_v18  ;;  %v1941_v28 = vld [vmem:[%s16490_s0 + $0x78] sm:$0xe]  ;;  %v1943_v11 = vld [vmem:[%s16490_s0 + $0x90] sm:$0xe] }
 0x183   :  { %v2091_v33 = vrot.slane %v12021_v17, 5  ;;  %v2095_v18 = vrot.slane %v13448_v45, 5  ;;  %v13989_v55 = vsel %vm12867_vm7, %v9380_v5, %v2081_v49  ;;  %v2102_v45 = vrot.slane %v13460_v62, 5  ;;  %v12022_v62 = vld [vmem:[%s16490_s0 + $0x74] sm:$0x1] }
 0x184   :  { %v13971_v15 = vsel %vm12867_vm7, %v2076_v38, %v2077_v47  ;;  %v2098_v36 = vrot.slane %v12022_v62, 5  ;;  %v2123_v38 = vrot.slane %v13560_v6, 5  ;;  %v9383_v53 = vrot.slane %v1941_v28, 9  ;;  %v1946_v28 = vld [vmem:[%s16490_s0 + $0xb4] sm:$0xe] }
 0x185   :  { %v9412_v7 = vcombine.low %v13967_v20, %v13971_v15  ;;  %v2104_v6 = vrot.slane %v2102_v45, 4  ;;  %v2130_v5 = vrot.slane %v13569_v26, 5 }
 0x186   :  { %v2125_v15 = vrot.slane %v2123_v38, 4 }
 0x187   :  { %11061 = vmatmul.mubr.msk.bf16.gmra.mrb[20].mxu0 %vm993_vm4, %v11845_v25  ;;  %v2088_v25 = vrot.slane %v13409_v48, 5  ;;  %v2071_v48 = vsel %vm12867_vm7, %v2069_v22, %v2070_v31  ;;  %v2109_v31 = vrot.slane %v13504_v58, 5  ;;  %v2116_v22 = vrot.slane %v13514_v60, 5  ;;  %v11850_v58 = vld [vmem:[%s16490_s0 + $0xf0] sm:$0xff]   ;;  %v1944_v60 = vld [vmem:[%s16490_s0 + $0x9c] sm:$0xe] }
 0x188   :  { %10777 = vmatmul.mubr.msk.bf16.vlgmr.msra.gmra.mrb[0].mxu1 %vm993_vm4, %v9407_v56  ;;  %11064 = vmatprep.mubr.msk.bf16.mxu0 %vm993_vm4, %v11846_v4  ;;  %v9409_v56 = vcombine.low %v2054_v19, %v2057_v61  ;;  %v11848_v4 = vld [vmem:[%s16490_s0 + $0xc0] sm:$0xff]   ;;  %v9411_v61 = vcombine.low %v2068_v16, %v2071_v48  ;;  %v9386_v20 = vrot.slane %v1944_v60, 9 }
 0x189   :  { %10780 = vmatprep.mubr.msk.bf16.mxu1 %vm993_vm4, %v9408_v2  ;;  %10841 = vmatpush3.bf16.msra.mxu1 %v3128_v21  ;;  %v12020_v2 = vld [vmem:[%s16490_s0 + $0x5c] sm:$0x1]  ;;  %v2090_v9 = vrot.slane %v2088_v25, 4  ;;  %v1940_v21 = vld [vmem:[%s16490_s0 + $0x6c] sm:$0xe]  ;;  %v14004_v49 = vsel %vm12867_vm7, %v9381_v13, %v2088_v25  ;;  %v2118_v48 = vrot.slane %v2116_v22, 4 }
 0x18a   :  { %11795 = vmatprep.subr.msk.bf16.mxu1 %vm1090_vm0, %v12019_v43  ;;  %v2084_v8 = vrot.slane %v12020_v2, 5  ;;  %v9382_v34 = vrot.slane %v1940_v21, 9  ;;  %v2097_v43 = vrot.slane %v2095_v18, 4  ;;  %v12024_v2 = vld [vmem:[%s16490_s0 + $0x8c] sm:$0x1] }
 0x18b   :  { %v14028_v39 = vsel %vm12867_vm7, %v2090_v9, %v2091_v33  ;;  %v12025_v13 = vld [vmem:[%s16490_s0 + $0x98] sm:$0x1]  ;;  %v12026_v9 = vld [vmem:[%s16490_s0 + $0xa4] sm:$0x1]  ;;  %v14056_v33 = vsel %vm12867_vm7, %v9383_v53, %v2102_v45  ;;  %v12027_v45 = vld [vmem:[%s16490_s0 + $0xb0] sm:$0x1] }
 0x18c   :  { %v13993_v19 = vsel %vm12867_vm7, %v2083_v59, %v2084_v8  ;;  %v2111_v59 = vrot.slane %v2109_v31, 4  ;;  %v2112_v8 = vrot.slane %v12024_v2, 5  ;;  %v2119_v16 = vrot.slane %v12025_v13, 5  ;;  %v11851_v53 = vld [vmem:[%s16490_s0 + $0xfc] sm:$0xff]   ;;  %v1948_v2 = vld [vmem:[%s16490_s0 + $0xe4] sm:$0xe] }
 0x18d   :  { %v9413_v47 = vcombine.low %v13989_v55, %v13993_v19  ;;  %v2126_v26 = vrot.slane %v12026_v9, 5  ;;  %v14052_v17 = vsel %vm12867_vm7, %v9382_v34, %v2095_v18  ;;  %v14066_v62 = vsel %vm12867_vm7, %v2097_v43, %v2098_v36  ;;  %v10018_v9 = vld [vmem:[%s16490_s0 + $0x18] sm:$0xf]  ;;  %v1950_v55 = vld [vmem:[%s16490_s0 + $0xfc] sm:$0xe] }
 0x18e   :  { %v2132_v18 = vrot.slane %v2130_v5, 4  ;;  %v2133_v34 = vrot.slane %v12027_v45, 5  ;;  %v9388_v43 = vrot.slane %v1946_v28, 9  ;;  %v9415_v13 = vcombine.low %v14052_v17, %v14066_v62  ;;  %v1953_v17 = vld [vmem:[%s16490_s0 + $0x120] sm:$0xe] }
 0x18f   :  { %11065 = vmatmul.mubr.msk.bf16.gmra.mrb[24].mxu0 %vm993_vm4, %v11847_v12  ;;  %v12023_v12 = vld [vmem:[%s16490_s0 + $0x80] sm:$0x1]  ;;  %v6575_v19 = vshrl.u32 %v10018_v9, 16 }
 0x190   :  { %10781 = vmatmul.mubr.msk.bf16.gmra.mrb[4].mxu1 %vm993_vm4, %v9409_v56  ;;  %11068 = vmatprep.mubr.msk.bf16.mxu0 %vm993_vm4, %v11848_v4  ;;  %v2105_v25 = vrot.slane %v12023_v12, 5  ;;  %v9384_v56 = vrot.slane %v1942_v30, 9  ;;  %v1945_v4 = vld [vmem:[%s16490_s0 + $0xa8] sm:$0xe]  ;;  %v2137_v30 = vrot.slane %v13608_v46, 5  ;;  %v2144_v46 = vrot.slane %v13617_v1, 5 }
 0x191   :  { %10784 = vmatprep.mubr.msk.bf16.mxu1 %vm993_vm4, %v9410_v40  ;;  %v9385_v40 = vrot.slane %v1943_v11, 9  ;;  %v9387_v21 = vrot.slane %v1945_v4, 9  ;;  %v1947_v11 = vld [vmem:[%s16490_s0 + $0xd8] sm:$0xe]  ;;  %v14094_v1 = vsel %vm12867_vm7, %v2118_v48, %v2119_v16 }
 0x192   :  { %v14082_v36 = vsel %vm12867_vm7, %v9384_v56, %v2109_v31  ;;  %v14102_v31 = vsel %vm12867_vm7, %v2125_v15, %v2126_v26  ;;  %v2139_v60 = vrot.slane %v2137_v30, 4  ;;  %v9389_v12 = vrot.slane %v1947_v11, 9  ;;  %v10019_v26 = vld [vmem:[%s16490_s0 + $0x1c] sm:$0xf] }
 0x193   :  { %v14119_v56 = vsel %vm12867_vm7, %v2132_v18, %v2133_v34  ;;  %v2146_v4 = vrot.slane %v2144_v46, 4  ;;  %v12030_v34 = vld [vmem:[%s16490_s0 + $0xec] sm:$0x1] }
 0x194   :  { %v2154_v11 = vrot.slane %v12030_v34, 5  ;;  %v6577_v34 = vrot.slane %v6575_v19, 4  ;;  %v10020_v19 = vld [vmem:[%s16490_s0 + $0x20] sm:$0x1] }
 0x197   :  { %11069 = vmatmul.mubr.msk.bf16.gmra.mrb[28].mxu0 %vm993_vm4, %v11849_v42  ;;  %v14086_v42 = vsel %vm12867_vm7, %v2111_v59, %v2112_v8  ;;  %v2151_v8 = vrot.slane %v13656_v37, 5 }
 0x198   :  { %10785 = vmatmul.mubr.msk.bf16.gmra.mrb[8].mxu1 %vm993_vm4, %v9411_v61  ;;  %11072 = vmatprep.mubr.msk.bf16.mxu0 %vm993_vm4, %v11850_v58  ;;  %v14078_v61 = vsel %vm12867_vm7, %v2104_v6, %v2105_v25  ;;  %v14090_v58 = vsel %vm12867_vm7, %v9385_v40, %v2116_v22  ;;  %v14109_v22 = vsel %vm12867_vm7, %v9387_v21, %v2130_v5  ;;  %v12028_v6 = vld [vmem:[%s16490_s0 + $0xbc] sm:$0x1]  ;;  %v11852_v25 = vld [vmem:[%s16490_s0 + $0x108] sm:$0xff]   ;;  %v12029_v5 = vld [vmem:[%s16490_s0 + $0xe0] sm:$0x1] }
 0x199   :  { %10788 = vmatprep.mubr.msk.bf16.mxu1 %vm993_vm4, %v9412_v7  ;;  %v14098_v7 = vsel %vm12867_vm7, %v9386_v20, %v2123_v38  ;;  %v2140_v38 = vrot.slane %v12028_v6, 5  ;;  %v2147_v59 = vrot.slane %v12029_v5, 5  ;;  %v9414_v40 = vcombine.low %v14004_v49, %v14028_v39  ;;  %v1949_v20 = vld [vmem:[%s16490_s0 + $0xf0] sm:$0xe] }
 0x19a   :  { %v9416_v16 = vcombine.low %v14056_v33, %v14078_v61  ;;  %v9417_v48 = vcombine.low %v14082_v36, %v14086_v42  ;;  %v9418_v15 = vcombine.low %v14090_v58, %v14094_v1  ;;  %v14145_v49 = vsel %vm12867_vm7, %v9388_v43, %v2137_v30  ;;  %v1955_v58 = vld [vmem:[%s16490_s0 + $0x138] sm:$0xe]  ;;  %v11857_v1 = vld [vmem:[%s16490_s0 + $0x144] sm:$0xff]  }
 0x19b   :  { %v2158_v39 = vrot.slane %v13665_v50, 5  ;;  %v14159_v28 = vsel %vm12867_vm7, %v2139_v60, %v2140_v38  ;;  %v14163_v50 = vsel %vm12867_vm7, %v9389_v12, %v2144_v46  ;;  %v9390_v30 = vrot.slane %v1948_v2, 9  ;;  %v12031_v38 = vld [vmem:[%s16490_s0 + $0xf8] sm:$0x1]  ;;  %v1951_v2 = vld [vmem:[%s16490_s0 + $0x108] sm:$0xe] }
 0x19c   :  { %v14172_v18 = vsel %vm12867_vm7, %v2146_v4, %v2147_v59  ;;  %v2153_v45 = vrot.slane %v2151_v8, 4  ;;  %v9391_v46 = vrot.slane %v1949_v20, 9  ;;  %v6584_v43 = vshll.u32 %v10019_v26, 16  ;;  %v11853_v4 = vld [vmem:[%s16490_s0 + $0x114] sm:$0xff]  }
 0x19d   :  { %v2160_v6 = vrot.slane %v2158_v39, 4  ;;  %v2161_v12 = vrot.slane %v12031_v38, 5  ;;  %v14194_v59 = vsel %vm12867_vm7, %v9390_v30, %v2151_v8  ;;  %v2179_v20 = vrot.slane %v13721_v41, 5  ;;  %v12032_v30 = vld [vmem:[%s16490_s0 + $0x104] sm:$0x1] }
 0x19e   :  { %v14210_v8 = vsel %vm12867_vm7, %v9391_v46, %v2158_v39  ;;  %v1952_v41 = vld [vmem:[%s16490_s0 + $0x114] sm:$0xe]  ;;  %v14218_v5 = vrot.slane %v6584_v43, 5  ;;  %v10021_v39 = vld [vmem:[%s16490_s0 + $0x24] sm:$0xf] }
 0x19f   :  { %11073 = vmatmul.mubr.msk.bf16.gmra.mrb[32].mxu0 %vm993_vm4, %v11851_v53  ;;  %v6588_v53 = vshrl.u32 %v10019_v26, 16  ;;  %v9392_v26 = vrot.slane %v1950_v55, 9  ;;  %v9393_v55 = vrot.slane %v1951_v2, 9  ;;  %v9394_v43 = vrot.slane %v1952_v41, 9 }
 0x1a0   :  { %10789 = vmatmul.mubr.msk.bf16.gmra.mrb[12].mxu1 %vm993_vm4, %v9413_v47  ;;  %11076 = vmatprep.mubr.msk.bf16.mxu0 %vm993_vm4, %v11852_v25  ;;  %v6578_v47 = vshll.u32 %v10018_v9, 16  ;;  %v2165_v25 = vrot.slane %v13695_v57, 5  ;;  %v11854_v57 = vld [vmem:[%s16490_s0 + $0x120] sm:$0xff]   ;;  %v14206_v9 = vsel %vm12867_vm7, %v2153_v45, %v2154_v11  ;;  %v14225_v11 = vsel %vm12867_vm7, %v2160_v6, %v2161_v12  ;;  %v12034_v6 = vld [vmem:[%s16490_s0 + $0x11c] sm:$0x1] }
 0x1a1   :  { %10792 = vmatprep.mubr.msk.bf16.mxu1 %vm993_vm4, %v9414_v40  ;;  %v2172_v40 = vrot.slane %v13704_v35, 5  ;;  %v2168_v35 = vrot.slane %v12032_v30, 5  ;;  %v6590_v45 = vrot.slane %v6588_v53, 4  ;;  %v12033_v30 = vld [vmem:[%s16490_s0 + $0x110] sm:$0x1]  ;;  %v2181_v53 = vrot.slane %v2179_v20, 4 }
 0x1a2   :  { %v6580_v38 = vrot.slane %v6578_v47, 5  ;;  %v2167_v46 = vrot.slane %v2165_v25, 4  ;;  %v2175_v60 = vrot.slane %v12033_v30, 5  ;;  %v2182_v12 = vrot.slane %v12034_v6, 5 }
 0x1a3   :  { %v2174_v47 = vrot.slane %v2172_v40, 4  ;;  %v6599_v30 = vshrl.u32 %v10021_v39, 16  ;;  %v6602_v41 = vshll.u32 %v10021_v39, 16  ;;  %v14251_v6 = vsel %vm12867_vm7, %v9392_v26, %v2165_v25  ;;  %v11855_v26 = vld [vmem:[%s16490_s0 + $0x12c] sm:$0xff]   ;;  %v10022_v39 = vld [vmem:[%s16490_s0 + $0x28] sm:$0xf] }
 0x1a4   :  { %v6581_v62 = vor.u32 %v6580_v38, %v6577_v34  ;;  %v14261_v33 = vsel %vm12867_vm7, %v2167_v46, %v2168_v35  ;;  %v14265_v61 = vsel %vm12867_vm7, %v9393_v55, %v2172_v40  ;;  %v2193_v25 = vrot.slane %v13749_v63, 5  ;;  %v11856_v34 = vld [vmem:[%s16490_s0 + $0x138] sm:$0xff]   ;;  %v12035_v63 = vld [vmem:[%s16490_s0 + $0x128] sm:$0x1] }
 0x1a5   :  { %v14279_v35 = vsel %vm12867_vm7, %v2174_v47, %v2175_v60  ;;  %v14283_v40 = vsel %vm12867_vm7, %v9394_v43, %v2179_v20  ;;  %v14287_v38 = vsel %vm12867_vm7, %v2181_v53, %v2182_v12  ;;  %v9395_v46 = vrot.slane %v1953_v17, 9  ;;  %v10024_v20 = vld [vmem:[%s16490_s0 + $0x30] sm:$0xf] }
 0x1a6   :  { %v6601_v55 = vrot.slane %v6599_v30, 4  ;;  %v6582_v47 = vrot.slane %v6581_v62, 4  ;;  %v6608_v21 = vshll.u32 %v10022_v39, 16  ;;  %v6612_v37 = vshrl.u32 %v10022_v39, 16 }
 0x1a7   :  { %11077 = vmatmul.mubr.msk.bf16.gmra.mrb[36].mxu0 %vm993_vm4, %v11853_v4  ;;  %v2186_v4 = vrot.slane %v13733_v52, 5  ;;  %v2195_v52 = vrot.slane %v2193_v25, 4  ;;  %v6623_v17 = vshrl.u32 %v10024_v20, 16  ;;  %v6626_v62 = vshll.u32 %v10024_v20, 16  ;;  %v10028_v20 = vld [vmem:[%s16490_s0 + $0x40] sm:$0xf] }
 0x1a8   :  { %10793 = vmatmul.mubr.msk.bf16.gmra.mrb[16].mxu1 %vm993_vm4, %v9415_v13  ;;  %11080 = vmatprep.mubr.msk.bf16.mxu0 %vm993_vm4, %v11854_v57  ;;  %v6591_v13 = vor.u32 %v6590_v45, %v14218_v5  ;;  %v6594_v57 = vshll.u32 %v10020_v19, 16  ;;  %v2189_v45 = vrot.slane %v12035_v63, 5  ;;  %v6604_v19 = vrot.slane %v6602_v41, 5  ;;  %v12036_v63 = vld [vmem:[%s16490_s0 + $0x134] sm:$0x1] }
 0x1a9   :  { %10796 = vmatprep.mubr.msk.bf16.mxu1 %vm993_vm4, %v9416_v16  ;;  %v1954_v16 = vld [vmem:[%s16490_s0 + $0x12c] sm:$0xe]  ;;  %v2188_v60 = vrot.slane %v2186_v4, 4  ;;  %v2196_v2 = vrot.slane %v12036_v63, 5  ;;  %v6587_v42 = vsel %vm12222_vm3, %v6582_v47, %v14218_v5  ;;  %v14352_v5 = vrot.slane %v6608_v21, 5 }
 0x1aa   :  { %v6592_v43 = vrot.slane %v6591_v13, 4  ;;  %v6596_v53 = vrot.slane %v6594_v57, 5  ;;  %v9396_v12 = vrot.slane %v1954_v16, 9  ;;  %v14309_v13 = vrot.slane %v4148_v27, 4  ;;  %v10031_v63 = vld [vmem:[%s16490_s0 + $0x4c] sm:$0xf] }
 0x1ab   :  { %v14318_v57 = vsel %vm12867_vm7, %v9395_v46, %v2186_v4  ;;  %v14322_v16 = vsel %vm12867_vm7, %v2188_v60, %v2189_v45  ;;  %v6605_v27 = vor.u32 %v6604_v19, %v6601_v55  ;;  %v11858_v45 = vld [vmem:[%s16490_s0 + $0x150] sm:$0xff]   ;;  %v6618_v46 = vshll.u32 %v10023_v51, 16  ;;  %v12037_v55 = vld [vmem:[%s16490_s0 + $0x140] sm:$0x1]  ;;  %v10026_v51 = vld [vmem:[%s16490_s0 + $0x38] sm:$0x1] }
 0x1ac   :  { %v14340_v4 = vsel %vm12867_vm7, %v9396_v12, %v2193_v25  ;;  %v10025_v25 = vld [vmem:[%s16490_s0 + $0x34] sm:$0xf]  ;;  %v6625_v60 = vrot.slane %v6623_v17, 4  ;;  %v2203_v19 = vrot.slane %v12037_v55, 5  ;;  %v6660_v55 = vshrl.u32 %v10028_v20, 16 }
 0x1ad   :  { %v14366_v21 = vrot.slane %v6605_v27, 4  ;;  %v6636_v12 = vshrl.u32 %v10025_v25, 16  ;;  %v6680_v36 = vshll.u32 %v10031_v63, 16  ;;  %v2221_v30 = vrot.slane %v13814_v24, 5 }
 0x1af   :  { %11081 = vmatmul.mubr.msk.bf16.gmra.mrb[40].mxu0 %vm993_vm4, %v11855_v26  ;;  %v6614_v26 = vrot.slane %v6612_v37, 4  ;;  %v10027_v37 = vld [vmem:[%s16490_s0 + $0x3c] sm:$0xf] }
 0x1b0   :  { %10797 = vmatmul.mubr.msk.bf16.gmra.mrb[20].mxu1 %vm993_vm4, %v9417_v48  ;;  %11084 = vmatprep.mubr.msk.bf16.mxu0 %vm993_vm4, %v11856_v34  ;;  %v6597_v48 = vsel %vm12222_vm3, %v6592_v43, %v6596_v53  ;;  %v2200_v34 = vrot.slane %v13760_v10, 5  ;;  %v14370_v10 = vsel %vm1090_vm0, %v13770_v54, 0  ;;  %v6632_v53 = vshll.u32 %v10025_v25, 16  ;;  %v10030_v54 = vld [vmem:[%s16490_s0 + $0x48] sm:$0xf] }
 0x1b1   :  { %10800 = vmatprep.mubr.msk.bf16.mxu1 %vm993_vm4, %v9418_v15  ;;  %v14350_v15 = vsel %vm12867_vm7, %v2195_v52, %v2196_v2  ;;  %v6628_v2 = vrot.slane %v6626_v62, 5  ;;  %v9397_v52 = vrot.slane %v1955_v58, 9  ;;  %v14378_v47 = vcombine.low %v6587_v42, %v6597_v48 }
 0x1b2   :  { %v6615_v17 = vor.u32 %v6614_v26, %v14352_v5  ;;  %v2202_v62 = vrot.slane %v2200_v34, 4  ;;  %v6647_v27 = vshrl.u32 %v10027_v37, 16  ;;  %v6650_v42 = vshll.u32 %v10027_v37, 16  ;;  %v1956_v26 = vld [vmem:[%s16490_s0 + $0x144] sm:$0xe] }
 0x1b3   :  { %v14393_v48 = vrot.slane %v6618_v46, 5  ;;  %v6629_v58 = vor.u32 %v6628_v2, %v6625_v60  ;;  %v6656_v25 = vshll.u32 %v10028_v20, 16  ;;  %v16501_v43 = vcombine.low %v14098_v7, %v14102_v31  ;;  %v11859_v2 = vld [vmem:[%s16490_s0 + $0x15c] sm:$0xff]   ;;  %v11860_v20 = vld [vmem:[%s16490_s0 + $0x168] sm:$0xff]  }
 0x1b4   :  { %v6671_v39 = vshrl.u32 %v10030_v54, 16  ;;  %v6674_v37 = vshll.u32 %v10030_v54, 16  ;;  %v16502_v46 = vcombine.low %v14109_v22, %v14119_v56  ;;  %v14409_v7 = vsel %vm12867_vm7, %v9397_v52, %v2200_v34 }
 0x1b5   :  { %v14411_v31 = vrot.slane %v6632_v53, 5  ;;  %v6642_v60 = vshll.u32 %v10026_v51, 16  ;;  %v14423_v22 = vsel %vm12867_vm7, %v2202_v62, %v2203_v19  ;;  %v6649_v56 = vrot.slane %v6647_v27, 4 }
 0x1b6   :  { %v6652_v34 = vrot.slane %v6650_v42, 5  ;;  %v14425_v52 = vrot.slane %v6629_v58, 4  ;;  %v9398_v53 = vrot.slane %v1956_v26, 9  ;;  %v14430_v54 = vrot.slane %v6656_v25, 5 }
 0x1b7   :  { %11085 = vmatmul.mubr.msk.bf16.gmra.mrb[44].mxu0 %vm993_vm4, %v11857_v1  ;;  %v6684_v1 = vshrl.u32 %v10031_v63, 16  ;;  %v6662_v63 = vrot.slane %v6660_v55, 4  ;;  %v6673_v51 = vrot.slane %v6671_v39, 4  ;;  %v14435_v19 = vrot.slane %v6680_v36, 5 }
 0x1b8   :  { %10801 = vmatmul.mubr.msk.bf16.gmra.mrb[24].mxu1 %vm993_vm4, %v16501_v43  ;;  %11088 = vmatprep.mubr.msk.bf16.mxu0 %vm993_vm4, %v11858_v45  ;;  %v6638_v45 = vrot.slane %v6636_v12, 4  ;;  %v14419_v43 = vrot.slane %v6615_v17, 4  ;;  %v10029_v12 = vld [vmem:[%s16490_s0 + $0x44] sm:$0x1]  ;;  %v10032_v17 = vld [vmem:[%s16490_s0 + $0x50] sm:$0x1]  ;;  %v6653_v55 = vor.u32 %v6652_v34, %v6649_v56 }
 0x1b9   :  { %10804 = vmatprep.mubr.msk.bf16.mxu1 %vm993_vm4, %v16502_v46  ;;  %v6676_v46 = vrot.slane %v6674_v37, 5  ;;  %v6686_v62 = vrot.slane %v6684_v1, 4  ;;  %v2207_v25 = vrot.slane %v13786_v14, 5  ;;  %v14449_v36 = vrot.slane %v6642_v60, 5  ;;  %v10033_v37 = vld [vmem:[%s16490_s0 + $0x54] sm:$0xf] }
 0x1ba   :  { %v6639_v58 = vor.u32 %v6638_v45, %v14411_v31  ;;  %v2214_v26 = vrot.slane %v13798_v32, 5  ;;  %v6663_v1 = vor.u32 %v6662_v63, %v14430_v54  ;;  %v6666_v45 = vshll.u32 %v10029_v12, 16  ;;  %v1957_v60 = vld [vmem:[%s16490_s0 + $0x150] sm:$0xe]  ;;  %v12038_v34 = vld [vmem:[%s16490_s0 + $0x14c] sm:$0x1] }
 0x1bb   :  { %v6690_v56 = vshll.u32 %v10032_v17, 16  ;;  %v16503_v32 = vcombine.low %v14145_v49, %v14159_v28  ;;  %v2210_v12 = vrot.slane %v12038_v34, 5  ;;  %v6677_v63 = vor.u32 %v6676_v46, %v6673_v51  ;;  %v11861_v34 = vld [vmem:[%s16490_s0 + $0x174] sm:$0xff]   ;;  %v11862_v51 = vld [vmem:[%s16490_s0 + $0x180] sm:$0xff]  }
 0x1bc   :  { %v6687_v42 = vor.u32 %v6686_v62, %v14435_v19  ;;  %v16504_v17 = vcombine.low %v14163_v50, %v14172_v18  ;;  %v6640_v49 = vrot.slane %v6639_v58, 4  ;;  %v2209_v28 = vrot.slane %v2207_v25, 4  ;;  %v12039_v62 = vld [vmem:[%s16490_s0 + $0x158] sm:$0x1] }
 0x1bd   :  { %v6654_v46 = vrot.slane %v6653_v55, 4  ;;  %v9399_v50 = vrot.slane %v1957_v60, 9  ;;  %v2216_v18 = vrot.slane %v2214_v26, 4  ;;  %v2217_v58 = vrot.slane %v12039_v62, 5  ;;  %v10035_v55 = vld [vmem:[%s16490_s0 + $0x5c] sm:$0x1] }
 0x1be   :  { %v6692_v41 = vrot.slane %v6690_v56, 5  ;;  %v6678_v14 = vrot.slane %v6677_v63, 4  ;;  %v6688_v27 = vrot.slane %v6687_v42, 4 }
 0x1bf   :  { %11089 = vmatmul.mubr.msk.bf16.gmra.mrb[48].mxu0 %vm993_vm4, %v11859_v2  ;;  %v14471_v2 = vsel %vm12867_vm7, %v9398_v53, %v2207_v25  ;;  %v6695_v53 = vshrl.u32 %v10033_v37, 16  ;;  %v6664_v25 = vrot.slane %v6663_v1, 4  ;;  %v6645_v1 = vsel %vm12222_vm3, %v6640_v49, %v14449_v36  ;;  %v12040_v49 = vld [vmem:[%s16490_s0 + $0x164] sm:$0x1] }
 0x1c0   :  { %10805 = vmatmul.mubr.msk.bf16.gmra.mrb[28].mxu1 %vm993_vm4, %v16503_v32  ;;  %11092 = vmatprep.mubr.msk.bf16.mxu0 %vm993_vm4, %v11860_v20  ;;  %v10034_v20 = vld [vmem:[%s16490_s0 + $0x58] sm:$0xf]  ;;  %v6698_v32 = vshll.u32 %v10033_v37, 16  ;;  %v1958_v37 = vld [vmem:[%s16490_s0 + $0x15c] sm:$0xe]  ;;  %v6659_v24 = vsel %vm12222_vm3, %v6654_v46, %v14430_v54  ;;  %v14512_v42 = vsel %vm12867_vm7, %v9399_v50, %v2214_v26  ;;  %v14516_v63 = vsel %vm12867_vm7, %v2216_v18, %v2217_v58 }
 0x1c1   :  { %10808 = vmatprep.mubr.msk.bf16.mxu1 %vm993_vm4, %v16504_v17  ;;  %v6668_v17 = vrot.slane %v6666_v45, 5  ;;  %v6704_v60 = vshll.u32 %v10034_v20, 16  ;;  %v6708_v39 = vshrl.u32 %v10034_v20, 16  ;;  %v14505_v45 = vsel %vm12867_vm7, %v2209_v28, %v2210_v12  ;;  %v1959_v50 = vld [vmem:[%s16490_s0 + $0x168] sm:$0xe] }
 0x1c2   :  { %v6697_v56 = vrot.slane %v6695_v53, 4  ;;  %v6700_v62 = vrot.slane %v6698_v32, 5  ;;  %v9400_v20 = vrot.slane %v1958_v37, 9  ;;  %v2223_v12 = vrot.slane %v2221_v30, 4  ;;  %v10037_v58 = vld [vmem:[%s16490_s0 + $0x64] sm:$0xf] }
 0x1c3   :  { %v6669_v36 = vsel %vm12222_vm3, %v6664_v25, %v6668_v17  ;;  %v2224_v54 = vrot.slane %v12040_v49, 5  ;;  %v6714_v28 = vshll.u32 %v10035_v55, 16  ;;  %v16505_v26 = vcombine.low %v14194_v59, %v14206_v9  ;;  %v10039_v25 = vld [vmem:[%s16490_s0 + $0x6c] sm:$0xf]  ;;  %v10042_v55 = vld [vmem:[%s16490_s0 + $0x78] sm:$0xf] }
 0x1c4   :  { %v6683_v53 = vsel %vm12222_vm3, %v6678_v14, %v14435_v19  ;;  %v6693_v32 = vsel %vm12222_vm3, %v6688_v27, %v6692_v41  ;;  %v6710_v46 = vrot.slane %v6708_v39, 4  ;;  %v16506_v59 = vcombine.low %v14210_v8, %v14225_v11  ;;  %v12041_v8 = vld [vmem:[%s16490_s0 + $0x16c] sm:$0xf] }
 0x1c5   :  { %v16507_v9 = vsel %vm12222_vm3, %v14419_v43, %v14393_v48  ;;  %v16508_v41 = vsel %vm12222_vm3, %v14366_v21, %v14352_v5  ;;  %v9431_v27 = vcombine.low %v14471_v2, %v14505_v45  ;;  %v6701_v39 = vor.u32 %v6700_v62, %v6697_v56  ;;  %v10036_v48 = vld [vmem:[%s16490_s0 + $0x60] sm:$0xf]  ;;  %v11863_v43 = vld [vmem:[%s16490_s0 + $0x18c] sm:$0xff]   ;;  %v10058_v2 = vld [vmem:[%s16490_s0 + $0xb8] sm:$0xf] }
 0x1c6   :  { %v14553_v19 = vcombine.low %v16508_v41, %v16507_v9  ;;  %v2228_v11 = vrot.slane %v12041_v8, 5  ;;  %v16509_v5 = vsel %vm12222_vm3, %v14425_v52, %v14411_v31  ;;  %v14573_v14 = vcombine.low %v6659_v24, %v6669_v36  ;;  %v12042_v56 = vld [vmem:[%s16490_s0 + $0x170] sm:$0x1]  ;;  %v10043_v36 = vld [vmem:[%s16490_s0 + $0x7c] sm:$0xf] }
 0x1c7   :  { %11093 = vmatmul.mubr.msk.bf16.gmra.mrb[52].mxu0 %vm993_vm4, %v11861_v34  ;;  %v14534_v34 = vrot.slane %v6704_v60, 5  ;;  %v14571_v21 = vcombine.low %v16509_v5, %v6645_v1  ;;  %v14579_v18 = vsel %vm12867_vm7, %v9400_v20, %v2221_v30  ;;  %v14587_v31 = vcombine.low %v6683_v53, %v6693_v32  ;;  %v10040_v30 = vld [vmem:[%s16490_s0 + $0x70] sm:$0xf]  ;;  %v11864_v60 = vld [vmem:[%s16490_s0 + $0x198] sm:$0xff]  }
 0x1c8   :  { %10809 = vmatmul.mubr.msk.bf16.gmra.mrb[32].mxu1 %vm993_vm4, %v16505_v26  ;;  %11096 = vmatprep.mubr.msk.bf16.mxu0 %vm993_vm4, %v11862_v51  ;;  %v14591_v52 = vsel %vm12867_vm7, %v2223_v12, %v2224_v54  ;;  %v14593_v17 = vrot.slane %v6714_v28, 5  ;;  %v9401_v37 = vrot.slane %v1959_v50, 9  ;;  %v2231_v62 = vrot.slane %v12042_v56, 5  ;;  %v10038_v26 = vld [vmem:[%s16490_s0 + $0x68] sm:$0x1] }
 0x1c9   :  { %10812 = vmatprep.mubr.msk.bf16.mxu1 %vm993_vm4, %v16506_v59  ;;  %v6711_v1 = vor.u32 %v6710_v46, %v14534_v34  ;;  %v6719_v24 = vshrl.u32 %v10036_v48, 16  ;;  %v6722_v20 = vshll.u32 %v10036_v48, 16  ;;  %v14611_v12 = vrot.slane %v6701_v39, 4  ;;  %v1960_v56 = vld [vmem:[%s16490_s0 + $0x174] sm:$0xe] }
 0x1ca   :  { %v2230_v49 = vrot.slane %v2228_v11, 4  ;;  %v6728_v54 = vshll.u32 %v10037_v58, 16  ;;  %v6732_v28 = vshrl.u32 %v10037_v58, 16  ;;  %v6743_v53 = vshrl.u32 %v10039_v25, 16 }
 0x1cb   :  { %v6746_v32 = vshll.u32 %v10039_v25, 16  ;;  %v6752_v46 = vshll.u32 %v10040_v30, 16  ;;  %v6756_v50 = vshrl.u32 %v10040_v30, 16  ;;  %v6767_v59 = vshrl.u32 %v10042_v55, 16 }
 0x1cc   :  { %v6770_v9 = vshll.u32 %v10042_v55, 16  ;;  %v6776_v41 = vshll.u32 %v10043_v36, 16  ;;  %v6780_v8 = vshrl.u32 %v10043_v36, 16  ;;  %v16510_v39 = vcombine.low %v14251_v6, %v14261_v33  ;;  %v11865_v6 = vld [vmem:[%s16490_s0 + $0x1a4] sm:$0xff]  }
 0x1cd   :  { %v14622_v48 = vrot.slane %v6711_v1, 4  ;;  %v14626_v5 = vsel %vm12867_vm7, %v9401_v37, %v2228_v11  ;;  %v6721_v58 = vrot.slane %v6719_v24, 4  ;;  %v6724_v25 = vrot.slane %v6722_v20, 5  ;;  %v10041_v37 = vld [vmem:[%s16490_s0 + $0x74] sm:$0x1] }
 0x1ce   :  { %v14637_v33 = vsel %vm12867_vm7, %v2230_v49, %v2231_v62  ;;  %v14639_v30 = vrot.slane %v6728_v54, 5  ;;  %v6734_v55 = vrot.slane %v6732_v28, 4  ;;  %v6738_v11 = vshll.u32 %v10038_v26, 16 }
 0x1cf   :  { %11097 = vmatmul.mubr.msk.bf16.gmra.mrb[56].mxu0 %vm993_vm4, %v11863_v43  ;;  %v16511_v43 = vcombine.low %v14265_v61, %v14279_v35  ;;  %v6748_v61 = vrot.slane %v6746_v32, 5  ;;  %v14644_v35 = vrot.slane %v6752_v46, 5  ;;  %v6758_v1 = vrot.slane %v6756_v50, 4  ;;  %v12043_v50 = vld [vmem:[%s16490_s0 + $0x178] sm:$0xf] }
 0x1d0   :  { %10813 = vmatmul.mubr.msk.bf16.gmra.mrb[36].mxu1 %vm993_vm4, %v16510_v39  ;;  %11100 = vmatprep.mubr.msk.bf16.mxu0 %vm993_vm4, %v11864_v60  ;;  %v6745_v60 = vrot.slane %v6743_v53, 4  ;;  %v6769_v24 = vrot.slane %v6767_v59, 4  ;;  %v6772_v62 = vrot.slane %v6770_v9, 5  ;;  %v14649_v20 = vrot.slane %v6776_v41, 5  ;;  %v10044_v53 = vld [vmem:[%s16490_s0 + $0x80] sm:$0x1] }
 0x1d1   :  { %10816 = vmatprep.mubr.msk.bf16.mxu1 %vm993_vm4, %v16511_v43  ;;  %v6782_v36 = vrot.slane %v6780_v8, 4  ;;  %v6707_v54 = vsel %vm12222_vm3, %v14611_v12, %v14534_v34  ;;  %v6717_v28 = vsel %vm12222_vm3, %v14622_v48, %v14593_v17  ;;  %v6725_v26 = vor.u32 %v6724_v25, %v6721_v58  ;;  %v10045_v41 = vld [vmem:[%s16490_s0 + $0x84] sm:$0xf]  ;;  %v1961_v25 = vld [vmem:[%s16490_s0 + $0x180] sm:$0xe] }
 0x1d2   :  { %v6735_v46 = vor.u32 %v6734_v55, %v14639_v30  ;;  %v2235_v59 = vrot.slane %v12043_v50, 5  ;;  %v6762_v9 = vshll.u32 %v10041_v37, 16  ;;  %v9402_v8 = vrot.slane %v1960_v56, 9  ;;  %v12044_v43 = vld [vmem:[%s16490_s0 + $0x184] sm:$0xf] }
 0x1d3   :  { %v6749_v39 = vor.u32 %v6748_v61, %v6745_v60  ;;  %v6759_v58 = vor.u32 %v6758_v1, %v14644_v35  ;;  %v2242_v55 = vrot.slane %v12044_v43, 5  ;;  %v6740_v37 = vrot.slane %v6738_v11, 5  ;;  %v12045_v1 = vld [vmem:[%s16490_s0 + $0x17c] sm:$0x1] }
 0x1d4   :  { %v6773_v50 = vor.u32 %v6772_v62, %v6769_v24  ;;  %v6783_v32 = vor.u32 %v6782_v36, %v14649_v20  ;;  %v6786_v49 = vshll.u32 %v10044_v53, 16  ;;  %v16512_v60 = vcombine.low %v14283_v40, %v14287_v38  ;;  %v10051_v12 = vld [vmem:[%s16490_s0 + $0x9c] sm:$0xf] }
 0x1d5   :  { %v6726_v61 = vrot.slane %v6725_v26, 4  ;;  %v2238_v56 = vrot.slane %v12045_v1, 5  ;;  %v6794_v11 = vshll.u32 %v10045_v41, 16  ;;  %v16513_v24 = vcombine.low %v14318_v57, %v14322_v16 }
 0x1d6   :  { %v6736_v62 = vrot.slane %v6735_v46, 4  ;;  %v2237_v40 = vrot.slane %v2235_v59, 4  ;;  %v6764_v38 = vrot.slane %v6762_v9, 5  ;;  %v9403_v36 = vrot.slane %v1961_v25, 9  ;;  %v1962_v46 = vld [vmem:[%s16490_s0 + $0x18c] sm:$0xe] }
 0x1d7   :  { %11101 = vmatmul.mubr.msk.bf16.gmra.mrb[60].mxu0 %vm993_vm4, %v11865_v6  ;;  %v6791_v6 = vshrl.u32 %v10045_v41, 16  ;;  %v6750_v26 = vrot.slane %v6749_v39, 4  ;;  %v6760_v53 = vrot.slane %v6759_v58, 4  ;;  %v2244_v43 = vrot.slane %v2242_v55, 4  ;;  %v12046_v41 = vld [vmem:[%s16490_s0 + $0x188] sm:$0x1] }
 0x1d8   :  { %10817 = vmatmul.mubr.msk.bf16.gmra.mrb[40].mxu1 %vm993_vm4, %v16512_v60  ;;  %11106 = vmatprep.mubr.msk.bf16.mxu0 %vm993_vm4, %v14378_v47  ;;  %v10046_v47 = vld [vmem:[%s16490_s0 + $0x88] sm:$0xf]  ;;  %v2245_v60 = vrot.slane %v12046_v41, 5  ;;  %v6774_v1 = vrot.slane %v6773_v50, 4  ;;  %v6784_v57 = vrot.slane %v6783_v32, 4  ;;  %v6788_v16 = vrot.slane %v6786_v49, 5 }
 0x1d9   :  { %10820 = vmatprep.mubr.msk.bf16.mxu1 %vm993_vm4, %v16513_v24  ;;  %v12047_v9 = vld [vmem:[%s16490_s0 + $0x190] sm:$0xf]  ;;  %v6793_v39 = vrot.slane %v6791_v6, 4  ;;  %v6796_v58 = vrot.slane %v6794_v11, 5  ;;  %v6800_v24 = vshll.u32 %v10046_v47, 16  ;;  %v6804_v51 = vshrl.u32 %v10046_v47, 16 }
 0x1da   :  { %v2249_v25 = vrot.slane %v12047_v9, 5  ;;  %v6731_v41 = vsel %vm12222_vm3, %v6726_v61, %v14639_v30  ;;  %v6741_v49 = vsel %vm12222_vm3, %v6736_v62, %v6740_v37  ;;  %v14714_v32 = vsel %vm12867_vm7, %v9402_v8, %v2235_v59  ;;  %v10048_v59 = vld [vmem:[%s16490_s0 + $0x90] sm:$0xf]  ;;  %v12048_v61 = vld [vmem:[%s16490_s0 + $0x194] sm:$0x1] }
 0x1db   :  { %v14718_v50 = vsel %vm12867_vm7, %v2237_v40, %v2238_v56  ;;  %v6755_v6 = vsel %vm12222_vm3, %v6750_v26, %v14644_v35  ;;  %v14725_v11 = vsel %vm12867_vm7, %v9403_v36, %v2242_v55  ;;  %v14729_v30 = vsel %vm12867_vm7, %v2244_v43, %v2245_v60  ;;  %v10049_v47 = vld [vmem:[%s16490_s0 + $0x94] sm:$0xf]  ;;  %v10052_v43 = vld [vmem:[%s16490_s0 + $0xa0] sm:$0xf]  ;;  %v10054_v60 = vld [vmem:[%s16490_s0 + $0xa8] sm:$0xf] }
 0x1dc   :  { %v9404_v37 = vrot.slane %v1962_v46, 9  ;;  %v6765_v8 = vsel %vm12222_vm3, %v6760_v53, %v6764_v38  ;;  %v6779_v35 = vsel %vm12222_vm3, %v6774_v1, %v14649_v20  ;;  %v2251_v55 = vrot.slane %v2249_v25, 4  ;;  %v10047_v20 = vld [vmem:[%s16490_s0 + $0x8c] sm:$0x1] }
 0x1dd   :  { %v2252_v56 = vrot.slane %v12048_v61, 5  ;;  %v16514_v62 = vcombine.low %v14340_v4, %v14350_v15  ;;  %v6797_v40 = vor.u32 %v6796_v58, %v6793_v39  ;;  %v14754_v38 = vrot.slane %v6800_v24, 5  ;;  %v10055_v9 = vld [vmem:[%s16490_s0 + $0xac] sm:$0xf]  ;;  %v10057_v61 = vld [vmem:[%s16490_s0 + $0xb4] sm:$0xf] }
 0x1de   :  { %v6806_v36 = vrot.slane %v6804_v51, 4  ;;  %v16515_v4 = vcombine.low %v14409_v7, %v14423_v22  ;;  %v14775_v15 = vcombine.low %v6707_v54, %v6717_v28  ;;  %v10050_v7 = vld [vmem:[%s16490_s0 + $0x98] sm:$0x1]  ;;  %v6815_v22 = vshrl.u32 %v10048_v59, 16 }
 0x1df   :  { %11107 = vmatmul.mubr.msk.bf16.vlgmr.msra.gmra.mrb[0].mxu0 %vm993_vm4, %v14553_v19  ;;  %v6789_v19 = vsel %vm12222_vm3, %v6784_v57, %v6788_v16  ;;  %v9435_v51 = vcombine.low %v14714_v32, %v14718_v50  ;;  %v14784_v26 = vcombine.low %v6755_v6, %v6765_v8  ;;  %v9436_v17 = vcombine.low %v14725_v11, %v14729_v30 }
 0x1e0   :  { %10821 = vmatmul.mubr.msk.bf16.gmra.mrb[44].mxu1 %vm993_vm4, %v16514_v62  ;;  %11171 = vmatpush3.bf16.msra.mxu0 %v14370_v10  ;;  %v14777_v10 = vcombine.low %v6731_v41, %v6741_v49  ;;  %v14790_v34 = vsel %vm12867_vm7, %v9404_v37, %v2249_v25  ;;  %v14795_v48 = vcombine.low %v6779_v35, %v6789_v19  ;;  %v6810_v28 = vshll.u32 %v10047_v20, 16  ;;  %v10053_v20 = vld [vmem:[%s16490_s0 + $0xa4] sm:$0x1] }
 0x1e1   :  { %10824 = vmatprep.mubr.msk.bf16.mxu1 %vm993_vm4, %v16515_v4  ;;  %11110 = vmatprep.mubr.msk.bf16.mxu0 %vm993_vm4, %v14571_v21  ;;  %v6818_v21 = vshll.u32 %v10048_v59, 16  ;;  %v14799_v54 = vsel %vm12867_vm7, %v2251_v55, %v2252_v56  ;;  %v6824_v53 = vshll.u32 %v10049_v47, 16  ;;  %v14807_v1 = vrot.slane %v6797_v40, 4 }
 0x1e2   :  { %v6807_v57 = vor.u32 %v6806_v36, %v14754_v38  ;;  %v6828_v16 = vshrl.u32 %v10049_v47, 16  ;;  %v6834_v46 = vshll.u32 %v10050_v7, 16  ;;  %v14813_v25 = vrot.slane %v6815_v22, 4  ;;  %v10060_v47 = vld [vmem:[%s16490_s0 + $0xc0] sm:$0xf] }
 0x1e3   :  { %v6820_v39 = vrot.slane %v6818_v21, 5  ;;  %v6839_v58 = vshrl.u32 %v10051_v12, 16  ;;  %v6842_v24 = vshll.u32 %v10051_v12, 16  ;;  %v6848_v41 = vshll.u32 %v10052_v43, 16  ;;  %v10056_v22 = vld [vmem:[%s16490_s0 + $0xb0] sm:$0x1] }
 0x1e4   :  { %v6852_v49 = vshrl.u32 %v10052_v43, 16  ;;  %v6863_v6 = vshrl.u32 %v10054_v60, 16  ;;  %v6866_v37 = vshll.u32 %v10054_v60, 16  ;;  %v9437_v59 = vcombine.low %v14790_v34, %v14799_v54  ;;  %v10061_v43 = vld [vmem:[%s16490_s0 + $0xc4] sm:$0xf] }
 0x1e5   :  { %v14819_v8 = vrot.slane %v6810_v28, 5  ;;  %v6872_v35 = vshll.u32 %v10055_v9, 16  ;;  %v6876_v55 = vshrl.u32 %v10055_v9, 16  ;;  %v14834_v56 = vrot.slane %v6807_v57, 4  ;;  %v9668_v34 = vld [vmem:[%s16490_s0 + $0x138] sm:$0xf] }
 0x1e6   :  { %v14836_v62 = vrot.slane %v6824_v53, 5  ;;  %v6830_v19 = vrot.slane %v6828_v16, 4  ;;  %v16516_v45 = vcombine.low %v14512_v42, %v14516_v63  ;;  %v6841_v40 = vrot.slane %v6839_v58, 4 }
 0x1e7   :  { %11111 = vmatmul.mubr.msk.bf16.gmra.mrb[4].mxu0 %vm993_vm4, %v14573_v14  ;;  %v6803_v14 = vsel %vm12222_vm3, %v14807_v1, %v14754_v38  ;;  %v6844_v36 = vrot.slane %v6842_v24, 5  ;;  %v14854_v4 = vrot.slane %v6848_v41, 5  ;;  %v6854_v7 = vrot.slane %v6852_v49, 4  ;;  %v10070_v38 = vld [vmem:[%s16490_s0 + $0x100] sm:$0xf] }
 0x1e8   :  { %10825 = vmatmul.mubr.msk.bf16.gmra.mrb[48].mxu1 %vm993_vm4, %v9431_v27  ;;  %11114 = vmatprep.mubr.msk.bf16.mxu0 %vm993_vm4, %v14587_v31  ;;  %v6821_v27 = vor.u32 %v6820_v39, %v14813_v25  ;;  %v14849_v31 = vrot.slane %v6834_v46, 5  ;;  %v6865_v42 = vrot.slane %v6863_v6, 4  ;;  %v6868_v63 = vrot.slane %v6866_v37, 5  ;;  %v10072_v1 = vld [vmem:[%s16490_s0 + $0x108] sm:$0xf] }
 0x1e9   :  { %10828 = vmatprep.mubr.msk.bf16.mxu1 %vm993_vm4, %v16516_v45  ;;  %v14859_v21 = vrot.slane %v6872_v35, 5  ;;  %v6878_v12 = vrot.slane %v6876_v55, 4  ;;  %v6887_v28 = vshrl.u32 %v10057_v61, 16  ;;  %v6890_v53 = vshll.u32 %v10057_v61, 16 }
 0x1ea   :  { %v6896_v60 = vshll.u32 %v10058_v2, 16  ;;  %v6900_v57 = vshrl.u32 %v10058_v2, 16  ;;  %v6911_v16 = vshrl.u32 %v10060_v47, 16  ;;  %v6914_v46 = vshll.u32 %v10060_v47, 16 }
 0x1eb   :  { %v6813_v9 = vsel %vm12222_vm3, %v14834_v56, %v14819_v8  ;;  %v6831_v25 = vor.u32 %v6830_v19, %v14836_v62  ;;  %v6845_v39 = vor.u32 %v6844_v36, %v6841_v40  ;;  %v6858_v58 = vshll.u32 %v10053_v20, 16  ;;  %v10059_v19 = vld [vmem:[%s16490_s0 + $0xbc] sm:$0x1] }
 0x1ec   :  { %v6855_v24 = vor.u32 %v6854_v7, %v14854_v4  ;;  %v6882_v41 = vshll.u32 %v10056_v22, 16  ;;  %v6920_v49 = vshll.u32 %v10061_v43, 16  ;;  %v6924_v6 = vshrl.u32 %v10061_v43, 16  ;;  %v10062_v43 = vld [vmem:[%s16490_s0 + $0xc8] sm:$0x1] }
 0x1ed   :  { %v6869_v37 = vor.u32 %v6868_v63, %v6865_v42  ;;  %v6879_v35 = vor.u32 %v6878_v12, %v14859_v21  ;;  %v6889_v55 = vrot.slane %v6887_v28, 4  ;;  %v6892_v61 = vrot.slane %v6890_v53, 5  ;;  %v10064_v28 = vld [vmem:[%s16490_s0 + $0xd0] sm:$0xf] }
 0x1ee   :  { %v16517_v2 = vcombine.low %v14579_v18, %v14591_v52  ;;  %v14882_v20 = vrot.slane %v6896_v60, 5  ;;  %v6913_v45 = vrot.slane %v6911_v16, 4  ;;  %v6916_v40 = vrot.slane %v6914_v46, 5 }
 0x1ef   :  { %11115 = vmatmul.mubr.msk.bf16.gmra.mrb[8].mxu0 %vm993_vm4, %v14775_v15  ;;  %v6902_v15 = vrot.slane %v6900_v57, 4  ;;  %v16518_v36 = vcombine.low %v14626_v5, %v14637_v33  ;;  %v6822_v18 = vrot.slane %v6821_v27, 4  ;;  %v6832_v52 = vrot.slane %v6831_v25, 4 }
 0x1f0   :  { %10829 = vmatmul.mubr.msk.bf16.gmra.mrb[52].mxu1 %vm993_vm4, %v16517_v2  ;;  %11118 = vmatprep.mubr.msk.bf16.mxu0 %vm993_vm4, %v14777_v10  ;;  %v6846_v47 = vrot.slane %v6845_v39, 4  ;;  %v6860_v7 = vrot.slane %v6858_v58, 5  ;;  %v10063_v10 = vld [vmem:[%s16490_s0 + $0xcc] sm:$0xf]  ;;  %v6856_v22 = vrot.slane %v6855_v24, 4  ;;  %v6884_v42 = vrot.slane %v6882_v41, 5 }
 0x1f1   :  { %10832 = vmatprep.mubr.msk.bf16.mxu1 %vm993_vm4, %v16518_v36  ;;  %v14891_v63 = vrot.slane %v6920_v49, 5  ;;  %v6926_v12 = vrot.slane %v6924_v6, 4  ;;  %v6870_v5 = vrot.slane %v6869_v37, 4  ;;  %v6880_v33 = vrot.slane %v6879_v35, 4 }
 0x1f2   :  { %v6893_v53 = vor.u32 %v6892_v61, %v6889_v55  ;;  %v6906_v27 = vshll.u32 %v10059_v19, 16  ;;  %v6903_v60 = vor.u32 %v6902_v15, %v14882_v20  ;;  %v6917_v57 = vor.u32 %v6916_v40, %v6913_v45  ;;  %v10067_v61 = vld [vmem:[%s16490_s0 + $0xf4] sm:$0xf] }
 0x1f3   :  { %v6935_v16 = vshrl.u32 %v10063_v10, 16  ;;  %v6938_v46 = vshll.u32 %v10063_v10, 16  ;;  %v6827_v25 = vsel %vm12222_vm3, %v6822_v18, %v14836_v62  ;;  %v6837_v39 = vsel %vm12222_vm3, %v6832_v52, %v14849_v31  ;;  %v10066_v62 = vld [vmem:[%s16490_s0 + $0xf0] sm:$0xf]  ;;  %v10065_v15 = vld [vmem:[%s16490_s0 + $0xd4] sm:$0x1] }
 0x1f4   :  { %v6944_v58 = vshll.u32 %v10064_v28, 16  ;;  %v6948_v24 = vshrl.u32 %v10064_v28, 16  ;;  %v6851_v41 = vsel %vm12222_vm3, %v6846_v47, %v14854_v4  ;;  %v6861_v49 = vsel %vm12222_vm3, %v6856_v22, %v6860_v7  ;;  %v10069_v47 = vld [vmem:[%s16490_s0 + $0xfc] sm:$0xf]  ;;  %v10068_v28 = vld [vmem:[%s16490_s0 + $0xf8] sm:$0x1] }
 0x1f5   :  { %v6927_v6 = vor.u32 %v6926_v12, %v14891_v63  ;;  %v6930_v37 = vshll.u32 %v10062_v43, 16  ;;  %v6875_v31 = vsel %vm12222_vm3, %v6870_v5, %v14859_v21  ;;  %v6885_v4 = vsel %vm12222_vm3, %v6880_v33, %v6884_v42 }
 0x1f6   :  { %v6894_v35 = vrot.slane %v6893_v53, 4  ;;  %v6908_v55 = vrot.slane %v6906_v27, 5  ;;  %v6918_v2 = vrot.slane %v6917_v57, 4  ;;  %v6937_v21 = vrot.slane %v6935_v16, 4 }
 0x1f7   :  { %11119 = vmatmul.mubr.msk.bf16.gmra.mrb[12].mxu0 %vm993_vm4, %v14784_v26  ;;  %v6904_v26 = vrot.slane %v6903_v60, 4  ;;  %v6940_v19 = vrot.slane %v6938_v46, 5  ;;  %v14938_v45 = vrot.slane %v6944_v58, 5  ;;  %v6950_v32 = vrot.slane %v6948_v24, 4  ;;  %v10073_v60 = vld [vmem:[%s16490_s0 + $0x10c] sm:$0xf] }
 0x1f8   :  { %10833 = vmatmul.mubr.msk.bf16.gmra.mrb[56].mxu1 %vm993_vm4, %v9435_v51  ;;  %11122 = vmatprep.mubr.msk.bf16.mxu0 %vm993_vm4, %v14795_v48  ;;  %v6959_v50 = vshrl.u32 %v10066_v62, 16  ;;  %v6962_v51 = vshll.u32 %v10066_v62, 16  ;;  %v6928_v40 = vrot.slane %v6927_v6, 4  ;;  %v6932_v48 = vrot.slane %v6930_v37, 5 }
 0x1f9   :  { %10836 = vmatprep.mubr.msk.bf16.mxu1 %vm993_vm4, %v9436_v17  ;;  %v6968_v36 = vshll.u32 %v10067_v61, 16  ;;  %v6972_v18 = vshrl.u32 %v10067_v61, 16  ;;  %v10124_v11 = vcombine.low %v6803_v14, %v6813_v9  ;;  %v10125_v30 = vcombine.low %v6827_v25, %v6837_v39  ;;  %v11866_v14 = vld [vmem:[%s16490_s0 + $0xc] sm:$0xff]   ;;  %v11867_v61 = vld [vmem:[%s16490_s0 + $0x18] sm:$0xff]  }
 0x1fa   :  { %v10126_v17 = vcombine.low %v6851_v41, %v6861_v49  ;;  %v14950_v52 = vcombine.low %v6875_v31, %v6885_v4  ;;  %v6899_v7 = vsel %vm12222_vm3, %v6894_v35, %v14882_v20  ;;  %v6909_v8 = vsel %vm12222_vm3, %v6904_v26, %v6908_v55  ;;  %v10074_v26 = vld [vmem:[%s16490_s0 + $0x110] sm:$0x1] }
 0x1fb   :  { %v6941_v56 = vor.u32 %v6940_v19, %v6937_v21  ;;  %v6954_v10 = vshll.u32 %v10065_v15, 16  ;;  %v6923_v9 = vsel %vm12222_vm3, %v6918_v2, %v14891_v63  ;;  %v6951_v20 = vor.u32 %v6950_v32, %v14938_v45  ;;  %v11868_v32 = vld [vmem:[%s16490_s0 + $0x24] sm:$0xff]  }
 0x1fc   :  { %v6961_v22 = vrot.slane %v6959_v50, 4  ;;  %v6964_v42 = vrot.slane %v6962_v51, 5  ;;  %v6933_v12 = vsel %vm12222_vm3, %v6928_v40, %v6932_v48  ;;  %v14978_v5 = vrot.slane %v6968_v36, 5 }
 0x1fd   :  { %v6974_v33 = vrot.slane %v6972_v18, 4  ;;  %v6983_v53 = vshrl.u32 %v10069_v47, 16  ;;  %v6986_v27 = vshll.u32 %v10069_v47, 16  ;;  %v6992_v43 = vshll.u32 %v10070_v38, 16 }
 0x1fe   :  { %v6996_v63 = vshrl.u32 %v10070_v38, 16  ;;  %v7007_v57 = vshrl.u32 %v10072_v1, 16  ;;  %v14989_v16 = vcombine.low %v6899_v7, %v6909_v8  ;;  %v14991_v46 = vrot.slane %v6941_v56, 4 }
 0x1ff   :  { %11123 = vmatmul.mubr.msk.bf16.gmra.mrb[16].mxu0 %vm993_vm4, %v10124_v11  ;;  %v14993_v25 = vrot.slane %v6954_v10, 5  ;;  %v7010_v39 = vshll.u32 %v10072_v1, 16  ;;  %v14996_v58 = vcombine.low %v6923_v9, %v6933_v12  ;;  %v14998_v24 = vrot.slane %v6951_v20, 4  ;;  %v10075_v11 = vld [vmem:[%s16490_s0 + $0x114] sm:$0xf] }
 0x200   :  { %10837 = vmatmul.mubr.msk.bf16.gmra.mrb[60].mxu1 %vm993_vm4, %v9437_v59  ;;  %11126 = vmatprep.mubr.msk.bf16.mxu0 %vm993_vm4, %v10125_v30  ;;  %v6965_v41 = vor.u32 %v6964_v42, %v6961_v22  ;;  %v6978_v49 = vshll.u32 %v10068_v28, 16  ;;  %v6975_v54 = vor.u32 %v6974_v33, %v14978_v5  ;;  %v10071_v59 = vld [vmem:[%s16490_s0 + $0x104] sm:$0x1]  ;;  %v6985_v6 = vrot.slane %v6983_v53, 4 }
 0x201   :  { %10842 = vmatprep.mubr.msk.bf16.mxu1 %vm993_vm4, %v11866_v14  ;;  %v7016_v37 = vshll.u32 %v10073_v60, 16  ;;  %v7020_v62 = vshrl.u32 %v10073_v60, 16  ;;  %v6988_v31 = vrot.slane %v6986_v27, 5  ;;  %v15007_v4 = vrot.slane %v6992_v43, 5  ;;  %v10079_v12 = vld [vmem:[%s16490_s0 + $0x124] sm:$0xf] }
 0x202   :  { %v6998_v35 = vrot.slane %v6996_v63, 4  ;;  %v7009_v55 = vrot.slane %v7007_v57, 4  ;;  %v7012_v2 = vrot.slane %v7010_v39, 5  ;;  %v4132_v21 = vshrl.u32 %v9668_v34, 16  ;;  %v11869_v43 = vld [vmem:[%s16490_s0 + $0x30] sm:$0xff]  }
 0x203   :  { %v4135_v19 = vshll.u32 %v9668_v34, 16  ;;  %v4154_v15 = vsel %vm12222_vm3, %v14309_v13, %v13973_v23  ;;  %v6947_v50 = vsel %vm12222_vm3, %v14991_v46, %v14938_v45  ;;  %v6966_v51 = vrot.slane %v6965_v41, 4  ;;  %v10076_v45 = vld [vmem:[%s16490_s0 + $0x118] sm:$0xf]  ;;  %v11870_v46 = vld [vmem:[%s16490_s0 + $0x3c] sm:$0xff]  }
 0x204   :  { %v6980_v40 = vrot.slane %v6978_v49, 5  ;;  %v7002_v48 = vshll.u32 %v10071_v59, 16  ;;  %v15026_v36 = vrot.slane %v7016_v37, 5  ;;  %v7022_v18 = vrot.slane %v7020_v62, 4  ;;  %v10077_v34 = vld [vmem:[%s16490_s0 + $0x11c] sm:$0x1] }
 0x205   :  { %v4134_v23 = vrot.slane %v4132_v21, 4  ;;  %v4137_v13 = vrot.slane %v4135_v19, 5  ;;  %v6976_v30 = vrot.slane %v6975_v54, 4  ;;  %v6989_v47 = vor.u32 %v6988_v31, %v6985_v6  ;;  %v10081_v37 = vld [vmem:[%s16490_s0 + $0x12c] sm:$0xf] }
 0x206   :  { %v6999_v7 = vor.u32 %v6998_v35, %v15007_v4  ;;  %v7026_v8 = vshll.u32 %v10074_v26, 16  ;;  %v6957_v56 = vsel %vm12222_vm3, %v14998_v24, %v14993_v25  ;;  %v6971_v38 = vsel %vm12222_vm3, %v6966_v51, %v14978_v5  ;;  %v10080_v35 = vld [vmem:[%s16490_s0 + $0x128] sm:$0x1]  ;;  %v10085_v51 = vld [vmem:[%s16490_s0 + $0x13c] sm:$0xf] }
 0x207   :  { %11127 = vmatmul.mubr.msk.bf16.gmra.mrb[20].mxu0 %vm993_vm4, %v10126_v17  ;;  %v7013_v17 = vor.u32 %v7012_v2, %v7009_v55  ;;  %v4138_v10 = vor.u32 %v4137_v13, %v4134_v23  ;;  %v7004_v1 = vrot.slane %v7002_v48, 5  ;;  %v7031_v14 = vshrl.u32 %v10075_v11, 16  ;;  %v11871_v23 = vld [vmem:[%s16490_s0 + $0x48] sm:$0xff]  }
 0x208   :  { %10843 = vmatmul.mubr.msk.bf16.vlgmr.msra.gmra.mrb[0].mxu1 %vm993_vm4, %v11867_v61  ;;  %11130 = vmatprep.mubr.msk.bf16.mxu0 %vm993_vm4, %v14950_v52  ;;  %v7034_v9 = vshll.u32 %v10075_v11, 16  ;;  %v10078_v52 = vld [vmem:[%s16490_s0 + $0x120] sm:$0xf]  ;;  %v7023_v20 = vor.u32 %v7022_v18, %v15026_v36  ;;  %v7040_v22 = vshll.u32 %v10076_v45, 16  ;;  %v7044_v42 = vshrl.u32 %v10076_v45, 16 }
 0x209   :  { %10846 = vmatprep.mubr.msk.bf16.mxu1 %vm993_vm4, %v11868_v32  ;;  %11277 = vmatpush3.bf16.msra.mxu1 %v12184_v3  ;;  %v4139_v28 = vrot.slane %v4138_v10, 4  ;;  %v6981_v5 = vsel %vm12222_vm3, %v6976_v30, %v6980_v40  ;;  %v6990_v33 = vrot.slane %v6989_v47, 4  ;;  %v7000_v53 = vrot.slane %v6999_v7, 4  ;;  %v10082_v61 = vld [vmem:[%s16490_s0 + $0x130] sm:$0xf]  ;;  %v11872_v7 = vld [vmem:[%s16490_s0 + $0x54] sm:$0xff]  }
 0x20a   :  { %v7028_v27 = vrot.slane %v7026_v8, 5  ;;  %v7014_v3 = vrot.slane %v7013_v17, 4  ;;  %v7055_v63 = vshrl.u32 %v10078_v52, 16  ;;  %v7058_v60 = vshll.u32 %v10078_v52, 16  ;;  %v10087_v52 = vld [vmem:[%s16490_s0 + $0x144] sm:$0xf] }
 0x20b   :  { %v4144_v57 = vsel %vm12222_vm3, %v4139_v28, %v13946_v44  ;;  %v7033_v25 = vrot.slane %v7031_v14, 4  ;;  %v7064_v39 = vshll.u32 %v10079_v12, 16  ;;  %v7068_v24 = vshrl.u32 %v10079_v12, 16  ;;  %v10088_v28 = vld [vmem:[%s16490_s0 + $0x148] sm:$0xf] }
 0x20c   :  { %v15066_v41 = vcombine.low %v4144_v57, %v4154_v15  ;;  %v7024_v49 = vrot.slane %v7023_v20, 4  ;;  %v7036_v54 = vrot.slane %v7034_v9, 5  ;;  %v15071_v59 = vrot.slane %v7040_v22, 5 }
 0x20d   :  { %v7046_v6 = vrot.slane %v7044_v42, 4  ;;  %v10130_v44 = vcombine.low %v6947_v50, %v6957_v56  ;;  %v10131_v62 = vcombine.low %v6971_v38, %v6981_v5  ;;  %v6995_v31 = vsel %vm12222_vm3, %v6990_v33, %v15007_v4  ;;  %v10084_v4 = vld [vmem:[%s16490_s0 + $0x138] sm:$0xf]  ;;  %v10083_v56 = vld [vmem:[%s16490_s0 + $0x134] sm:$0x1] }
 0x20e   :  { %v7060_v55 = vrot.slane %v7058_v60, 5  ;;  %v7050_v26 = vshll.u32 %v10077_v34, 16  ;;  %v15093_v2 = vrot.slane %v7064_v39, 5  ;;  %v7070_v21 = vrot.slane %v7068_v24, 4 }
 0x20f   :  { %11131 = vmatmul.mubr.msk.bf16.gmra.mrb[24].mxu0 %vm993_vm4, %v14989_v16  ;;  %v7057_v16 = vrot.slane %v7055_v63, 4  ;;  %v7019_v19 = vsel %vm12222_vm3, %v7014_v3, %v15026_v36  ;;  %v7029_v15 = vsel %vm12222_vm3, %v7024_v49, %v7028_v27  ;;  %v7037_v32 = vor.u32 %v7036_v54, %v7033_v25 }
 0x210   :  { %10847 = vmatmul.mubr.msk.bf16.gmra.mrb[4].mxu1 %vm993_vm4, %v11869_v43  ;;  %11134 = vmatprep.mubr.msk.bf16.mxu0 %vm993_vm4, %v14996_v58  ;;  %v7005_v58 = vsel %vm12222_vm3, %v7000_v53, %v7004_v1  ;;  %v7047_v50 = vor.u32 %v7046_v6, %v15071_v59  ;;  %v7079_v40 = vshrl.u32 %v10081_v37, 16  ;;  %v7082_v48 = vshll.u32 %v10081_v37, 16  ;;  %v10086_v53 = vld [vmem:[%s16490_s0 + $0x140] sm:$0x1] }
 0x211   :  { %10850 = vmatprep.mubr.msk.bf16.mxu1 %vm993_vm4, %v11870_v46  ;;  %v7088_v18 = vshll.u32 %v10082_v61, 16  ;;  %v7092_v11 = vshrl.u32 %v10082_v61, 16  ;;  %v7061_v13 = vor.u32 %v7060_v55, %v7057_v16  ;;  %v7074_v36 = vshll.u32 %v10080_v35, 16  ;;  %v10090_v46 = vld [vmem:[%s16490_s0 + $0x150] sm:$0xf]  ;;  %v11873_v37 = vld [vmem:[%s16490_s0 + $0x60] sm:$0xff]  }
 0x212   :  { %v7103_v30 = vshrl.u32 %v10084_v4, 16  ;;  %v7106_v47 = vshll.u32 %v10084_v4, 16  ;;  %v10132_v8 = vcombine.low %v6995_v31, %v7005_v58  ;;  %v7071_v45 = vor.u32 %v7070_v21, %v15093_v2  ;;  %v10091_v35 = vld [vmem:[%s16490_s0 + $0x154] sm:$0xf]  ;;  %v11874_v55 = vld [vmem:[%s16490_s0 + $0x6c] sm:$0xff]  }
 0x213   :  { %v7112_v17 = vshll.u32 %v10085_v51, 16  ;;  %v7116_v10 = vshrl.u32 %v10085_v51, 16  ;;  %v10133_v38 = vcombine.low %v7019_v19, %v7029_v15  ;;  %v15117_v1 = vrot.slane %v7037_v32, 4  ;;  %v10093_v4 = vld [vmem:[%s16490_s0 + $0x15c] sm:$0xf] }
 0x214   :  { %v15119_v14 = vrot.slane %v7047_v50, 4  ;;  %v15121_v9 = vrot.slane %v7050_v26, 5  ;;  %v7081_v20 = vrot.slane %v7079_v40, 4  ;;  %v7084_v22 = vrot.slane %v7082_v48, 5  ;;  %v10089_v48 = vld [vmem:[%s16490_s0 + $0x14c] sm:$0x1] }
 0x215   :  { %v15127_v42 = vrot.slane %v7088_v18, 5  ;;  %v7094_v12 = vrot.slane %v7092_v11, 4  ;;  %v7062_v5 = vrot.slane %v7061_v13, 4  ;;  %v7076_v33 = vrot.slane %v7074_v36, 5 }
 0x216   :  { %v7105_v27 = vrot.slane %v7103_v30, 4  ;;  %v7108_v43 = vrot.slane %v7106_v47, 5  ;;  %v7072_v3 = vrot.slane %v7071_v45, 4  ;;  %v7098_v63 = vshll.u32 %v10083_v56, 16 }
 0x217   :  { %11135 = vmatmul.mubr.msk.bf16.gmra.mrb[28].mxu0 %vm993_vm4, %v10130_v44  ;;  %v15138_v60 = vrot.slane %v7112_v17, 5  ;;  %v7118_v57 = vrot.slane %v7116_v10, 4  ;;  %v7127_v25 = vshrl.u32 %v10087_v52, 16  ;;  %v7130_v39 = vshll.u32 %v10087_v52, 16 }
 0x218   :  { %10851 = vmatmul.mubr.msk.bf16.gmra.mrb[8].mxu1 %vm993_vm4, %v11871_v23  ;;  %11138 = vmatprep.mubr.msk.bf16.mxu0 %vm993_vm4, %v10131_v62  ;;  %v7136_v24 = vshll.u32 %v10088_v28, 16  ;;  %v7140_v49 = vshrl.u32 %v10088_v28, 16  ;;  %v7043_v34 = vsel %vm12222_vm3, %v15117_v1, %v15071_v59  ;;  %v7053_v54 = vsel %vm12222_vm3, %v15119_v14, %v15121_v9  ;;  %v11875_v14 = vld [vmem:[%s16490_s0 + $0x78] sm:$0xff]  }
 0x219   :  { %10854 = vmatprep.mubr.msk.bf16.mxu1 %vm993_vm4, %v11872_v7  ;;  %v7085_v6 = vor.u32 %v7084_v22, %v7081_v20  ;;  %v7095_v44 = vor.u32 %v7094_v12, %v15127_v42  ;;  %v7109_v62 = vor.u32 %v7108_v43, %v7105_v27  ;;  %v7122_v31 = vshll.u32 %v10086_v53, 16  ;;  %v11876_v22 = vld [vmem:[%s16490_s0 + $0x84] sm:$0xff]  }
 0x21a   :  { %v7151_v16 = vshrl.u32 %v10090_v46, 16  ;;  %v7154_v59 = vshll.u32 %v10090_v46, 16  ;;  %v7067_v61 = vsel %vm12222_vm3, %v7062_v5, %v15093_v2  ;;  %v7077_v58 = vsel %vm12222_vm3, %v7072_v3, %v7076_v33  ;;  %v10094_v2 = vld [vmem:[%s16490_s0 + $0x160] sm:$0xf]  ;;  %v10092_v33 = vld [vmem:[%s16490_s0 + $0x158] sm:$0x1] }
 0x21b   :  { %v15166_v26 = vrot.slane %v7098_v63, 5  ;;  %v7119_v21 = vor.u32 %v7118_v57, %v15138_v60  ;;  %v7129_v19 = vrot.slane %v7127_v25, 4  ;;  %v7132_v15 = vrot.slane %v7130_v39, 5  ;;  %v10096_v27 = vld [vmem:[%s16490_s0 + $0x168] sm:$0xf] }
 0x21c   :  { %v15172_v32 = vrot.slane %v7136_v24, 5  ;;  %v7142_v50 = vrot.slane %v7140_v49, 4  ;;  %v7086_v51 = vrot.slane %v7085_v6, 4  ;;  %v7096_v40 = vrot.slane %v7095_v44, 4  ;;  %v10097_v57 = vld [vmem:[%s16490_s0 + $0x16c] sm:$0xf] }
 0x21d   :  { %v7160_v18 = vshll.u32 %v10091_v35, 16  ;;  %v7164_v11 = vshrl.u32 %v10091_v35, 16  ;;  %v7110_v23 = vrot.slane %v7109_v62, 4  ;;  %v7124_v13 = vrot.slane %v7122_v31, 5  ;;  %v10095_v24 = vld [vmem:[%s16490_s0 + $0x164] sm:$0x1] }
 0x21e   :  { %v7153_v36 = vrot.slane %v7151_v16, 4  ;;  %v7156_v30 = vrot.slane %v7154_v59, 5  ;;  %v7175_v47 = vshrl.u32 %v10093_v4, 16  ;;  %v7178_v7 = vshll.u32 %v10093_v4, 16  ;;  %v10099_v59 = vld [vmem:[%s16490_s0 + $0x174] sm:$0xf] }
 0x21f   :  { %11139 = vmatmul.mubr.msk.bf16.gmra.mrb[32].mxu0 %vm993_vm4, %v10132_v8  ;;  %v7184_v8 = vshll.u32 %v10094_v2, 16  ;;  %v7188_v45 = vshrl.u32 %v10094_v2, 16  ;;  %v7120_v56 = vrot.slane %v7119_v21, 4  ;;  %v7133_v17 = vor.u32 %v7132_v15, %v7129_v19  ;;  %v10098_v4 = vld [vmem:[%s16490_s0 + $0x170] sm:$0x1] }
 0x220   :  { %10855 = vmatmul.mubr.msk.bf16.gmra.mrb[12].mxu1 %vm993_vm4, %v11873_v37  ;;  %11142 = vmatprep.mubr.msk.bf16.mxu0 %vm993_vm4, %v10133_v38  ;;  %v7143_v10 = vor.u32 %v7142_v50, %v15172_v32  ;;  %v7146_v1 = vshll.u32 %v10089_v48, 16  ;;  %v10134_v38 = vcombine.low %v7043_v34, %v7053_v54  ;;  %v10135_v9 = vcombine.low %v7067_v61, %v7077_v58  ;;  %v10100_v19 = vld [vmem:[%s16490_s0 + $0x178] sm:$0xf] }
 0x221   :  { %10858 = vmatprep.mubr.msk.bf16.mxu1 %vm993_vm4, %v11874_v55  ;;  %v15188_v52 = vrot.slane %v7160_v18, 5  ;;  %v7166_v20 = vrot.slane %v7164_v11, 4  ;;  %v7091_v12 = vsel %vm12222_vm3, %v7086_v51, %v15127_v42  ;;  %v7101_v28 = vsel %vm12222_vm3, %v7096_v40, %v15166_v26  ;;  %v11877_v55 = vld [vmem:[%s16490_s0 + $0x90] sm:$0xff]   ;;  %v10102_v40 = vld [vmem:[%s16490_s0 + $0x180] sm:$0xf] }
 0x222   :  { %v7115_v5 = vsel %vm12222_vm3, %v7110_v23, %v15138_v60  ;;  %v7157_v53 = vor.u32 %v7156_v30, %v7153_v36  ;;  %v7177_v43 = vrot.slane %v7175_v47, 4  ;;  %v7180_v3 = vrot.slane %v7178_v7, 5  ;;  %v10103_v23 = vld [vmem:[%s16490_s0 + $0x184] sm:$0xf] }
 0x223   :  { %v15208_v42 = vrot.slane %v7184_v8, 5  ;;  %v7190_v63 = vrot.slane %v7188_v45, 4  ;;  %v7125_v60 = vsel %vm12222_vm3, %v7120_v56, %v7124_v13  ;;  %v7134_v46 = vrot.slane %v7133_v17, 4  ;;  %v11878_v13 = vld [vmem:[%s16490_s0 + $0x9c] sm:$0xff]  }
 0x224   :  { %v7144_v25 = vrot.slane %v7143_v10, 4  ;;  %v7148_v39 = vrot.slane %v7146_v1, 5  ;;  %v7167_v49 = vor.u32 %v7166_v20, %v15188_v52  ;;  %v7170_v34 = vshll.u32 %v10092_v33, 16  ;;  %v10101_v33 = vld [vmem:[%s16490_s0 + $0x17c] sm:$0x1] }
 0x225   :  { %v7199_v54 = vshrl.u32 %v10096_v27, 16  ;;  %v7202_v6 = vshll.u32 %v10096_v27, 16  ;;  %v7208_v44 = vshll.u32 %v10097_v57, 16  ;;  %v7212_v37 = vshrl.u32 %v10097_v57, 16 }
 0x226   :  { %v7158_v62 = vrot.slane %v7157_v53, 4  ;;  %v7181_v31 = vor.u32 %v7180_v3, %v7177_v43  ;;  %v7191_v35 = vor.u32 %v7190_v63, %v15208_v42  ;;  %v7194_v16 = vshll.u32 %v10095_v24, 16  ;;  %v10105_v63 = vld [vmem:[%s16490_s0 + $0x18c] sm:$0xf] }
 0x227   :  { %11143 = vmatmul.mubr.msk.bf16.gmra.mrb[36].mxu0 %vm993_vm4, %v10134_v38  ;;  %v10136_v61 = vcombine.low %v7091_v12, %v7101_v28  ;;  %v10137_v58 = vcombine.low %v7115_v5, %v7125_v60  ;;  %v7139_v26 = vsel %vm12222_vm3, %v7134_v46, %v15172_v32  ;;  %v7149_v21 = vsel %vm12222_vm3, %v7144_v25, %v7148_v39  ;;  %v11879_v39 = vld [vmem:[%s16490_s0 + $0xa8] sm:$0xff]  }
 0x228   :  { %10859 = vmatmul.mubr.msk.bf16.gmra.mrb[16].mxu1 %vm993_vm4, %v11875_v14  ;;  %11146 = vmatprep.mubr.msk.bf16.mxu0 %vm993_vm4, %v10135_v9  ;;  %v7168_v15 = vrot.slane %v7167_v49, 4  ;;  %v7172_v50 = vrot.slane %v7170_v34, 5  ;;  %v7201_v2 = vrot.slane %v7199_v54, 4  ;;  %v7204_v51 = vrot.slane %v7202_v6, 5  ;;  %v10106_v6 = vld [vmem:[%s16490_s0 + $0x190] sm:$0xf] }
 0x229   :  { %10862 = vmatprep.mubr.msk.bf16.mxu1 %vm993_vm4, %v11876_v22  ;;  %v15244_v32 = vrot.slane %v7208_v44, 5  ;;  %v7214_v48 = vrot.slane %v7212_v37, 4  ;;  %v7223_v18 = vshrl.u32 %v10099_v59, 16  ;;  %v7226_v11 = vshll.u32 %v10099_v59, 16  ;;  %v11880_v44 = vld [vmem:[%s16490_s0 + $0xb4] sm:$0xff]  }
 0x22a   :  { %v7163_v36 = vsel %vm12222_vm3, %v7158_v62, %v15188_v52  ;;  %v7182_v30 = vrot.slane %v7181_v31, 4  ;;  %v7192_v47 = vrot.slane %v7191_v35, 4  ;;  %v7196_v7 = vrot.slane %v7194_v16, 5  ;;  %v10108_v59 = vld [vmem:[%s16490_s0 + $0x198] sm:$0xf] }
 0x22b   :  { %v7232_v8 = vshll.u32 %v10100_v19, 16  ;;  %v7236_v45 = vshrl.u32 %v10100_v19, 16  ;;  %v7247_v56 = vshrl.u32 %v10102_v40, 16  ;;  %v7250_v17 = vshll.u32 %v10102_v40, 16 }
 0x22c   :  { %v7173_v10 = vsel %vm12222_vm3, %v7168_v15, %v7172_v50  ;;  %v7218_v1 = vshll.u32 %v10098_v4, 16  ;;  %v7256_v14 = vshll.u32 %v10103_v23, 16  ;;  %v7260_v38 = vshrl.u32 %v10103_v23, 16 }
 0x22d   :  { %v7205_v9 = vor.u32 %v7204_v51, %v7201_v2  ;;  %v7215_v52 = vor.u32 %v7214_v48, %v15244_v32  ;;  %v7225_v20 = vrot.slane %v7223_v18, 4  ;;  %v7228_v22 = vrot.slane %v7226_v11, 5 }
 0x22e   :  { %v10138_v12 = vcombine.low %v7139_v26, %v7149_v21  ;;  %v7187_v28 = vsel %vm12222_vm3, %v7182_v30, %v15208_v42  ;;  %v7197_v5 = vsel %vm12222_vm3, %v7192_v47, %v7196_v7  ;;  %v15270_v53 = vrot.slane %v7232_v8, 5  ;;  %v10104_v42 = vld [vmem:[%s16490_s0 + $0x188] sm:$0x1] }
 0x22f   :  { %11147 = vmatmul.mubr.msk.bf16.gmra.mrb[40].mxu0 %vm993_vm4, %v10136_v61  ;;  %v7238_v27 = vrot.slane %v7236_v45, 4  ;;  %v7249_v43 = vrot.slane %v7247_v56, 4  ;;  %v7252_v3 = vrot.slane %v7250_v17, 5  ;;  %v10139_v57 = vcombine.low %v7163_v36, %v7173_v10  ;;  %v11881_v36 = vld [vmem:[%s16490_s0 + $0xc0] sm:$0xff]   ;;  %v10107_v56 = vld [vmem:[%s16490_s0 + $0x194] sm:$0x1] }
 0x230   :  { %10863 = vmatmul.mubr.msk.bf16.gmra.mrb[20].mxu1 %vm993_vm4, %v11877_v55  ;;  %11150 = vmatprep.mubr.msk.bf16.mxu0 %vm993_vm4, %v10137_v58  ;;  %v7220_v60 = vrot.slane %v7218_v1, 5  ;;  %v15278_v46 = vrot.slane %v7256_v14, 5  ;;  %v7262_v25 = vrot.slane %v7260_v38, 4  ;;  %v7206_v24 = vrot.slane %v7205_v9, 4  ;;  %v10109_v55 = vld [vmem:[%s16490_s0 + $0x19c] sm:$0xf] }
 0x231   :  { %10866 = vmatprep.mubr.msk.bf16.mxu1 %vm993_vm4, %v11878_v13  ;;  %v7216_v49 = vrot.slane %v7215_v52, 4  ;;  %v7229_v34 = vor.u32 %v7228_v22, %v7225_v20  ;;  %v7242_v54 = vshll.u32 %v10101_v33, 16  ;;  %v10140_v37 = vcombine.low %v7187_v28, %v7197_v5  ;;  %v11882_v8 = vld [vmem:[%s16490_s0 + $0xe4] sm:$0xff]  }
 0x232   :  { %v7239_v62 = vor.u32 %v7238_v27, %v15270_v53  ;;  %v7253_v31 = vor.u32 %v7252_v3, %v7249_v43  ;;  %v7266_v35 = vshll.u32 %v10104_v42, 16  ;;  %v7271_v16 = vshrl.u32 %v10105_v63, 16  ;;  %v10111_v17 = vld [vmem:[%s16490_s0 + $0x1a4] sm:$0xf]  ;;  %v10112_v9 = vld [vmem:[%s16490_s0 + $0x1a8] sm:$0xf] }
 0x233   :  { %v7263_v61 = vor.u32 %v7262_v25, %v15278_v46  ;;  %v7274_v58 = vshll.u32 %v10105_v63, 16  ;;  %v7280_v26 = vshll.u32 %v10106_v6, 16  ;;  %v7284_v21 = vshrl.u32 %v10106_v6, 16 }
 0x234   :  { %v7211_v4 = vsel %vm12222_vm3, %v7206_v24, %v15244_v32  ;;  %v7221_v19 = vsel %vm12222_vm3, %v7216_v49, %v7220_v60  ;;  %v7230_v15 = vrot.slane %v7229_v34, 4  ;;  %v7244_v50 = vrot.slane %v7242_v54, 5  ;;  %v11883_v34 = vld [vmem:[%s16490_s0 + $0xf0] sm:$0xff]  }
 0x235   :  { %v7295_v2 = vshrl.u32 %v10108_v59, 16  ;;  %v7298_v51 = vshll.u32 %v10108_v59, 16  ;;  %v7304_v40 = vshll.u32 %v10109_v55, 16  ;;  %v7308_v48 = vshrl.u32 %v10109_v55, 16  ;;  %v15347_v59 = vld [vmem:[%s16490_s0 + $0x1ac] sm:$0x1] }
 0x236   :  { %v7240_v18 = vrot.slane %v7239_v62, 4  ;;  %v7254_v11 = vrot.slane %v7253_v31, 4  ;;  %v7268_v23 = vrot.slane %v7266_v35, 5  ;;  %v7273_v13 = vrot.slane %v7271_v16, 4  ;;  %v11884_v62 = vld [vmem:[%s16490_s0 + $0xfc] sm:$0xff]  }
 0x237   :  { %11151 = vmatmul.mubr.msk.bf16.gmra.mrb[44].mxu0 %vm993_vm4, %v10138_v12  ;;  %v7264_v32 = vrot.slane %v7263_v61, 4  ;;  %v7276_v30 = vrot.slane %v7274_v58, 5  ;;  %v7282_v47 = vrot.slane %v7280_v26, 5  ;;  %v7286_v7 = vrot.slane %v7284_v21, 4  ;;  %v10110_v12 = vld [vmem:[%s16490_s0 + $0x1a0] sm:$0x1] }
 0x238   :  { %10867 = vmatmul.mubr.msk.bf16.gmra.mrb[24].mxu1 %vm993_vm4, %v11879_v39  ;;  %11154 = vmatprep.mubr.msk.bf16.mxu0 %vm993_vm4, %v10139_v57  ;;  %v10141_v45 = vcombine.low %v7211_v4, %v7221_v19  ;;  %v7297_v10 = vrot.slane %v7295_v2, 4  ;;  %v7300_v1 = vrot.slane %v7298_v51, 5  ;;  %v7306_v14 = vrot.slane %v7304_v40, 5  ;;  %v10179_v2 = vld [vmem:[%s16490_s0 + $0x18] sm:$0xe]  ;;  %v11885_v40 = vld [vmem:[%s16490_s0 + $0x108] sm:$0xff]  }
 0x239   :  { %10870 = vmatprep.mubr.msk.bf16.mxu1 %vm993_vm4, %v11880_v44  ;;  %v7310_v38 = vrot.slane %v7308_v48, 4  ;;  %v7235_v52 = vsel %vm12222_vm3, %v7230_v15, %v15270_v53  ;;  %v7245_v20 = vsel %vm12222_vm3, %v7240_v18, %v7244_v50  ;;  %v7259_v22 = vsel %vm12222_vm3, %v7254_v11, %v15278_v46  ;;  %v12049_v15 = vld [vmem:[%s16490_s0 + $0x1c] sm:$0xf] }
 0x23a   :  { %v7269_v28 = vsel %vm12222_vm3, %v7264_v32, %v7268_v23  ;;  %v7277_v5 = vor.u32 %v7276_v30, %v7273_v13  ;;  %v7287_v33 = vor.u32 %v7286_v7, %v7282_v47  ;;  %v7290_v27 = vshll.u32 %v10107_v56, 16  ;;  %v11886_v13 = vld [vmem:[%s16490_s0 + $0x114] sm:$0xff]   ;;  %v12050_v30 = vld [vmem:[%s16490_s0 + $0x20] sm:$0x1]  ;;  %v10180_v7 = vld [vmem:[%s16490_s0 + $0x24] sm:$0xe] }
 0x23b   :  { %v7319_v53 = vshrl.u32 %v10111_v17, 16  ;;  %v7322_v43 = vshll.u32 %v10111_v17, 16  ;;  %v7328_v3 = vshll.u32 %v10112_v9, 16  ;;  %v7332_v63 = vshrl.u32 %v10112_v9, 16 }
 0x23c   :  { %v7301_v57 = vor.u32 %v7300_v1, %v7297_v10  ;;  %v7311_v60 = vor.u32 %v7310_v38, %v7306_v14  ;;  %v7314_v42 = vshll.u32 %v10110_v12, 16  ;;  %v10142_v46 = vcombine.low %v7235_v52, %v7245_v20  ;;  %v10181_v10 = vld [vmem:[%s16490_s0 + $0x30] sm:$0xe]  ;;  %v12052_v1 = vld [vmem:[%s16490_s0 + $0x34] sm:$0xf] }
 0x23d   :  { %v10143_v25 = vcombine.low %v7259_v22, %v7269_v28  ;;  %v7278_v39 = vrot.slane %v7277_v5, 4  ;;  %v7288_v24 = vrot.slane %v7287_v33, 4  ;;  %v7292_v49 = vrot.slane %v7290_v27, 5  ;;  %v12053_v12 = vld [vmem:[%s16490_s0 + $0x2c] sm:$0x1]  ;;  %v11887_v33 = vld [vmem:[%s16490_s0 + $0x120] sm:$0xff]  }
 0x23e   :  { %v7321_v54 = vrot.slane %v7319_v53, 4  ;;  %v7324_v6 = vrot.slane %v7322_v43, 5  ;;  %v7330_v44 = vrot.slane %v7328_v3, 5  ;;  %v7302_v31 = vrot.slane %v7301_v57, 4  ;;  %v12054_v43 = vld [vmem:[%s16490_s0 + $0x38] sm:$0x1] }
 0x23f   :  { %11155 = vmatmul.mubr.msk.bf16.gmra.mrb[48].mxu0 %vm993_vm4, %v10140_v37  ;;  %v7334_v37 = vrot.slane %v7332_v63, 4  ;;  %v7312_v35 = vrot.slane %v7311_v60, 4  ;;  %v7316_v16 = vrot.slane %v7314_v42, 5  ;;  %v7283_v55 = vsel %vm12222_vm3, %v7278_v39, %v7282_v47  ;;  %v10182_v63 = vld [vmem:[%s16490_s0 + $0x3c] sm:$0xe]  ;;  %v11888_v42 = vld [vmem:[%s16490_s0 + $0x12c] sm:$0xff]  }
 0x240   :  { %10871 = vmatmul.mubr.msk.bf16.gmra.mrb[28].mxu1 %vm993_vm4, %v11881_v36  ;;  %11158 = vmatprep.mubr.msk.bf16.mxu0 %vm993_vm4, %v10141_v45  ;;  %v7293_v61 = vsel %vm12222_vm3, %v7288_v24, %v7292_v49  ;;  %v7325_v58 = vor.u32 %v7324_v6, %v7321_v54  ;;  %v7338_v21 = vshll.u32 %v15347_v59, 16  ;;  %v7307_v4 = vsel %vm12222_vm3, %v7302_v31, %v7306_v14  ;;  %v12055_v57 = vld [vmem:[%s16490_s0 + $0x40] sm:$0xf]  ;;  %v10184_v24 = vld [vmem:[%s16490_s0 + $0x54] sm:$0xe] }
 0x241   :  { %10874 = vmatprep.mubr.msk.bf16.mxu1 %vm993_vm4, %v11882_v8  ;;  %v7335_v26 = vor.u32 %v7334_v37, %v7330_v44  ;;  %v7317_v19 = vsel %vm12222_vm3, %v7312_v35, %v7316_v16  ;;  %v8022_v50 = vrot.slane %v12049_v15, 5  ;;  %v10144_v51 = vcombine.low %v7283_v55, %v7293_v61  ;;  %v12051_v8 = vld [vmem:[%s16490_s0 + $0x28] sm:$0xf]  ;;  %v12057_v49 = vld [vmem:[%s16490_s0 + $0x58] sm:$0xf] }
 0x242   :  { %v10145_v48 = vcombine.low %v7307_v4, %v7317_v19  ;;  %v7326_v18 = vrot.slane %v7325_v58, 4  ;;  %v7340_v23 = vrot.slane %v7338_v21, 5  ;;  %v10211_v36 = vrot.slane %v10179_v2, 9  ;;  %v12058_v35 = vld [vmem:[%s16490_s0 + $0x44] sm:$0x1] }
 0x243   :  { %v7336_v11 = vrot.slane %v7335_v26, 4  ;;  %v8024_v32 = vrot.slane %v8022_v50, 4  ;;  %v8025_v47 = vrot.slane %v12050_v30, 5  ;;  %v8029_v45 = vrot.slane %v12051_v8, 5  ;;  %v12059_v58 = vld [vmem:[%s16490_s0 + $0x50] sm:$0x1] }
 0x244   :  { %v7331_v56 = vsel %vm12222_vm3, %v7326_v18, %v7330_v44  ;;  %v8036_v14 = vrot.slane %v12052_v1, 5  ;;  %v8023_v38 = vsel %vm12867_vm7, %v10211_v36, %v8022_v50  ;;  %v10212_v52 = vrot.slane %v10180_v7, 9  ;;  %v12060_v19 = vld [vmem:[%s16490_s0 + $0x5c] sm:$0x1]  ;;  %v10185_v50 = vld [vmem:[%s16490_s0 + $0x60] sm:$0xe] }
 0x245   :  { %v7341_v17 = vsel %vm12222_vm3, %v7336_v11, %v7340_v23  ;;  %v8026_v9 = vsel %vm12867_vm7, %v8024_v32, %v8025_v47  ;;  %v8031_v22 = vrot.slane %v8029_v45, 4  ;;  %v8032_v28 = vrot.slane %v12053_v12, 5  ;;  %v12061_v2 = vld [vmem:[%s16490_s0 + $0x64] sm:$0xf]  ;;  %v9665_v18 = vld [vmem:[%s16490_s0 + $0x12c] sm:$0xf] }
 0x246   :  { %v10146_v20 = vcombine.low %v7331_v56, %v7341_v17  ;;  %v10213_v5 = vrot.slane %v10181_v10, 9  ;;  %v10244_v27 = vcombine.low %v8023_v38, %v8026_v9  ;;  %v8038_v53 = vrot.slane %v8036_v14, 4  ;;  %v11889_v11 = vld [vmem:[%s16490_s0 + $0x138] sm:$0xff]   ;;  %v10186_v32 = vld [vmem:[%s16490_s0 + $0x6c] sm:$0xe]  ;;  %v11890_v7 = vld [vmem:[%s16490_s0 + $0x144] sm:$0xff]  }
 0x247   :  { %11159 = vmatmul.mubr.msk.bf16.gmra.mrb[52].mxu0 %vm993_vm4, %v10142_v46  ;;  %v8039_v3 = vrot.slane %v12054_v43, 5  ;;  %v8043_v60 = vrot.slane %v12055_v57, 5  ;;  %v10183_v46 = vld [vmem:[%s16490_s0 + $0x48] sm:$0xe]  ;;  %v8030_v54 = vsel %vm12867_vm7, %v10212_v52, %v8029_v45  ;;  %v8033_v6 = vsel %vm12867_vm7, %v8031_v22, %v8032_v28  ;;  %v12062_v30 = vld [vmem:[%s16490_s0 + $0x70] sm:$0xf] }
 0x248   :  { %10875 = vmatmul.mubr.msk.bf16.gmra.mrb[32].mxu1 %vm993_vm4, %v11883_v34  ;;  %11162 = vmatprep.mubr.msk.bf16.mxu0 %vm993_vm4, %v10143_v25  ;;  %v12056_v25 = vld [vmem:[%s16490_s0 + $0x4c] sm:$0xf]  ;;  %v8057_v34 = vrot.slane %v12057_v49, 5  ;;  %v8037_v44 = vsel %vm12867_vm7, %v10213_v5, %v8036_v14  ;;  %v10214_v37 = vrot.slane %v10182_v63, 9  ;;  %v8046_v16 = vrot.slane %v12058_v35, 5 }
 0x249   :  { %10878 = vmatprep.mubr.msk.bf16.mxu1 %vm993_vm4, %v11884_v62  ;;  %v8050_v39 = vrot.slane %v12056_v25, 5  ;;  %v8040_v62 = vsel %vm12867_vm7, %v8038_v53, %v8039_v3  ;;  %v8045_v31 = vrot.slane %v8043_v60, 4  ;;  %v10215_v55 = vrot.slane %v10183_v46, 9  ;;  %v12063_v17 = vld [vmem:[%s16490_s0 + $0x68] sm:$0x1] }
 0x24a   :  { %v8053_v26 = vrot.slane %v12059_v58, 5  ;;  %v10216_v21 = vrot.slane %v10184_v24, 9  ;;  %v8059_v4 = vrot.slane %v8057_v34, 4  ;;  %v8060_v15 = vrot.slane %v12060_v19, 5  ;;  %v10187_v38 = vld [vmem:[%s16490_s0 + $0x78] sm:$0xe] }
 0x24b   :  { %v8052_v61 = vrot.slane %v8050_v39, 4  ;;  %v15466_v23 = vsel %vm12867_vm7, %v10214_v37, %v8043_v60  ;;  %v15474_v36 = vsel %vm12867_vm7, %v10215_v55, %v8050_v39  ;;  %v8071_v47 = vrot.slane %v12062_v30, 5  ;;  %v12064_v12 = vld [vmem:[%s16490_s0 + $0x7c] sm:$0xf]  ;;  %v12065_v5 = vld [vmem:[%s16490_s0 + $0x88] sm:$0xf] }
 0x24c   :  { %v15491_v45 = vsel %vm12867_vm7, %v10216_v21, %v8057_v34  ;;  %v10217_v56 = vrot.slane %v10185_v50, 9  ;;  %v8067_v10 = vrot.slane %v12063_v17, 5  ;;  %v15498_v1 = vsel %vm12867_vm7, %v8059_v4, %v8060_v15  ;;  %v12066_v53 = vld [vmem:[%s16490_s0 + $0x74] sm:$0x1]  ;;  %v10188_v3 = vld [vmem:[%s16490_s0 + $0x84] sm:$0xe] }
 0x24d   :  { %v15487_v8 = vsel %vm12867_vm7, %v8052_v61, %v8053_v26  ;;  %v4108_v9 = vshrl.u32 %v9665_v18, 16  ;;  %v4111_v52 = vshll.u32 %v9665_v18, 16  ;;  %v10218_v22 = vrot.slane %v10186_v32, 9  ;;  %v12067_v63 = vld [vmem:[%s16490_s0 + $0x130] sm:$0xf]  ;;  %v11892_v61 = vld [vmem:[%s16490_s0 + $0x15c] sm:$0xff]  }
 0x24e   :  { %v8078_v28 = vrot.slane %v12064_v12, 5  ;;  %v8074_v43 = vrot.slane %v12066_v53, 5  ;;  %v4117_v57 = vshll.u32 %v12067_v63, 16  ;;  %v4121_v60 = vshrl.u32 %v12067_v63, 16  ;;  %v12068_v49 = vld [vmem:[%s16490_s0 + $0x80] sm:$0x1] }
 0x24f   :  { %11163 = vmatmul.mubr.msk.bf16.gmra.mrb[56].mxu0 %vm993_vm4, %v10144_v51  ;;  %v8064_v51 = vrot.slane %v12061_v2, 5  ;;  %v10249_v46 = vcombine.low %v15491_v45, %v15498_v1  ;;  %v10219_v39 = vrot.slane %v10187_v38, 9  ;;  %v8081_v34 = vrot.slane %v12068_v49, 5  ;;  %v12069_v35 = vld [vmem:[%s16490_s0 + $0x8c] sm:$0x1]  ;;  %v11891_v55 = vld [vmem:[%s16490_s0 + $0x150] sm:$0xff]  }
 0x250   :  { %10879 = vmatmul.mubr.msk.bf16.gmra.mrb[36].mxu1 %vm993_vm4, %v11885_v40  ;;  %11166 = vmatprep.mubr.msk.bf16.mxu0 %vm993_vm4, %v10145_v48  ;;  %v10245_v40 = vcombine.low %v8030_v54, %v8033_v6  ;;  %v10246_v48 = vcombine.low %v8037_v44, %v8040_v62  ;;  %v4110_v54 = vrot.slane %v4108_v9, 4  ;;  %v4113_v6 = vrot.slane %v4111_v52, 5  ;;  %v9671_v44 = vld [vmem:[%s16490_s0 + $0x144] sm:$0xf]  ;;  %v10189_v19 = vld [vmem:[%s16490_s0 + $0x90] sm:$0xe] }
 0x251   :  { %10882 = vmatprep.mubr.msk.bf16.mxu1 %vm993_vm4, %v11886_v13  ;;  %v15470_v13 = vsel %vm12867_vm7, %v8045_v31, %v8046_v16  ;;  %v8066_v14 = vrot.slane %v8064_v51, 4  ;;  %v15530_v25 = vsel %vm12867_vm7, %v10217_v56, %v8064_v51  ;;  %v8080_v37 = vrot.slane %v8078_v28, 4  ;;  %v12070_v2 = vld [vmem:[%s16490_s0 + $0x148] sm:$0xf]  ;;  %v12072_v56 = vld [vmem:[%s16490_s0 + $0x134] sm:$0x1] }
 0x252   :  { %v10220_v62 = vrot.slane %v10188_v3, 9  ;;  %v8088_v16 = vrot.slane %v12069_v35, 5  ;;  %v15553_v58 = vsel %vm12867_vm7, %v10218_v22, %v8071_v47  ;;  %v15559_v21 = vrot.slane %v4117_v57, 5  ;;  %v9674_v9 = vld [vmem:[%s16490_s0 + $0x150] sm:$0xf] }
 0x253   :  { %v15534_v24 = vsel %vm12867_vm7, %v8066_v14, %v8067_v10  ;;  %v4123_v4 = vrot.slane %v4121_v60, 4  ;;  %v4156_v15 = vshrl.u32 %v9671_v44, 16  ;;  %v4159_v50 = vshll.u32 %v9671_v44, 16  ;;  %v12073_v14 = vld [vmem:[%s16490_s0 + $0xa0] sm:$0xf]  ;;  %v11893_v60 = vld [vmem:[%s16490_s0 + $0x168] sm:$0xff]  }
 0x254   :  { %v4165_v51 = vshll.u32 %v12070_v2, 16  ;;  %v15571_v18 = vsel %vm12867_vm7, %v10219_v39, %v8078_v28  ;;  %v15581_v32 = vsel %vm12867_vm7, %v8080_v37, %v8081_v34  ;;  %v4127_v17 = vshll.u32 %v12072_v56, 16  ;;  %v12075_v39 = vld [vmem:[%s16490_s0 + $0xa4] sm:$0x1]  ;;  %v12076_v49 = vld [vmem:[%s16490_s0 + $0xac] sm:$0xf] }
 0x255   :  { %v10221_v10 = vrot.slane %v10189_v19, 9  ;;  %v8099_v38 = vrot.slane %v12073_v14, 5  ;;  %v4158_v52 = vrot.slane %v4156_v15, 4  ;;  %v4180_v63 = vshrl.u32 %v9674_v9, 16  ;;  %v10191_v35 = vld [vmem:[%s16490_s0 + $0xa8] sm:$0xe] }
 0x256   :  { %v15607_v22 = vrot.slane %v4165_v51, 5  ;;  %v4183_v57 = vshll.u32 %v9674_v9, 16  ;;  %v8106_v34 = vrot.slane %v12076_v49, 5  ;;  %v9677_v51 = vld [vmem:[%s16490_s0 + $0x15c] sm:$0xf]  ;;  %v10223_v1 = vrot.slane %v10191_v35, 9 }
 0x257   :  { %11167 = vmatmul.mubr.msk.bf16.gmra.mrb[60].mxu0 %vm993_vm4, %v10146_v20  ;;  %v10247_v20 = vcombine.low %v15466_v23, %v15470_v13  ;;  %v12071_v23 = vld [vmem:[%s16490_s0 + $0x94] sm:$0xf]  ;;  %v4182_v19 = vrot.slane %v4180_v63, 4  ;;  %v4207_v56 = vshll.u32 %v9677_v51, 16  ;;  %v11896_v63 = vld [vmem:[%s16490_s0 + $0x18c] sm:$0xff]  }
 0x258   :  { %10883 = vmatmul.mubr.msk.bf16.gmra.mrb[40].mxu1 %vm993_vm4, %v11887_v33  ;;  %11172 = vmatprep.mubr.msk.bf16.mxu0 %vm993_vm4, %v10244_v27  ;;  %v8085_v33 = vrot.slane %v12065_v5, 5  ;;  %v8073_v27 = vrot.slane %v8071_v47, 4  ;;  %v8092_v13 = vrot.slane %v12071_v23, 5  ;;  %v4185_v15 = vrot.slane %v4183_v57, 5  ;;  %v9680_v49 = vld [vmem:[%s16490_s0 + $0x168] sm:$0xf] }
 0x259   :  { %10886 = vmatprep.mubr.msk.bf16.mxu1 %vm993_vm4, %v11888_v42  ;;  %v10248_v42 = vcombine.low %v15474_v36, %v15487_v8  ;;  %v4124_v8 = vor.u32 %v4123_v4, %v15559_v21 }
 0x25a   :  { %v8087_v31 = vrot.slane %v8085_v33, 4  ;;  %v15557_v26 = vsel %vm12867_vm7, %v8073_v27, %v8074_v43  ;;  %v15585_v30 = vsel %vm12867_vm7, %v10220_v62, %v8085_v33  ;;  %v8094_v5 = vrot.slane %v8092_v13, 4  ;;  %v12074_v33 = vld [vmem:[%s16490_s0 + $0x98] sm:$0x1]  ;;  %v12077_v62 = vld [vmem:[%s16490_s0 + $0x14c] sm:$0x1] }
 0x25b   :  { %v10251_v36 = vcombine.low %v15553_v58, %v15557_v26  ;;  %v8095_v27 = vrot.slane %v12074_v33, 5  ;;  %v10252_v43 = vcombine.low %v15571_v18, %v15581_v32  ;;  %v4186_v9 = vor.u32 %v4185_v15, %v4182_v19  ;;  %v10193_v58 = vld [vmem:[%s16490_s0 + $0xc0] sm:$0xe]  ;;  %v12083_v26 = vld [vmem:[%s16490_s0 + $0xc4] sm:$0xf] }
 0x25c   :  { %v15589_v47 = vsel %vm12867_vm7, %v8087_v31, %v8088_v16  ;;  %v4175_v31 = vshll.u32 %v12077_v62, 16  ;;  %v15688_v33 = vsel %vm12867_vm7, %v10223_v1, %v8106_v34  ;;  %v4231_v19 = vshll.u32 %v9680_v49, 16  ;;  %v12084_v18 = vld [vmem:[%s16490_s0 + $0xbc] sm:$0x1]  ;;  %v12086_v1 = vld [vmem:[%s16490_s0 + $0x164] sm:$0x1] }
 0x25d   :  { %v10253_v3 = vcombine.low %v15585_v30, %v15589_v47  ;;  %v8116_v32 = vrot.slane %v12084_v18, 5 }
 0x25f   :  { %11173 = vmatmul.mubr.msk.bf16.vlgmr.msra.gmra.mrb[0].mxu0 %vm993_vm4, %v10245_v40  ;;  %v4169_v40 = vshrl.u32 %v12070_v2, 16 }
 0x260   :  { %10887 = vmatmul.mubr.msk.bf16.gmra.mrb[44].mxu1 %vm993_vm4, %v11889_v11  ;;  %11176 = vmatprep.mubr.msk.bf16.mxu0 %vm993_vm4, %v10246_v48  ;;  %v10250_v48 = vcombine.low %v15530_v25, %v15534_v24  ;;  %v4114_v11 = vor.u32 %v4113_v6, %v4110_v54  ;;  %v4129_v25 = vrot.slane %v4127_v17, 5  ;;  %v8102_v24 = vrot.slane %v12075_v39, 5  ;;  %v11894_v54 = vld [vmem:[%s16490_s0 + $0x174] sm:$0xff]   ;;  %v12080_v17 = vld [vmem:[%s16490_s0 + $0x160] sm:$0xf] }
 0x261   :  { %10890 = vmatprep.mubr.msk.bf16.mxu1 %vm993_vm4, %v11890_v7  ;;  %v10190_v7 = vld [vmem:[%s16490_s0 + $0x9c] sm:$0xe]  ;;  %v4171_v12 = vrot.slane %v4169_v40, 4  ;;  %v8101_v6 = vrot.slane %v8099_v38, 4  ;;  %v12079_v40 = vld [vmem:[%s16490_s0 + $0xb0] sm:$0x1] }
 0x262   :  { %v4115_v28 = vrot.slane %v4114_v11, 4  ;;  %v10222_v53 = vrot.slane %v10190_v7, 9  ;;  %v8109_v11 = vrot.slane %v12079_v40, 5  ;;  %v4217_v14 = vshrl.u32 %v12080_v17, 16  ;;  %v12082_v39 = vld [vmem:[%s16490_s0 + $0xb8] sm:$0xf] }
 0x263   :  { %v4172_v37 = vor.u32 %v4171_v12, %v15607_v22  ;;  %v15670_v23 = vsel %vm12867_vm7, %v8101_v6, %v8102_v24  ;;  %v11895_v12 = vld [vmem:[%s16490_s0 + $0x180] sm:$0xff]   ;;  %v8113_v24 = vrot.slane %v12082_v39, 5  ;;  %v9683_v40 = vld [vmem:[%s16490_s0 + $0x174] sm:$0xf] }
 0x264   :  { %v4120_v16 = vsel %vm12222_vm3, %v4115_v28, %v15559_v21  ;;  %v15648_v4 = vsel %vm12867_vm7, %v10222_v53, %v8099_v38  ;;  %v12078_v21 = vld [vmem:[%s16490_s0 + $0x154] sm:$0xf]  ;;  %v4219_v6 = vrot.slane %v4217_v14, 4 }
 0x265   :  { %v4193_v2 = vshrl.u32 %v12078_v21, 16  ;;  %v4173_v7 = vrot.slane %v4172_v37, 4  ;;  %v10192_v53 = vld [vmem:[%s16490_s0 + $0xb4] sm:$0xe]  ;;  %v15722_v37 = vrot.slane %v4186_v9, 4  ;;  %v4233_v9 = vrot.slane %v4231_v19, 5 }
 0x267   :  { %11177 = vmatmul.mubr.msk.bf16.gmra.mrb[4].mxu0 %vm993_vm4, %v10247_v20  ;;  %v4161_v20 = vrot.slane %v4159_v50, 5  ;;  %v4189_v50 = vshll.u32 %v12078_v21, 16 }
 0x268   :  { %10891 = vmatmul.mubr.msk.bf16.gmra.mrb[48].mxu1 %vm993_vm4, %v11891_v55  ;;  %11180 = vmatprep.mubr.msk.bf16.mxu0 %vm993_vm4, %v10248_v42  ;;  %v4125_v42 = vrot.slane %v4124_v8, 4  ;;  %v15640_v55 = vsel %vm12867_vm7, %v10221_v10, %v8092_v13  ;;  %v4177_v8 = vrot.slane %v4175_v31, 5  ;;  %v4213_v10 = vshll.u32 %v12080_v17, 16  ;;  %v12087_v17 = vld [vmem:[%s16490_s0 + $0xc8] sm:$0x1] }
 0x269   :  { %10894 = vmatprep.mubr.msk.bf16.mxu1 %vm993_vm4, %v11892_v61  ;;  %v4162_v44 = vor.u32 %v4161_v20, %v4158_v52  ;;  %v15644_v61 = vsel %vm12867_vm7, %v8094_v5, %v8095_v27  ;;  %v15677_v52 = vrot.slane %v4189_v50, 5  ;;  %v4195_v20 = vrot.slane %v4193_v2, 4 }
 0x26a   :  { %v4130_v45 = vsel %vm12222_vm3, %v4125_v42, %v4129_v25  ;;  %v10254_v38 = vcombine.low %v15640_v55, %v15644_v61  ;;  %v10255_v5 = vcombine.low %v15648_v4, %v15670_v23  ;;  %v12081_v42 = vld [vmem:[%s16490_s0 + $0x158] sm:$0x1]  ;;  %v10224_v31 = vrot.slane %v10192_v53, 9  ;;  %v12090_v55 = vld [vmem:[%s16490_s0 + $0xd0] sm:$0xf] }
 0x26b   :  { %v4163_v13 = vrot.slane %v4162_v44, 4  ;;  %v15682_v28 = vcombine.low %v4120_v16, %v4130_v45  ;;  %v4199_v25 = vshll.u32 %v12081_v42, 16  ;;  %v4196_v62 = vor.u32 %v4195_v20, %v15677_v52  ;;  %v12095_v4 = vld [vmem:[%s16490_s0 + $0xf8] sm:$0x1] }
 0x26c   :  { %v4228_v16 = vshrl.u32 %v9680_v49, 16  ;;  %v8115_v2 = vrot.slane %v8113_v24, 4  ;;  %v4252_v53 = vshrl.u32 %v9683_v40, 16  ;;  %v8127_v61 = vrot.slane %v12090_v55, 5 }
 0x26d   :  { %v4168_v57 = vsel %vm12222_vm3, %v4163_v13, %v15607_v22  ;;  %v15714_v22 = vrot.slane %v4213_v10, 5  ;;  %v4201_v15 = vrot.slane %v4199_v25, 5  ;;  %v4197_v13 = vrot.slane %v4196_v62, 4 }
 0x26e   :  { %v8123_v10 = vrot.slane %v12087_v17, 5  ;;  %v4230_v14 = vrot.slane %v4228_v16, 4  ;;  %v9686_v16 = vld [vmem:[%s16490_s0 + $0x180] sm:$0xf]  ;;  %v12094_v17 = vld [vmem:[%s16490_s0 + $0x184] sm:$0xf] }
 0x26f   :  { %11181 = vmatmul.mubr.msk.bf16.gmra.mrb[8].mxu0 %vm993_vm4, %v10249_v46  ;;  %v8108_v46 = vrot.slane %v8106_v34, 4  ;;  %v4220_v45 = vor.u32 %v4219_v6, %v15714_v22  ;;  %v4202_v39 = vsel %vm12222_vm3, %v4197_v13, %v4201_v15  ;;  %v12093_v13 = vld [vmem:[%s16490_s0 + $0x17c] sm:$0x1]  ;;  %v8137_v23 = vrot.slane %v12095_v4, 5 }
 0x270   :  { %10895 = vmatmul.mubr.msk.bf16.gmra.mrb[52].mxu1 %vm993_vm4, %v11893_v60  ;;  %11184 = vmatprep.mubr.msk.bf16.mxu0 %vm993_vm4, %v10250_v48  ;;  %v4204_v48 = vshrl.u32 %v9677_v51, 16  ;;  %v4178_v60 = vsel %vm12222_vm3, %v4173_v7, %v4177_v8  ;;  %v15758_v7 = vsel %vm12867_vm7, %v10224_v31, %v8113_v24  ;;  %v10225_v8 = vrot.slane %v10193_v58, 9  ;;  %v12088_v24 = vld [vmem:[%s16490_s0 + $0x170] sm:$0x1] }
 0x271   :  { %10898 = vmatprep.mubr.msk.bf16.mxu1 %vm993_vm4, %v11894_v54  ;;  %v15692_v27 = vsel %vm12867_vm7, %v8108_v46, %v8109_v11  ;;  %v4209_v54 = vrot.slane %v4207_v56, 5  ;;  %v15730_v35 = vcombine.low %v4168_v57, %v4178_v60  ;;  %v4223_v46 = vshll.u32 %v12086_v1, 16  ;;  %v9689_v1 = vld [vmem:[%s16490_s0 + $0x18c] sm:$0xf] }
 0x272   :  { %v4206_v34 = vrot.slane %v4204_v48, 4  ;;  %v10256_v44 = vcombine.low %v15688_v33, %v15692_v27  ;;  %v4192_v11 = vsel %vm12222_vm3, %v15722_v37, %v15677_v52  ;;  %v11897_v48 = vld [vmem:[%s16490_s0 + $0x198] sm:$0xff]   ;;  %v15773_v57 = vsel %vm12867_vm7, %v8115_v2, %v8116_v32 }
 0x273   :  { %v15777_v42 = vrot.slane %v4220_v45, 4  ;;  %v15779_v25 = vrot.slane %v4223_v46, 5  ;;  %v4247_v49 = vshll.u32 %v12088_v24, 16  ;;  %v15812_v58 = vcombine.low %v4192_v11, %v4202_v39 }
 0x274   :  { %v4210_v51 = vor.u32 %v4209_v54, %v4206_v34  ;;  %v12089_v34 = vld [vmem:[%s16490_s0 + $0x178] sm:$0xf] }
 0x275   :  { %v4261_v54 = vshll.u32 %v12089_v34, 16  ;;  %v4265_v6 = vshrl.u32 %v12089_v34, 16  ;;  %v4249_v15 = vrot.slane %v4247_v49, 5 }
 0x276   :  { %v15775_v60 = vrot.slane %v4210_v51, 4  ;;  %v12092_v51 = vld [vmem:[%s16490_s0 + $0xf4] sm:$0xf] }
 0x277   :  { %11185 = vmatmul.mubr.msk.bf16.gmra.mrb[12].mxu0 %vm993_vm4, %v10251_v36  ;;  %v8120_v36 = vrot.slane %v12083_v26, 5  ;;  %v10257_v26 = vcombine.low %v15758_v7, %v15773_v57  ;;  %v15829_v18 = vrot.slane %v4261_v54, 5  ;;  %v4267_v32 = vrot.slane %v4265_v6, 4  ;;  %v10197_v57 = vld [vmem:[%s16490_s0 + $0x108] sm:$0xe] }
 0x278   :  { %10899 = vmatmul.mubr.msk.bf16.gmra.mrb[56].mxu1 %vm993_vm4, %v11895_v12  ;;  %11188 = vmatprep.mubr.msk.bf16.mxu0 %vm993_vm4, %v10252_v43  ;;  %v12085_v43 = vld [vmem:[%s16490_s0 + $0x16c] sm:$0xf]  ;;  %v8134_v45 = vrot.slane %v12092_v51, 5  ;;  %v12099_v51 = vld [vmem:[%s16490_s0 + $0x194] sm:$0x1] }
 0x279   :  { %10902 = vmatprep.mubr.msk.bf16.mxu1 %vm993_vm4, %v11896_v63  ;;  %v4237_v21 = vshll.u32 %v12085_v43, 16  ;;  %v4241_v50 = vshrl.u32 %v12085_v43, 16  ;;  %v8122_v56 = vrot.slane %v8120_v36, 4  ;;  %v10194_v12 = vld [vmem:[%s16490_s0 + $0xcc] sm:$0xe]  ;;  %v4255_v63 = vshll.u32 %v9683_v40, 16 }
 0x27a   :  { %v15800_v30 = vsel %vm12867_vm7, %v10225_v8, %v8120_v36  ;;  %v10226_v37 = vrot.slane %v10194_v12, 9  ;;  %v4216_v36 = vsel %vm12222_vm3, %v15775_v60, %v15714_v22  ;;  %v10195_v22 = vld [vmem:[%s16490_s0 + $0xf0] sm:$0xe]  ;;  %v8129_v40 = vrot.slane %v8127_v61, 4 }
 0x27b   :  { %v15766_v20 = vrot.slane %v4237_v21, 5  ;;  %v4243_v52 = vrot.slane %v4241_v50, 4  ;;  %v15804_v47 = vsel %vm12867_vm7, %v8122_v56, %v8123_v10  ;;  %v4257_v31 = vrot.slane %v4255_v63, 5  ;;  %v12091_v50 = vld [vmem:[%s16490_s0 + $0xd4] sm:$0x1] }
 0x27c   :  { %v10258_v19 = vcombine.low %v15800_v30, %v15804_v47  ;;  %v15836_v21 = vsel %vm12867_vm7, %v10226_v37, %v8127_v61  ;;  %v8130_v2 = vrot.slane %v12091_v50, 5  ;;  %v4271_v8 = vshll.u32 %v12093_v13, 16  ;;  %v12101_v30 = vld [vmem:[%s16490_s0 + $0x19c] sm:$0xf] }
 0x27d   :  { %v4244_v62 = vor.u32 %v4243_v52, %v15766_v20  ;;  %v4279_v56 = vshll.u32 %v9686_v16, 16  ;;  %v4285_v10 = vshll.u32 %v12094_v17, 16  ;;  %v10227_v52 = vrot.slane %v10195_v22, 9 }
 0x27e   :  { %v4300_v12 = vshrl.u32 %v9689_v1, 16  ;;  %v8136_v63 = vrot.slane %v8134_v45, 4  ;;  %v15879_v27 = vsel %vm12867_vm7, %v8129_v40, %v8130_v2  ;;  %v4273_v54 = vrot.slane %v4271_v8, 5 }
 0x27f   :  { %11189 = vmatmul.mubr.msk.bf16.gmra.mrb[16].mxu0 %vm993_vm4, %v10253_v3  ;;  %v4234_v3 = vor.u32 %v4233_v9, %v4230_v14  ;;  %v4245_v46 = vrot.slane %v4244_v62, 4  ;;  %v4289_v14 = vshrl.u32 %v12094_v17, 16  ;;  %v4268_v9 = vor.u32 %v4267_v32, %v15829_v18 }
 0x280   :  { %10903 = vmatmul.mubr.msk.bf16.gmra.mrb[60].mxu1 %vm993_vm4, %v11897_v48  ;;  %11192 = vmatprep.mubr.msk.bf16.mxu0 %vm993_vm4, %v10254_v38  ;;  %v4254_v38 = vrot.slane %v4252_v53, 4  ;;  %v4276_v48 = vshrl.u32 %v9686_v16, 16  ;;  %v4303_v53 = vshll.u32 %v9689_v1, 16  ;;  %v4281_v39 = vrot.slane %v4279_v56, 5  ;;  %v12102_v56 = vld [vmem:[%s16490_s0 + $0x104] sm:$0x1] }
 0x281   :  { %10952 = vmatprep.mubr.msk.bf16.mxu1 %vm993_vm4, %v15682_v28  ;;  %v4226_v28 = vsel %vm12222_vm3, %v15777_v42, %v15779_v25  ;;  %v4235_v43 = vrot.slane %v4234_v3, 4  ;;  %v4250_v33 = vsel %vm12222_vm3, %v4245_v46, %v4249_v15  ;;  %v15881_v24 = vrot.slane %v4285_v10, 5  ;;  %v9692_v15 = vld [vmem:[%s16490_s0 + $0x198] sm:$0xf] }
 0x282   :  { %v4258_v11 = vor.u32 %v4257_v31, %v4254_v38  ;;  %v4278_v25 = vrot.slane %v4276_v48, 4  ;;  %v4291_v49 = vrot.slane %v4289_v14, 4  ;;  %v4269_v34 = vrot.slane %v4268_v9, 4  ;;  %v12097_v31 = vld [vmem:[%s16490_s0 + $0x188] sm:$0x1] }
 0x283   :  { %v4305_v6 = vrot.slane %v4303_v53, 5  ;;  %v15889_v3 = vsel %vm12867_vm7, %v8136_v63, %v8137_v23  ;;  %v9722_v55 = vcombine.low %v4216_v36, %v4226_v28  ;;  %v10259_v38 = vcombine.low %v15836_v21, %v15879_v27  ;;  %v10196_v28 = vld [vmem:[%s16490_s0 + $0xfc] sm:$0xe] }
 0x284   :  { %v4295_v16 = vshll.u32 %v12097_v31, 16  ;;  %v4282_v22 = vor.u32 %v4281_v39, %v4278_v25  ;;  %v4292_v36 = vor.u32 %v4291_v49, %v15881_v24  ;;  %v4324_v46 = vshrl.u32 %v9692_v15, 16 }
 0x285   :  { %v4327_v40 = vshll.u32 %v9692_v15, 16  ;;  %v4333_v47 = vshll.u32 %v12101_v30, 16  ;;  %v8144_v17 = vrot.slane %v12102_v56, 5  ;;  %v10229_v9 = vrot.slane %v10197_v57, 9 }
 0x286   :  { %v4283_v13 = vrot.slane %v4282_v22, 4  ;;  %v4293_v8 = vrot.slane %v4292_v36, 4  ;;  %v4326_v4 = vrot.slane %v4324_v46, 4  ;;  %v12109_v46 = vld [vmem:[%s16490_s0 + $0x130] sm:$0xf] }
 0x287   :  { %11193 = vmatmul.mubr.msk.bf16.gmra.mrb[20].mxu0 %vm993_vm4, %v10255_v5  ;;  %v12096_v5 = vld [vmem:[%s16490_s0 + $0x190] sm:$0xf]  ;;  %v4329_v23 = vrot.slane %v4327_v40, 5  ;;  %v8169_v40 = vrot.slane %v12109_v46, 5 }
 0x288   :  { %10953 = vmatmul.mubr.msk.bf16.vlgmr.msra.gmra.mrb[44].mxu1 %vm993_vm4, %v15066_v41  ;;  %11196 = vmatprep.mubr.msk.bf16.mxu0 %vm993_vm4, %v10256_v44  ;;  %v4309_v60 = vshll.u32 %v12096_v5, 16  ;;  %v4313_v42 = vshrl.u32 %v12096_v5, 16  ;;  %v4240_v41 = vsel %vm12222_vm3, %v4235_v43, %v15766_v20  ;;  %v4259_v44 = vrot.slane %v4258_v11, 4  ;;  %v12098_v43 = vld [vmem:[%s16490_s0 + $0x100] sm:$0xf] }
 0x289   :  { %10956 = vmatprep.mubr.msk.bf16.mxu1 %vm993_vm4, %v15730_v35  ;;  %v4302_v35 = vrot.slane %v4300_v12, 4  ;;  %v15885_v20 = vsel %vm12867_vm7, %v10227_v52, %v8134_v45  ;;  %v9723_v61 = vcombine.low %v4240_v41, %v4250_v33  ;;  %v8141_v21 = vrot.slane %v12098_v43, 5  ;;  %v12103_v52 = vld [vmem:[%s16490_s0 + $0x110] sm:$0x1]  ;;  %v12107_v43 = vld [vmem:[%s16490_s0 + $0x11c] sm:$0x1] }
 0x28a   :  { %v15891_v37 = vrot.slane %v4309_v60, 5  ;;  %v4315_v62 = vrot.slane %v4313_v42, 4  ;;  %v4264_v32 = vsel %vm12222_vm3, %v4259_v44, %v15829_v18  ;;  %v4274_v18 = vsel %vm12222_vm3, %v4269_v34, %v4273_v54 }
 0x28b   :  { %v10260_v50 = vcombine.low %v15885_v20, %v15889_v3  ;;  %v4306_v2 = vor.u32 %v4305_v6, %v4302_v35  ;;  %v4319_v45 = vshll.u32 %v12099_v51, 16  ;;  %v10228_v11 = vrot.slane %v10196_v28, 9  ;;  %v12105_v6 = vld [vmem:[%s16490_s0 + $0x118] sm:$0xf]  ;;  %v12108_v51 = vld [vmem:[%s16490_s0 + $0x128] sm:$0x1] }
 0x28c   :  { %v4316_v7 = vor.u32 %v4315_v62, %v15891_v37  ;;  %v8143_v48 = vrot.slane %v8141_v21, 4  ;;  %v8151_v12 = vrot.slane %v12103_v52, 5  ;;  %v9724_v5 = vcombine.low %v4264_v32, %v4274_v18  ;;  %v12106_v62 = vld [vmem:[%s16490_s0 + $0x124] sm:$0xf] }
 0x28d   :  { %v4307_v10 = vrot.slane %v4306_v2, 4  ;;  %v4321_v14 = vrot.slane %v4319_v45, 5  ;;  %v4335_v60 = vrot.slane %v4333_v47, 5  ;;  %v4288_v41 = vsel %vm12222_vm3, %v4283_v13, %v15881_v24  ;;  %v12104_v24 = vld [vmem:[%s16490_s0 + $0x1a0] sm:$0x1] }
 0x28e   :  { %v4317_v53 = vrot.slane %v4316_v7, 4  ;;  %v8142_v33 = vsel %vm12867_vm7, %v10228_v11, %v8141_v21  ;;  %v8145_v27 = vsel %vm12867_vm7, %v8143_v48, %v8144_v17  ;;  %v4343_v49 = vshll.u32 %v12104_v24, 16  ;;  %v12110_v47 = vld [vmem:[%s16490_s0 + $0x13c] sm:$0xf]  ;;  %v10201_v13 = vld [vmem:[%s16490_s0 + $0x138] sm:$0xe] }
 0x28f   :  { %11197 = vmatmul.mubr.msk.bf16.gmra.mrb[24].mxu0 %vm993_vm4, %v10257_v26  ;;  %v12100_v26 = vld [vmem:[%s16490_s0 + $0x10c] sm:$0xf]  ;;  %v4312_v25 = vsel %vm12222_vm3, %v4307_v10, %v15891_v37  ;;  %v4330_v35 = vor.u32 %v4329_v23, %v4326_v4  ;;  %v8155_v20 = vrot.slane %v12105_v6, 5  ;;  %v10198_v37 = vld [vmem:[%s16490_s0 + $0x114] sm:$0xe]  ;;  %v8158_v21 = vrot.slane %v12107_v43, 5 }
 0x290   :  { %10957 = vmatmul.mubr.msk.bf16.gmra.mrb[48].mxu1 %vm993_vm4, %v15812_v58  ;;  %11200 = vmatprep.mubr.msk.bf16.mxu0 %vm993_vm4, %v10258_v19  ;;  %v8148_v1 = vrot.slane %v12100_v26, 5  ;;  %v4297_v58 = vrot.slane %v4295_v16, 5  ;;  %v4337_v19 = vshrl.u32 %v12101_v30, 16  ;;  %v4322_v34 = vsel %vm12222_vm3, %v4317_v53, %v4321_v14  ;;  %v12111_v10 = vld [vmem:[%s16490_s0 + $0x134] sm:$0x1] }
 0x291   :  { %10960 = vmatprep.mubr.msk.bf16.mxu1 %vm993_vm4, %v9722_v55  ;;  %v8162_v55 = vrot.slane %v12106_v62, 5  ;;  %v9726_v16 = vcombine.low %v4312_v25, %v4322_v34  ;;  %v4345_v32 = vrot.slane %v4343_v49, 5  ;;  %v4331_v22 = vrot.slane %v4330_v35, 4  ;;  %v12113_v23 = vld [vmem:[%s16490_s0 + $0x148] sm:$0xf] }
 0x292   :  { %v8150_v63 = vrot.slane %v8148_v1, 4  ;;  %v4339_v42 = vrot.slane %v4337_v19, 4  ;;  %v4298_v44 = vsel %vm12222_vm3, %v4293_v8, %v4297_v58  ;;  %v8149_v39 = vsel %vm12867_vm7, %v10229_v9, %v8148_v1  ;;  %v10200_v1 = vld [vmem:[%s16490_s0 + $0x12c] sm:$0xe]  ;;  %v12115_v34 = vld [vmem:[%s16490_s0 + $0x14c] sm:$0x1] }
 0x293   :  { %v9725_v31 = vcombine.low %v4288_v41, %v4298_v44  ;;  %v10230_v36 = vrot.slane %v10198_v37, 9  ;;  %v8157_v28 = vrot.slane %v8155_v20, 4  ;;  %v8164_v2 = vrot.slane %v8162_v55, 4  ;;  %v10202_v41 = vld [vmem:[%s16490_s0 + $0x144] sm:$0xe] }
 0x294   :  { %v8152_v54 = vsel %vm12867_vm7, %v8150_v63, %v8151_v12  ;;  %v4340_v3 = vor.u32 %v4339_v42, %v4335_v60  ;;  %v8165_v45 = vrot.slane %v12108_v51, 5  ;;  %v4336_v7 = vsel %vm12222_vm3, %v4331_v22, %v4335_v60  ;;  %v12112_v12 = vld [vmem:[%s16490_s0 + $0x140] sm:$0x1]  ;;  %v10203_v44 = vld [vmem:[%s16490_s0 + $0x150] sm:$0xe] }
 0x295   :  { %v10262_v15 = vcombine.low %v8149_v39, %v8152_v54  ;;  %v8156_v57 = vsel %vm12867_vm7, %v10230_v36, %v8155_v20  ;;  %v8159_v26 = vsel %vm12867_vm7, %v8157_v28, %v8158_v21  ;;  %v8176_v19 = vrot.slane %v12110_v47, 5  ;;  %v12116_v20 = vld [vmem:[%s16490_s0 + $0x158] sm:$0x1]  ;;  %v10205_v22 = vld [vmem:[%s16490_s0 + $0x168] sm:$0xe] }
 0x296   :  { %v4341_v18 = vrot.slane %v4340_v3, 4  ;;  %v8166_v30 = vsel %vm12867_vm7, %v8164_v2, %v8165_v45  ;;  %v10263_v8 = vcombine.low %v8156_v57, %v8159_v26  ;;  %v10232_v48 = vrot.slane %v10200_v1, 9  ;;  %v12120_v45 = vld [vmem:[%s16490_s0 + $0x170] sm:$0x1]  ;;  %v12121_v1 = vld [vmem:[%s16490_s0 + $0x178] sm:$0xf] }
 0x297   :  { %11201 = vmatmul.mubr.msk.bf16.gmra.mrb[28].mxu0 %vm993_vm4, %v10259_v38  ;;  %v10199_v38 = vld [vmem:[%s16490_s0 + $0x120] sm:$0xe]  ;;  %v8171_v17 = vrot.slane %v8169_v40, 4  ;;  %v8172_v14 = vrot.slane %v12111_v10, 5  ;;  %v10233_v9 = vrot.slane %v10201_v13, 9  ;;  %v8178_v52 = vrot.slane %v8176_v19, 4 }
 0x298   :  { %10961 = vmatmul.mubr.msk.bf16.gmra.mrb[52].mxu1 %vm993_vm4, %v9723_v61  ;;  %11204 = vmatprep.mubr.msk.bf16.mxu0 %vm993_vm4, %v10260_v50  ;;  %v10261_v61 = vcombine.low %v8142_v33, %v8145_v27  ;;  %v10231_v50 = vrot.slane %v10199_v38, 9  ;;  %v4346_v58 = vsel %vm12222_vm3, %v4341_v18, %v4345_v32  ;;  %v8179_v53 = vrot.slane %v12112_v12, 5  ;;  %v12114_v33 = vld [vmem:[%s16490_s0 + $0x154] sm:$0xf]  ;;  %v12119_v18 = vld [vmem:[%s16490_s0 + $0x164] sm:$0x1] }
 0x299   :  { %10964 = vmatprep.mubr.msk.bf16.mxu1 %vm993_vm4, %v9724_v5  ;;  %v9727_v56 = vcombine.low %v4336_v7, %v4346_v58  ;;  %v8170_v63 = vsel %vm12867_vm7, %v10232_v48, %v8169_v40  ;;  %v8173_v4 = vsel %vm12867_vm7, %v8171_v17, %v8172_v14  ;;  %v8183_v5 = vrot.slane %v12113_v23, 5 }
 0x29a   :  { %v8163_v11 = vsel %vm12867_vm7, %v10231_v50, %v8162_v55  ;;  %v8177_v60 = vsel %vm12867_vm7, %v10233_v9, %v8176_v19  ;;  %v8180_v42 = vsel %vm12867_vm7, %v8178_v52, %v8179_v53  ;;  %v8190_v27 = vrot.slane %v12114_v33, 5  ;;  %v12117_v55 = vld [vmem:[%s16490_s0 + $0x160] sm:$0xf]  ;;  %v12124_v9 = vld [vmem:[%s16490_s0 + $0x188] sm:$0x1] }
 0x29b   :  { %v10264_v29 = vcombine.low %v8163_v11, %v8166_v30  ;;  %v10265_v25 = vcombine.low %v8170_v63, %v8173_v4  ;;  %v10266_v39 = vcombine.low %v8177_v60, %v8180_v42  ;;  %v10234_v24 = vrot.slane %v10202_v41, 9  ;;  %v10206_v11 = vld [vmem:[%s16490_s0 + $0x174] sm:$0xe]  ;;  %v12122_v30 = vld [vmem:[%s16490_s0 + $0x184] sm:$0xf] }
 0x29c   :  { %v8185_v49 = vrot.slane %v8183_v5, 4  ;;  %v8186_v54 = vrot.slane %v12115_v34, 5  ;;  %v10235_v35 = vrot.slane %v10203_v44, 9  ;;  %v8192_v6 = vrot.slane %v8190_v27, 4  ;;  %v10207_v19 = vld [vmem:[%s16490_s0 + $0x180] sm:$0xe] }
 0x29d   :  { %v8193_v3 = vrot.slane %v12116_v20, 5  ;;  %v8184_v37 = vsel %vm12867_vm7, %v10234_v24, %v8183_v5  ;;  %v8200_v50 = vrot.slane %v12119_v18, 5  ;;  %v10237_v2 = vrot.slane %v10205_v22, 9  ;;  %v12125_v63 = vld [vmem:[%s16490_s0 + $0x190] sm:$0xf] }
 0x29e   :  { %v8187_v62 = vsel %vm12867_vm7, %v8185_v49, %v8186_v54  ;;  %v8191_v38 = vsel %vm12867_vm7, %v10235_v35, %v8190_v27  ;;  %v8207_v7 = vrot.slane %v12120_v45, 5  ;;  %v8211_v46 = vrot.slane %v12121_v1, 5  ;;  %v10208_v60 = vld [vmem:[%s16490_s0 + $0x18c] sm:$0xe]  ;;  %v12126_v42 = vld [vmem:[%s16490_s0 + $0x19c] sm:$0xf] }
 0x29f   :  { %11205 = vmatmul.mubr.msk.bf16.gmra.mrb[32].mxu0 %vm993_vm4, %v10261_v61  ;;  %v8197_v61 = vrot.slane %v12117_v55, 5  ;;  %v10267_v36 = vcombine.low %v8184_v37, %v8187_v62  ;;  %v8218_v47 = vrot.slane %v12122_v30, 5  ;;  %v10238_v48 = vrot.slane %v10206_v11, 9  ;;  %v10209_v33 = vld [vmem:[%s16490_s0 + $0x198] sm:$0xe] }
 0x2a0   :  { %10965 = vmatmul.mubr.msk.bf16.gmra.mrb[56].mxu1 %vm993_vm4, %v9725_v31  ;;  %11208 = vmatprep.mubr.msk.bf16.mxu0 %vm993_vm4, %v10262_v15  ;;  %v8194_v31 = vsel %vm12867_vm7, %v8192_v6, %v8193_v3  ;;  %v12118_v15 = vld [vmem:[%s16490_s0 + $0x16c] sm:$0xf]  ;;  %v10239_v10 = vrot.slane %v10207_v19, 9  ;;  %v8221_v52 = vrot.slane %v12124_v9, 5  ;;  %v8225_v4 = vrot.slane %v12125_v63, 5 }
 0x2a1   :  { %10968 = vmatprep.mubr.msk.bf16.mxu1 %vm993_vm4, %v9726_v16  ;;  %v10204_v16 = vld [vmem:[%s16490_s0 + $0x15c] sm:$0xe]  ;;  %v8204_v32 = vrot.slane %v12118_v15, 5  ;;  %v10268_v28 = vcombine.low %v8191_v38, %v8194_v31  ;;  %v8199_v21 = vrot.slane %v8197_v61, 4  ;;  %v8220_v14 = vrot.slane %v8218_v47, 4 }
 0x2a2   :  { %v10236_v43 = vrot.slane %v10204_v16, 9  ;;  %v8212_v12 = vsel %vm12867_vm7, %v10238_v48, %v8211_v46  ;;  %v8219_v23 = vsel %vm12867_vm7, %v10239_v10, %v8218_v47  ;;  %v8232_v41 = vrot.slane %v12126_v42, 5  ;;  %v12127_v24 = vld [vmem:[%s16490_s0 + $0x194] sm:$0x1]  ;;  %v12128_v35 = vld [vmem:[%s16490_s0 + $0x1a0] sm:$0x1] }
 0x2a3   :  { %v8206_v51 = vrot.slane %v8204_v32, 4  ;;  %v8201_v26 = vsel %vm12867_vm7, %v8199_v21, %v8200_v50  ;;  %v8205_v40 = vsel %vm12867_vm7, %v10237_v2, %v8204_v32  ;;  %v8222_v5 = vsel %vm12867_vm7, %v8220_v14, %v8221_v52  ;;  %v12129_v37 = vld [vmem:[%s16490_s0 + $0x1a8] sm:$0xf]  ;;  %v10210_v38 = vld [vmem:[%s16490_s0 + $0x1a4] sm:$0xe] }
 0x2a4   :  { %v8198_v57 = vsel %vm12867_vm7, %v10236_v43, %v8197_v61  ;;  %v10272_v44 = vcombine.low %v8219_v23, %v8222_v5  ;;  %v8228_v49 = vrot.slane %v12127_v24, 5  ;;  %v10241_v34 = vrot.slane %v10209_v33, 9 }
 0x2a5   :  { %v8208_v58 = vsel %vm12867_vm7, %v8206_v51, %v8207_v7  ;;  %v10269_v13 = vcombine.low %v8198_v57, %v8201_v26  ;;  %v8234_v54 = vrot.slane %v8232_v41, 4  ;;  %v8235_v6 = vrot.slane %v12128_v35, 5 }
 0x2a6   :  { %v8239_v62 = vrot.slane %v12129_v37, 5  ;;  %v8233_v55 = vsel %vm12867_vm7, %v10241_v34, %v8232_v41  ;;  %v10242_v15 = vrot.slane %v10210_v38, 9  ;;  %v8242_v22 = vrot.slane %v15347_v59, 5  ;;  %v11898_v34 = vld [vmem:[%s16492_s3] sm:$0xff]  }
 0x2a7   :  { %11209 = vmatmul.mubr.msk.bf16.gmra.mrb[36].mxu0 %vm993_vm4, %v10263_v8  ;;  %v10270_v8 = vcombine.low %v8205_v40, %v8208_v58  ;;  %v8236_v61 = vsel %vm12867_vm7, %v8234_v54, %v8235_v6  ;;  %v16246_v54 = vld [vmem:[%s16491_s2] ss:$0 sm:$0xff]  ;;  %v11899_v6 = vld [vmem:[%s16492_s3 + $0x8] sm:$0xff]  }
 0x2a8   :  { %10969 = vmatmul.mubr.msk.bf16.gmra.mrb[60].mxu1 %vm993_vm4, %v9727_v56  ;;  %11212 = vmatprep.mubr.msk.bf16.mxu0 %vm993_vm4, %v10264_v29  ;;  %v8213_v56 = vrot.slane %v8211_v46, 4  ;;  %v12123_v29 = vld [vmem:[%s16490_s0 + $0x17c] sm:$0x1]  ;;  %v10274_v16 = vcombine.low %v8233_v55, %v8236_v61  ;;  %v8241_v32 = vrot.slane %v8239_v62, 4 }
 0x2a9   :  { %v8214_v17 = vrot.slane %v12123_v29, 5 }
 0x2ab   :  { %v8215_v53 = vsel %vm12867_vm7, %v8213_v56, %v8214_v17 }
 0x2ac   :  { %v10271_v27 = vcombine.low %v8212_v12, %v8215_v53 }
 0x2af   :  { %11213 = vmatmul.mubr.msk.bf16.gmra.mrb[40].mxu0 %vm993_vm4, %v10265_v25  ;;  %v10240_v25 = vrot.slane %v10208_v60, 9 }
 0x2b0   :  { %11216 = vmatprep.mubr.msk.bf16.mxu0 %vm993_vm4, %v10266_v39  ;;  %v8227_v39 = vrot.slane %v8225_v4, 4 }
 0x2b1   :  { %v8226_v20 = vsel %vm12867_vm7, %v10240_v25, %v8225_v4 }
 0x2b2   :  { %v8229_v3 = vsel %vm12867_vm7, %v8227_v39, %v8228_v49  ;;  %v12130_v49 = vmov 0.0  }
 0x2b3   :  { %v10273_v31 = vcombine.low %v8226_v20, %v8229_v3  ;;  %11236 = vmatprep.subr.bf16.mxu1 %v12130_v49  ;;  %11252 = vmatprep.mubr.msk.bf16.mxu1 %vm12131_vm8, %v12130_v49 }
 0x2b4   :  { %11237 = vmatpush3.bf16.msra.mxu1 %v11898_v34 }
 0x2b5   :  { %11238 = vmatprep.subr.bf16.mxu1 %v12130_v49 }
 0x2b7   :  { %11217 = vmatmul.mubr.msk.bf16.gmra.mrb[44].mxu0 %vm993_vm4, %v10267_v36  ;;  %v8240_v36 = vsel %vm12867_vm7, %v10242_v15, %v8239_v62 }
 0x2b8   :  { %11220 = vmatprep.mubr.msk.bf16.mxu0 %vm993_vm4, %v10268_v28  ;;  %v8243_v28 = vsel %vm12867_vm7, %v8241_v32, %v8242_v22  ;;  %11239 = vmatpush3.bf16.msra.mxu1 %v11899_v6 }
 0x2b9   :  { %v10275_v43 = vcombine.low %v8240_v36, %v8243_v28  ;;  %11240 = vmatprep.subr.bf16.mxu1 %v12130_v49 }
 0x2bf   :  { %11221 = vmatmul.mubr.msk.bf16.gmra.mrb[48].mxu0 %vm993_vm4, %v10269_v13 }
 0x2c0   :  { %11224 = vmatprep.mubr.msk.bf16.mxu0 %vm993_vm4, %v10270_v8 }
 0x2c7   :  { %11225 = vmatmul.mubr.msk.bf16.gmra.mrb[52].mxu0 %vm993_vm4, %v10271_v27 }
 0x2c8   :  { %11228 = vmatprep.mubr.msk.bf16.mxu0 %vm993_vm4, %v10272_v44 }
 0x2cf   :  { %11229 = vmatmul.mubr.msk.bf16.gmra.mrb[56].mxu0 %vm993_vm4, %v10273_v31 }
 0x2d0   :  { %11232 = vmatprep.mubr.msk.bf16.mxu0 %vm993_vm4, %v10274_v16  ;;  %v11900_v16 = vld [vmem:[%s16492_s3 + $0x10] sm:$0xff]  }
 0x2d1   :  { %11241 = vmatpush3.bf16.msra.mxu1 %v11900_v16 }
 0x2d2   :  { %11242 = vmatprep.subr.bf16.mxu1 %v12130_v49 }
 0x2d7   :  { %11233 = vmatmul.mubr.msk.bf16.gmra.mrb[60].mxu0 %vm993_vm4, %v10275_v43 }
 0x2db   :  { %v10844_v21 = vpop.f32.mrb[0].mxu1 }
 0x2dc   :  { %v3164_v18 = vpop.f32.mrb[1].mxu1 }
 0x2dd   :  { %v10845_v50 = vpop.f32.mrb[2].mxu1 }
 0x2de   :  { %v3167_v2 = vpop.f32.mrb[3].mxu1 }
 0x2e3   :  { %v16159_v51 = vpop.f32.mrb[4].mxu1 }
 0x2e4   :  { %v16161_v59 = vpop.f32.mrb[5].mxu1 }
 0x2e5   :  { %v16163_v45 = vpop.f32.mrb[6].mxu1 }
 0x2e6   :  { %v16165_v7 = vpop.f32.mrb[7].mxu1 }
 0x2eb   :  { %v16167_v57 = vpop.f32.mrb[8].mxu1 }
 0x2ec   :  { %v16169_v26 = vpop.f32.mrb[9].mxu1 }
 0x2ed   :  { %v16171_v0 = vpop.f32.mrb[10].mxu1 }
 0x2ee   :  { %v16173_v1 = vpop.f32.mrb[11].mxu1 }
 0x2f3   :  { %v16175_v46 = vpop.f32.mrb[12].mxu1 }
 0x2f4   :  { %v16177_v40 = vpop.f32.mrb[13].mxu1 }
 0x2f5   :  { %v16179_v58 = vpop.f32.mrb[14].mxu1 }
 0x2f6   :  { %v16181_v11 = vpop.f32.mrb[15].mxu1 }
 0x2fb   :  { %v16183_v30 = vpop.f32.mrb[16].mxu1 }
 0x2fc   :  { %v16185_v47 = vpop.f32.mrb[17].mxu1 }
 0x2fd   :  { %v16187_v19 = vpop.f32.mrb[18].mxu1 }
 0x2fe   :  { %v16189_v13 = vpop.f32.mrb[19].mxu1 }
 0x303   :  { %v16191_v8 = vpop.f32.mrb[20].mxu1 }
 0x304   :  { %v16193_v48 = vpop.f32.mrb[21].mxu1 }
 0x305   :  { %v16195_v56 = vpop.f32.mrb[22].mxu1 }
 0x306   :  { %v16197_v29 = vpop.f32.mrb[23].mxu1 }
 0x30b   :  { %v16199_v17 = vpop.f32.mrb[24].mxu1 }
 0x30c   :  { %v16201_v10 = vpop.f32.mrb[25].mxu1 }
 0x30d   :  { %v16203_v14 = vpop.f32.mrb[26].mxu1 }
 0x30e   :  { %v16205_v9 = vpop.f32.mrb[27].mxu1 }
 0x313   :  { %v16207_v52 = vpop.f32.mrb[28].mxu1 }
 0x314   :  { %v16209_v12 = vpop.f32.mrb[29].mxu1 }
 0x315   :  { %v16211_v53 = vpop.f32.mrb[30].mxu1 }
 0x316   :  { %v16213_v63 = vpop.f32.mrb[31].mxu1 }
 0x31b   :  { %v16215_v4 = vpop.f32.mrb[32].mxu1 }
 0x31c   :  { %v16217_v23 = vpop.f32.mrb[33].mxu1 }
 0x31d   :  { %v16219_v5 = vpop.f32.mrb[34].mxu1 }
 0x31e   :  { %v16221_v60 = vpop.f32.mrb[35].mxu1 }
 0x323   :  { %v16223_v42 = vpop.f32.mrb[36].mxu1 }
 0x324   :  { %v16225_v41 = vpop.f32.mrb[37].mxu1 }
 0x325   :  { %v16227_v33 = vpop.f32.mrb[38].mxu1 }
 0x326   :  { %v16229_v27 = vpop.f32.mrb[39].mxu1 }
 0x32b   :  { %v16231_v44 = vpop.f32.mrb[40].mxu1 }
 0x32c   :  { %v16233_v25 = vpop.f32.mrb[41].mxu1 }
 0x32d   :  { %v16235_v39 = vpop.f32.mrb[42].mxu1 }
 0x32e   :  { %v16237_v24 = vpop.f32.mrb[43].mxu1 }
 0x332   :  { %v11174_v35 = vpop.f32.mrb[0].mxu0 }
 0x333   :  { %v11278_v20 = vadd.f32 %v11174_v35, %v10844_v21  ;;  %v8475_v3 = vpop.f32.mrb[1].mxu0 }
 0x334   :  { %v11279_v37 = vadd.f32 %v8475_v3, %v3164_v18  ;;  %v11175_v62 = vpop.f32.mrb[2].mxu0 }
 0x335   :  { %v11280_v55 = vadd.f32 %v11175_v62, %v10845_v50  ;;  %v8478_v61 = vpop.f32.mrb[3].mxu0  ;;  %v8803_v15 = vadd.f32 %v11278_v20, %v16246_v54  ;;  %v11901_v50 = vld [vmem:[%s16492_s3 + $0x18] sm:$0xff]  }
 0x336   :  { %v8801_v38 = vadd.f32 %v11279_v37, %v16246_v54  ;;  %v11281_v31 = vadd.f32 %v8478_v61, %v3167_v2  ;;  %11243 = vmatpush3.bf16.msra.mxu1 %v11901_v50  ;;  %v11902_v61 = vld [vmem:[%s16492_s3 + $0x20] sm:$0xff]  }
 0x337   :  { %v8804_v36 = vadd.f32 %v11280_v55, %v16246_v54  ;;  %v8867_v2 = vmax.f32 %v8803_v15, 0.0  ;;  %11244 = vmatprep.subr.bf16.mxu1 %v12130_v49 }
 0x338   :  { %v8802_v32 = vadd.f32 %v11281_v31, %v16246_v54  ;;  %v8865_v22 = vmax.f32 %v8801_v38, 0.0 }
 0x339   :  { %v8868_v37 = vmax.f32 %v8804_v36, 0.0 }
 0x33a   :  { %v8866_v28 = vmax.f32 %v8802_v32, 0.0  ;;  %v11178_v43 = vpop.f32.mrb[4].mxu0  ;;  %11245 = vmatpush3.bf16.msra.mxu1 %v11902_v61 }
 0x33b   :  { %v11282_v21 = vadd.f32 %v11178_v43, %v16159_v51  ;;  %v8491_v18 = vpop.f32.mrb[5].mxu0  ;;  %11246 = vmatprep.subr.bf16.mxu1 %v12130_v49 }
 0x33c   :  { %v8929_v34 = vadd.f32 %v8866_v28, %v8865_v22  ;;  %v11283_v35 = vadd.f32 %v8491_v18, %v16161_v59  ;;  %v11179_v6 = vpop.f32.mrb[6].mxu0  ;;  %v11903_v28 = vld [vmem:[%s16492_s3 + $0x28] sm:$0xff]  }
 0x33d   :  { %v11284_v20 = vadd.f32 %v11179_v6, %v16163_v45  ;;  %v8494_v3 = vpop.f32.mrb[7].mxu0  ;;  %v8807_v38 = vadd.f32 %v11282_v21, %v16246_v54 }
 0x33e   :  { %v8930_v62 = vadd.f32 %v8929_v34, %v8867_v2  ;;  %v8805_v55 = vadd.f32 %v11283_v35, %v16246_v54  ;;  %v11285_v51 = vadd.f32 %v8494_v3, %v16165_v7  ;;  %11247 = vmatpush3.bf16.msra.mxu1 %v11903_v28  ;;  %v11904_v3 = vld [vmem:[%s16492_s3 + $0x30] sm:$0xff]  }
 0x33f   :  { %v8808_v15 = vadd.f32 %v11284_v20, %v16246_v54  ;;  %v8871_v43 = vmax.f32 %v8807_v38, 0.0  ;;  %11248 = vmatprep.subr.bf16.mxu1 %v12130_v49 }
 0x340   :  { %v8869_v59 = vmax.f32 %v8805_v55, 0.0  ;;  %v8931_v31 = vadd.f32 %v8930_v62, %v8868_v37  ;;  %v8806_v45 = vadd.f32 %v11285_v51, %v16246_v54 }
 0x341   :  { %v8872_v35 = vmax.f32 %v8808_v15, 0.0 }
 0x342   :  { %v8932_v16 = vadd.f32 %v8931_v31, %v8869_v59  ;;  %v8870_v32 = vmax.f32 %v8806_v45, 0.0  ;;  %v11182_v22 = vpop.f32.mrb[8].mxu0  ;;  %11249 = vmatpush3.bf16.msra.mxu1 %v11904_v3 }
 0x343   :  { %v11286_v7 = vadd.f32 %v11182_v22, %v16167_v57  ;;  %v8507_v36 = vpop.f32.mrb[9].mxu0  ;;  %11250 = vmatprep.subr.bf16.mxu1 %v12130_v49 }
 0x344   :  { %v8933_v21 = vadd.f32 %v8932_v16, %v8870_v32  ;;  %v11287_v18 = vadd.f32 %v8507_v36, %v16169_v26  ;;  %v11183_v50 = vpop.f32.mrb[10].mxu0 }
 0x345   :  { %v11288_v2 = vadd.f32 %v11183_v50, %v16171_v0  ;;  %v8510_v34 = vpop.f32.mrb[11].mxu0  ;;  %v8811_v37 = vadd.f32 %v11286_v7, %v16246_v54 }
 0x346   :  { %v8934_v6 = vadd.f32 %v8933_v21, %v8871_v43  ;;  %v8809_v20 = vadd.f32 %v11287_v18, %v16246_v54  ;;  %v11289_v57 = vadd.f32 %v8510_v34, %v16173_v1  ;;  %v11905_v1 = vld [vmem:[%s16492_s3 + $0x38] sm:$0xff]  }
 0x347   :  { %v8812_v51 = vadd.f32 %v11288_v2, %v16246_v54  ;;  %v8875_v45 = vmax.f32 %v8811_v37, 0.0  ;;  %11251 = vmatpush3.bf16.msra.mxu1 %v11905_v1 }
 0x348   :  { %v8873_v26 = vmax.f32 %v8809_v20, 0.0  ;;  %v8935_v62 = vadd.f32 %v8934_v6, %v8872_v35  ;;  %v8810_v0 = vadd.f32 %v11289_v57, %v16246_v54  ;;  %11256 = vmatprep.subr.bf16.mxu1 %v12130_v49 }
 0x349   :  { %v8876_v36 = vmax.f32 %v8812_v51, 0.0 }
 0x34a   :  { %v8936_v55 = vadd.f32 %v8935_v62, %v8873_v26  ;;  %v8874_v61 = vmax.f32 %v8810_v0, 0.0  ;;  %v11186_v38 = vpop.f32.mrb[12].mxu0 }
 0x34b   :  { %v11290_v59 = vadd.f32 %v11186_v38, %v16175_v46  ;;  %v8523_v31 = vpop.f32.mrb[13].mxu0 }
 0x34c   :  { %v8937_v16 = vadd.f32 %v8936_v55, %v8874_v61  ;;  %v11291_v15 = vadd.f32 %v8523_v31, %v16177_v40  ;;  %v11187_v32 = vpop.f32.mrb[14].mxu0 }
 0x34d   :  { %v11292_v22 = vadd.f32 %v11187_v32, %v16179_v58  ;;  %v8526_v7 = vpop.f32.mrb[15].mxu0  ;;  %v8815_v21 = vadd.f32 %v11290_v59, %v16246_v54 }
 0x34e   :  { %v8938_v28 = vadd.f32 %v8937_v16, %v8875_v45  ;;  %v8813_v43 = vadd.f32 %v11291_v15, %v16246_v54  ;;  %v11293_v46 = vadd.f32 %v8526_v7, %v16181_v11 }
 0x34f   :  { %v8816_v40 = vadd.f32 %v11292_v22, %v16246_v54  ;;  %v8879_v57 = vmax.f32 %v8815_v21, 0.0 }
 0x350   :  { %v8877_v18 = vmax.f32 %v8813_v43, 0.0  ;;  %v8939_v50 = vadd.f32 %v8938_v28, %v8876_v36  ;;  %v8814_v2 = vadd.f32 %v11293_v46, %v16246_v54 }
 0x351   :  { %v8880_v26 = vmax.f32 %v8816_v40, 0.0 }
 0x352   :  { %v8940_v34 = vadd.f32 %v8939_v50, %v8877_v18  ;;  %v8878_v58 = vmax.f32 %v8814_v2, 0.0  ;;  %v11190_v35 = vpop.f32.mrb[16].mxu0 }
 0x353   :  { %v11294_v6 = vadd.f32 %v11190_v35, %v16183_v30  ;;  %v8539_v20 = vpop.f32.mrb[17].mxu0 }
 0x354   :  { %v8941_v3 = vadd.f32 %v8940_v34, %v8878_v58  ;;  %v11295_v11 = vadd.f32 %v8539_v20, %v16185_v47  ;;  %v11191_v37 = vpop.f32.mrb[18].mxu0 }
 0x355   :  { %v11296_v62 = vadd.f32 %v11191_v37, %v16187_v19  ;;  %v8542_v0 = vpop.f32.mrb[19].mxu0  ;;  %v8819_v38 = vadd.f32 %v11294_v6, %v16246_v54 }
 0x356   :  { %v8942_v55 = vadd.f32 %v8941_v3, %v8879_v57  ;;  %v8817_v51 = vadd.f32 %v11295_v11, %v16246_v54  ;;  %v11297_v61 = vadd.f32 %v8542_v0, %v16189_v13 }
 0x357   :  { %v8820_v45 = vadd.f32 %v11296_v62, %v16246_v54  ;;  %v8883_v22 = vmax.f32 %v8819_v38, 0.0 }
 0x358   :  { %v8881_v1 = vmax.f32 %v8817_v51, 0.0  ;;  %v8943_v59 = vadd.f32 %v8942_v55, %v8880_v26  ;;  %v8818_v30 = vadd.f32 %v11297_v61, %v16246_v54 }
 0x359   :  { %v8884_v18 = vmax.f32 %v8820_v45, 0.0 }
 0x35a   :  { %v8944_v31 = vadd.f32 %v8943_v59, %v8881_v1  ;;  %v8882_v47 = vmax.f32 %v8818_v30, 0.0  ;;  %v11194_v16 = vpop.f32.mrb[20].mxu0 }
 0x35b   :  { %v16315_v15 = vpop.f32.mrb[44].mxu1  ;;  %v11298_v19 = vadd.f32 %v11194_v16, %v16191_v8  ;;  %v8555_v32 = vpop.f32.mrb[21].mxu0 }
 0x35c   :  { %v8945_v7 = vadd.f32 %v8944_v31, %v8882_v47  ;;  %v16318_v36 = vpop.f32.mrb[45].mxu1  ;;  %v11299_v13 = vadd.f32 %v8555_v32, %v16193_v48  ;;  %v11195_v28 = vpop.f32.mrb[22].mxu0 }
 0x35d   :  { %v16321_v43 = vpop.f32.mrb[46].mxu1  ;;  %v11300_v46 = vadd.f32 %v11195_v28, %v16195_v56  ;;  %v8558_v21 = vpop.f32.mrb[23].mxu0  ;;  %v8823_v34 = vadd.f32 %v11298_v19, %v16246_v54 }
 0x35e   :  { %v8946_v50 = vadd.f32 %v8945_v7, %v8883_v22  ;;  %v8821_v2 = vadd.f32 %v11299_v13, %v16246_v54  ;;  %v16325_v40 = vpop.f32.mrb[47].mxu1  ;;  %v11301_v8 = vadd.f32 %v8558_v21, %v16197_v29 }
 0x35f   :  { %v8824_v20 = vadd.f32 %v11300_v46, %v16246_v54  ;;  %v8887_v26 = vmax.f32 %v8823_v34, 0.0 }
 0x360   :  { %v8885_v58 = vmax.f32 %v8821_v2, 0.0  ;;  %v8947_v35 = vadd.f32 %v8946_v50, %v8884_v18  ;;  %v8822_v48 = vadd.f32 %v11301_v8, %v16246_v54 }
 0x361   :  { %v8888_v1 = vmax.f32 %v8824_v20, 0.0 }
 0x362   :  { %v8948_v6 = vadd.f32 %v8947_v35, %v8885_v58  ;;  %v8886_v57 = vmax.f32 %v8822_v48, 0.0  ;;  %v11198_v56 = vpop.f32.mrb[24].mxu0 }
 0x363   :  { %v16331_v3 = vpop.f32.mrb[48].mxu1  ;;  %v11302_v11 = vadd.f32 %v11198_v56, %v16199_v17  ;;  %v8571_v37 = vpop.f32.mrb[25].mxu0 }
 0x364   :  { %v8949_v62 = vadd.f32 %v8948_v6, %v8886_v57  ;;  %v16334_v0 = vpop.f32.mrb[49].mxu1  ;;  %v11303_v29 = vadd.f32 %v8571_v37, %v16201_v10  ;;  %v11199_v55 = vpop.f32.mrb[26].mxu0 }
 0x365   :  { %v16337_v51 = vpop.f32.mrb[50].mxu1  ;;  %v11304_v61 = vadd.f32 %v11199_v55, %v16203_v14  ;;  %v8574_v38 = vpop.f32.mrb[27].mxu0  ;;  %v8827_v45 = vadd.f32 %v11302_v11, %v16246_v54 }
 0x366   :  { %v8950_v59 = vadd.f32 %v8949_v62, %v8887_v26  ;;  %v8825_v30 = vadd.f32 %v11303_v29, %v16246_v54  ;;  %v16341_v31 = vpop.f32.mrb[51].mxu1  ;;  %v11305_v17 = vadd.f32 %v8574_v38, %v16205_v9 }
 0x367   :  { %v8828_v32 = vadd.f32 %v11304_v61, %v16246_v54  ;;  %v8891_v46 = vmax.f32 %v8827_v45, 0.0 }
 0x368   :  { %v8889_v47 = vmax.f32 %v8825_v30, 0.0  ;;  %v8951_v16 = vadd.f32 %v8950_v59, %v8888_v1  ;;  %v8826_v10 = vadd.f32 %v11305_v17, %v16246_v54 }
 0x369   :  { %v8892_v58 = vmax.f32 %v8828_v32, 0.0 }
 0x36a   :  { %v8952_v19 = vadd.f32 %v8951_v16, %v8889_v47  ;;  %v8890_v22 = vmax.f32 %v8826_v10, 0.0  ;;  %v11202_v14 = vpop.f32.mrb[28].mxu0 }
 0x36b   :  { %v16347_v7 = vpop.f32.mrb[52].mxu1  ;;  %v11306_v13 = vadd.f32 %v11202_v14, %v16207_v52  ;;  %v8587_v28 = vpop.f32.mrb[29].mxu0 }
 0x36c   :  { %v8953_v21 = vadd.f32 %v8952_v19, %v8890_v22  ;;  %v16350_v18 = vpop.f32.mrb[53].mxu1  ;;  %v11307_v9 = vadd.f32 %v8587_v28, %v16209_v12  ;;  %v11203_v50 = vpop.f32.mrb[30].mxu0 }
 0x36d   :  { %v16353_v2 = vpop.f32.mrb[54].mxu1  ;;  %v11308_v8 = vadd.f32 %v11203_v50, %v16211_v53  ;;  %v8590_v34 = vpop.f32.mrb[31].mxu0  ;;  %v8831_v20 = vadd.f32 %v11306_v13, %v16246_v54 }
 0x36e   :  { %v8954_v35 = vadd.f32 %v8953_v21, %v8891_v46  ;;  %v8829_v48 = vadd.f32 %v11307_v9, %v16246_v54  ;;  %v16357_v6 = vpop.f32.mrb[55].mxu1  ;;  %v11309_v52 = vadd.f32 %v8590_v34, %v16213_v63 }
 0x36f   :  { %v8832_v37 = vadd.f32 %v11308_v8, %v16246_v54  ;;  %v8895_v61 = vmax.f32 %v8831_v20, 0.0 }
 0x370   :  { %v8893_v57 = vmax.f32 %v8829_v48, 0.0  ;;  %v8955_v56 = vadd.f32 %v8954_v35, %v8892_v58  ;;  %v8830_v12 = vadd.f32 %v11309_v52, %v16246_v54 }
 0x371   :  { %v8896_v47 = vmax.f32 %v8832_v37, 0.0 }
 0x372   :  { %v8956_v11 = vadd.f32 %v8955_v56, %v8893_v57  ;;  %v8894_v26 = vmax.f32 %v8830_v12, 0.0  ;;  %v11206_v53 = vpop.f32.mrb[32].mxu0 }
 0x373   :  { %v16363_v62 = vpop.f32.mrb[56].mxu1  ;;  %v11310_v29 = vadd.f32 %v11206_v53, %v16215_v4  ;;  %v8603_v55 = vpop.f32.mrb[33].mxu0 }
 0x374   :  { %v8957_v38 = vadd.f32 %v8956_v11, %v8894_v26  ;;  %v16366_v1 = vpop.f32.mrb[57].mxu1  ;;  %v11311_v63 = vadd.f32 %v8603_v55, %v16217_v23  ;;  %v11207_v59 = vpop.f32.mrb[34].mxu0 }
 0x375   :  { %v16369_v30 = vpop.f32.mrb[58].mxu1  ;;  %v11312_v17 = vadd.f32 %v11207_v59, %v16219_v5  ;;  %v8606_v45 = vpop.f32.mrb[35].mxu0  ;;  %v8835_v22 = vadd.f32 %v11310_v29, %v16246_v54 }
 0x376   :  { %v8958_v16 = vadd.f32 %v8957_v38, %v8895_v61  ;;  %v8833_v10 = vadd.f32 %v11311_v63, %v16246_v54  ;;  %v16373_v19 = vpop.f32.mrb[59].mxu1  ;;  %v11313_v4 = vadd.f32 %v8606_v45, %v16221_v60 }
 0x377   :  { %v8836_v13 = vadd.f32 %v11312_v17, %v16246_v54  ;;  %v8899_v50 = vmax.f32 %v8835_v22, 0.0 }
 0x378   :  { %v16376_v32 = vadd.f32 %v8958_v16, %v8896_v47  ;;  %v8834_v23 = vadd.f32 %v11313_v4, %v16246_v54  ;;  %v8897_v14 = vmax.f32 %v8833_v10, 0.0 }
 0x379   :  { %v8900_v20 = vmax.f32 %v8836_v13, 0.0 }
 0x37a   :  { %v8898_v28 = vmax.f32 %v8834_v23, 0.0  ;;  %v11210_v5 = vpop.f32.mrb[36].mxu0 }
 0x37b   :  { %v16381_v46 = vpop.f32.mrb[60].mxu1  ;;  %v11314_v21 = vadd.f32 %v11210_v5, %v16223_v42  ;;  %v8619_v9 = vpop.f32.mrb[37].mxu0 }
 0x37c   :  { %v8966_v8 = vadd.f32 %v8898_v28, %v8897_v14  ;;  %v16384_v34 = vpop.f32.mrb[61].mxu1  ;;  %v11315_v60 = vadd.f32 %v8619_v9, %v16225_v41  ;;  %v11211_v58 = vpop.f32.mrb[38].mxu0 }
 0x37d   :  { %v16387_v35 = vpop.f32.mrb[62].mxu1  ;;  %v11316_v48 = vadd.f32 %v11211_v58, %v16227_v33  ;;  %v8622_v52 = vpop.f32.mrb[39].mxu0  ;;  %v8839_v11 = vadd.f32 %v11314_v21, %v16246_v54 }
 0x37e   :  { %v8967_v57 = vadd.f32 %v8966_v8, %v8899_v50  ;;  %v8837_v56 = vadd.f32 %v11315_v60, %v16246_v54  ;;  %v16391_v12 = vpop.f32.mrb[63].mxu1  ;;  %v11317_v42 = vadd.f32 %v8622_v52, %v16229_v27 }
 0x37f   :  { %v8840_v29 = vadd.f32 %v11316_v48, %v16246_v54  ;;  %v8903_v63 = vmax.f32 %v8839_v11, 0.0 }
 0x380   :  { %v8901_v37 = vmax.f32 %v8837_v56, 0.0  ;;  %v8968_v26 = vadd.f32 %v8967_v57, %v8900_v20  ;;  %v8838_v41 = vadd.f32 %v11317_v42, %v16246_v54 }
 0x381   :  { %v8904_v16 = vmax.f32 %v8840_v29, 0.0 }
 0x382   :  { %v8969_v53 = vadd.f32 %v8968_v26, %v8901_v37  ;;  %v8902_v55 = vmax.f32 %v8838_v41, 0.0  ;;  %v11214_v33 = vpop.f32.mrb[40].mxu0 }
 0x383   :  { %v11318_v61 = vadd.f32 %v11214_v33, %v16231_v44  ;;  %v8635_v38 = vpop.f32.mrb[41].mxu0 }
 0x384   :  { %v8970_v59 = vadd.f32 %v8969_v53, %v8902_v55  ;;  %v11319_v17 = vadd.f32 %v8635_v38, %v16233_v25  ;;  %v11215_v45 = vpop.f32.mrb[42].mxu0 }
 0x385   :  { %v11320_v27 = vadd.f32 %v11215_v45, %v16235_v39  ;;  %v8638_v47 = vpop.f32.mrb[43].mxu0  ;;  %v8843_v23 = vadd.f32 %v11318_v61, %v16246_v54 }
 0x386   :  { %v8971_v10 = vadd.f32 %v8970_v59, %v8903_v63  ;;  %v8841_v4 = vadd.f32 %v11319_v17, %v16246_v54  ;;  %v11321_v22 = vadd.f32 %v8638_v47, %v16237_v24 }
 0x387   :  { %v8844_v5 = vadd.f32 %v11320_v27, %v16246_v54  ;;  %v8907_v50 = vmax.f32 %v8843_v23, 0.0 }
 0x388   :  { %v8905_v14 = vmax.f32 %v8841_v4, 0.0  ;;  %v8972_v13 = vadd.f32 %v8971_v10, %v8904_v16  ;;  %v8842_v44 = vadd.f32 %v11321_v22, %v16246_v54 }
 0x389   :  { %v8908_v52 = vmax.f32 %v8844_v5, 0.0 }
 0x38a   :  { %v8973_v28 = vadd.f32 %v8972_v13, %v8905_v14  ;;  %v8906_v25 = vmax.f32 %v8842_v44, 0.0  ;;  %v11218_v21 = vpop.f32.mrb[44].mxu0 }
 0x38b   :  { %v11322_v39 = vadd.f32 %v11218_v21, %v16315_v15  ;;  %v8651_v9 = vpop.f32.mrb[45].mxu0 }
 0x38c   :  { %v8974_v8 = vadd.f32 %v8973_v28, %v8906_v25  ;;  %v11323_v60 = vadd.f32 %v8651_v9, %v16318_v36  ;;  %v11219_v58 = vpop.f32.mrb[46].mxu0 }
 0x38d   :  { %v11324_v24 = vadd.f32 %v11219_v58, %v16321_v43  ;;  %v8654_v48 = vpop.f32.mrb[47].mxu0  ;;  %v8847_v42 = vadd.f32 %v11322_v39, %v16246_v54 }
 0x38e   :  { %v8975_v20 = vadd.f32 %v8974_v8, %v8907_v50  ;;  %v8845_v57 = vadd.f32 %v11323_v60, %v16246_v54  ;;  %v11325_v56 = vadd.f32 %v8654_v48, %v16325_v40 }
 0x38f   :  { %v8848_v41 = vadd.f32 %v11324_v24, %v16246_v54  ;;  %v8911_v55 = vmax.f32 %v8847_v42, 0.0 }
 0x390   :  { %v8909_v11 = vmax.f32 %v8845_v57, 0.0  ;;  %v8976_v37 = vadd.f32 %v8975_v20, %v8908_v52  ;;  %v8846_v15 = vadd.f32 %v11325_v56, %v16246_v54 }
 0x391   :  { %v8912_v59 = vmax.f32 %v8848_v41, 0.0 }
 0x392   :  { %v8977_v26 = vadd.f32 %v8976_v37, %v8909_v11  ;;  %v8910_v36 = vmax.f32 %v8846_v15, 0.0  ;;  %v11222_v53 = vpop.f32.mrb[48].mxu0 }
 0x393   :  { %v11326_v43 = vadd.f32 %v11222_v53, %v16331_v3  ;;  %v8667_v29 = vpop.f32.mrb[49].mxu0 }
 0x394   :  { %v8978_v33 = vadd.f32 %v8977_v26, %v8910_v36  ;;  %v11327_v61 = vadd.f32 %v8667_v29, %v16334_v0  ;;  %v11223_v38 = vpop.f32.mrb[50].mxu0 }
 0x395   :  { %v11328_v40 = vadd.f32 %v11223_v38, %v16337_v51  ;;  %v8670_v63 = vpop.f32.mrb[51].mxu0  ;;  %v8851_v47 = vadd.f32 %v11326_v43, %v16246_v54 }
 0x396   :  { %v8979_v17 = vadd.f32 %v8978_v33, %v8911_v55  ;;  %v8849_v45 = vadd.f32 %v11327_v61, %v16246_v54  ;;  %v11329_v27 = vadd.f32 %v8670_v63, %v16341_v31  ;;  %v8960_v55 = vrot.slane %v16376_v32, 4 }
 0x397   :  { %v8852_v22 = vadd.f32 %v11328_v40, %v16246_v54  ;;  %v8915_v13 = vmax.f32 %v8851_v47, 0.0 }
 0x398   :  { %v8913_v16 = vmax.f32 %v8849_v45, 0.0  ;;  %v8980_v10 = vadd.f32 %v8979_v17, %v8912_v59  ;;  %v8850_v3 = vadd.f32 %v11329_v27, %v16246_v54  ;;  %v8961_v45 = vadd.f32 %v8960_v55, %v16376_v32 }
 0x399   :  { %v8916_v21 = vmax.f32 %v8852_v22, 0.0 }
 0x39a   :  { %v8981_v4 = vadd.f32 %v8980_v10, %v8913_v16  ;;  %v8914_v0 = vmax.f32 %v8850_v3, 0.0  ;;  %v11226_v23 = vpop.f32.mrb[52].mxu0 }
 0x39b   :  { %v11330_v51 = vadd.f32 %v11226_v23, %v16347_v7  ;;  %v8683_v14 = vpop.f32.mrb[53].mxu0 }
 0x39c   :  { %v8982_v44 = vadd.f32 %v8981_v4, %v8914_v0  ;;  %v11331_v28 = vadd.f32 %v8683_v14, %v16350_v18  ;;  %v11227_v5 = vpop.f32.mrb[54].mxu0 }
 0x39d   :  { %v11332_v31 = vadd.f32 %v11227_v5, %v16353_v2  ;;  %v8686_v25 = vpop.f32.mrb[55].mxu0  ;;  %v8855_v8 = vadd.f32 %v11330_v51, %v16246_v54  ;;  %v8962_v51 = vrot.slane %v8961_v45, 2 }
 0x39e   :  { %v8983_v39 = vadd.f32 %v8982_v44, %v8915_v13  ;;  %v8853_v9 = vadd.f32 %v11331_v28, %v16246_v54  ;;  %v11333_v50 = vadd.f32 %v8686_v25, %v16357_v6 }
 0x39f   :  { %v8856_v48 = vadd.f32 %v11332_v31, %v16246_v54  ;;  %v8919_v57 = vmax.f32 %v8855_v8, 0.0  ;;  %v8963_v44 = vadd.f32 %v8962_v51, %v8961_v45 }
 0x3a0   :  { %v8917_v60 = vmax.f32 %v8853_v9, 0.0  ;;  %v8984_v58 = vadd.f32 %v8983_v39, %v8916_v21  ;;  %v8854_v7 = vadd.f32 %v11333_v50, %v16246_v54 }
 0x3a1   :  { %v8920_v15 = vmax.f32 %v8856_v48, 0.0  ;;  %v8964_v25 = vrot.slane %v8963_v44, 1 }
 0x3a2   :  { %v8985_v24 = vadd.f32 %v8984_v58, %v8917_v60  ;;  %v8918_v18 = vmax.f32 %v8854_v7, 0.0  ;;  %v11230_v52 = vpop.f32.mrb[56].mxu0 }
 0x3a3   :  { %v11334_v2 = vadd.f32 %v11230_v52, %v16363_v62  ;;  %v8699_v20 = vpop.f32.mrb[57].mxu0  ;;  %v8965_v39 = vadd.f32 %v8964_v25, %v8963_v44 }
 0x3a4   :  { %v8986_v56 = vadd.f32 %v8985_v24, %v8918_v18  ;;  %v11335_v42 = vadd.f32 %v8699_v20, %v16366_v1  ;;  %v11231_v11 = vpop.f32.mrb[58].mxu0 }
 0x3a5   :  { %v11336_v6 = vadd.f32 %v11231_v11, %v16369_v30  ;;  %v8702_v37 = vpop.f32.mrb[59].mxu0  ;;  %v8859_v53 = vadd.f32 %v11334_v2, %v16246_v54  ;;  %v9004_v8 = vmul.f32 0.00390625, %v8965_v39  ;;  %v11906_v2 = vld [vmem:[%s16493_s5] sm:$0xff]  }
 0x3a6   :  { %v8987_v26 = vadd.f32 %v8986_v56, %v8919_v57  ;;  %v8857_v41 = vadd.f32 %v11335_v42, %v16246_v54  ;;  %v11337_v36 = vadd.f32 %v8702_v37, %v16373_v19  ;;  %v11907_v57 = vld [vmem:[%s16493_s5 + $0x8] sm:$0xff]   ;;  %v11908_v56 = vld [vmem:[%s16493_s5 + $0x10] sm:$0xff]   ;;  %v11909_v42 = vld [vmem:[%s16493_s5 + $0x18] sm:$0xff]  }
 0x3a7   :  { %v8860_v1 = vadd.f32 %v11336_v6, %v16246_v54  ;;  %v8923_v63 = vmax.f32 %v8859_v53, 0.0  ;;  %v9006_v7 = vpack.c.bf16 %v9004_v8, %v9004_v8  ;;  %v11910_v11 = vld [vmem:[%s16493_s5 + $0x20] sm:$0xff]   ;;  %v11911_v6 = vld [vmem:[%s16493_s5 + $0x28] sm:$0xff]   ;;  %v11912_v37 = vld [vmem:[%s16493_s5 + $0x30] sm:$0xff]  }
 0x3a8   :  { %v8921_v43 = vmax.f32 %v8857_v41, 0.0  ;;  %v8988_v29 = vadd.f32 %v8987_v26, %v8920_v15  ;;  %v8858_v62 = vadd.f32 %v11337_v36, %v16246_v54  ;;  %v11913_v15 = vld [vmem:[%s16493_s5 + $0x38] sm:$0xff]   ;;  %v10309_v26 = vld [vmem:[%s16494_s4] ss:$0 sm:$0xff] }
 0x3a9   :  { %v8924_v16 = vmax.f32 %v8860_v1, 0.0 }
 0x3aa   :  { %v8989_v33 = vadd.f32 %v8988_v29, %v8921_v43  ;;  %v8922_v61 = vmax.f32 %v8858_v62, 0.0  ;;  %v11234_v30 = vpop.f32.mrb[60].mxu0 }
 0x3ab   :  { %v11338_v38 = vadd.f32 %v11234_v30, %v16381_v46  ;;  %v8715_v40 = vpop.f32.mrb[61].mxu0 }
 0x3ac   :  { %v8990_v59 = vadd.f32 %v8989_v33, %v8922_v61  ;;  %v11339_v19 = vadd.f32 %v8715_v40, %v16384_v34  ;;  %v11235_v17 = vpop.f32.mrb[62].mxu0 }
 0x3ad   :  { %v11340_v27 = vadd.f32 %v11235_v17, %v16387_v35  ;;  %v8718_v47 = vpop.f32.mrb[63].mxu0  ;;  %v8863_v22 = vadd.f32 %v11338_v38, %v16246_v54 }
 0x3ae   :  { %v8991_v10 = vadd.f32 %v8990_v59, %v8923_v63  ;;  %v8861_v3 = vadd.f32 %v11339_v19, %v16246_v54  ;;  %v11341_v4 = vadd.f32 %v8718_v47, %v16391_v12 }
 0x3af   :  { %v8864_v14 = vadd.f32 %v11340_v27, %v16246_v54  ;;  %v8927_v13 = vmax.f32 %v8863_v22, 0.0 }
 0x3b0   :  { %v8925_v46 = vmax.f32 %v8861_v3, 0.0  ;;  %v8992_v0 = vadd.f32 %v8991_v10, %v8924_v16  ;;  %v8862_v23 = vadd.f32 %v11341_v4, %v16246_v54  ;;  %v9033_v54 = vunpack.c.l.b16 %v9006_v7 }
 0x3b1   :  { %v8928_v28 = vmax.f32 %v8864_v14, 0.0 }
 0x3b2   :  { %v8993_v34 = vadd.f32 %v8992_v0, %v8925_v46  ;;  %v8926_v32 = vmax.f32 %v8862_v23, 0.0 }
 0x3b4   :  { %v8994_v35 = vadd.f32 %v8993_v34, %v8926_v32 }
 0x3b6   :  { %v8995_v5 = vadd.f32 %v8994_v35, %v8927_v13 }
 0x3b8   :  { %v8996_v31 = vadd.f32 %v8995_v5, %v8928_v28 }
 0x3ba   :  { %v8997_v21 = vrot.slane %v8996_v31, 4 }
 0x3bc   :  { %v8998_v12 = vadd.f32 %v8997_v21, %v8996_v31 }
 0x3be   :  { %v8999_v9 = vrot.slane %v8998_v12, 2 }
 0x3c0   :  { %v9000_v50 = vadd.f32 %v8999_v9, %v8998_v12 }
 0x3c2   :  { %v9001_v60 = vrot.slane %v9000_v50, 1 }
 0x3c4   :  { %v9002_v58 = vadd.f32 %v9001_v60, %v9000_v50 }
 0x3c6   :  { %v9005_v24 = vmul.f32 0.00390625, %v9002_v58 }
 0x3c8   :  { %v9007_v48 = vpack.c.bf16 %v9005_v24, %v9005_v24 }
 0x3ca   :  { %v9034_v18 = vunpack.c.l.b16 %v9007_v48 }
 0x3cc   :  { %v9036_v52 = vsel %vm9035_vm9, %v9034_v18, %v9033_v54 }
 0x3cd   :  { %v9037_v20 = vpack.c.b16 %v9036_v52, %v9036_v52 }
 0x3cf   :  { %11253 = vmatmul.mubr.bf16.vlgmr.msra.gmra.mrb[64].mxu1 %v9037_v20 }
 0x3d0   :  { %11257 = vmatpush3.bf16.msra.mxu1 %v11906_v2  ;;  %11272 = vmatprep.mubr.msk.bf16.mxu1 %vm12131_vm8, %v12130_v49 }
 0x3d1   :  { %11258 = vmatprep.subr.bf16.mxu1 %v12130_v49 }
 0x3d4   :  { %11259 = vmatpush3.bf16.msra.mxu1 %v11907_v57 }
 0x3d5   :  { %11260 = vmatprep.subr.bf16.mxu1 %v12130_v49 }
 0x3d8   :  { %11261 = vmatpush3.bf16.msra.mxu1 %v11908_v56 }
 0x3d9   :  { %11262 = vmatprep.subr.bf16.mxu1 %v12130_v49 }
 0x3dc   :  { %11263 = vmatpush3.bf16.msra.mxu1 %v11909_v42 }
 0x3dd   :  { %11264 = vmatprep.subr.bf16.mxu1 %v12130_v49 }
 0x3e0   :  { %11265 = vmatpush3.bf16.msra.mxu1 %v11910_v11 }
 0x3e1   :  { %11266 = vmatprep.subr.bf16.mxu1 %v12130_v49 }
 0x3e4   :  { %11267 = vmatpush3.bf16.msra.mxu1 %v11911_v6 }
 0x3e5   :  { %11268 = vmatprep.subr.bf16.mxu1 %v12130_v49 }
 0x3e8   :  { %11269 = vmatpush3.bf16.msra.mxu1 %v11912_v37 }
 0x3e9   :  { %11270 = vmatprep.subr.bf16.mxu1 %v12130_v49  ;;  %v10318_v49 = vld [vmem:[%s16495_s6] ss:$0 sm:$0xff] }
 0x3ec   :  { %11271 = vmatpush3.bf16.msra.mxu1 %v11913_v15 }
 0x4a2   :  { %v9121_v41 = vpop.f32.mrb[64].mxu1 }
 0x4a3   :  { %v9122_v36 = vadd.f32 %v10309_v26, %v9121_v41  ;;  %v11254_v53 = vpop.f32.mrb[65].mxu1 }
 0x4a4   :  { %v9124_v43 = vpop.f32.mrb[66].mxu1 }
 0x4a5   :  { %v9127_v29 = vpack.c.bf16 %v9122_v36, %v9122_v36  ;;  %v11255_v62 = vpop.f32.mrb[67].mxu1 }
 0x4a7   :  { %11273 = vmatmul.mubr.bf16.vlgmr.msra.gmra.mrb[68].mxu1 %v9127_v29 }
 0x57a   :  { %v9233_v55 = vpop.f32.mrb[68].mxu1 }
 0x57b   :  { %v9234_v33 = vadd.f32 %v10318_v49, %v9233_v55  ;;  %v11274_v1 = vpop.f32.mrb[69].mxu1 }
 0x57c   :  { %v9236_v61 = vpop.f32.mrb[70].mxu1 }
 0x57d   :  { %9239 = vst [vmem:[%s16496_s7] sm:$0x3] %v9234_v33  ;;  %v11275_v30 = vpop.f32.mrb[71].mxu1 }

</bundles_post_ra>
